<compile_context>
chip_gen: v7x
topology: tpu7x:2x2x1
jax: 0.10.0
libtpu: 0.0.40
codegen_flags: <defaults>
</compile_context>

<pallas_src>
import math
from collections import namedtuple
from functools import partial

import jax
import jax.numpy as jnp
from jax import lax
from jax.experimental import pallas as pl
from jax.experimental.pallas import tpu as pltpu

_LANE = 128
_SUBLANE = 8


def _round_up(n, m):
    return ((n + m - 1) // m) * m


# -----------------------------------------------------------------------------
# Capability probe: can grid-invariant operands be single-buffered via
# pipeline_mode=pl.Buffered(1)?  (Halves the resident R.T footprint on v7x's
# 64 MiB VMEM.)  Falls back to default double-buffering if unsupported.
# -----------------------------------------------------------------------------
_SINGLE_BUFFER_OK = None


def _probe_kernel(a_ref, r_ref, o_ref):
    o_ref[...] = a_ref[...] + r_ref[...]


def _single_buffer_supported():
    global _SINGLE_BUFFER_OK
    if _SINGLE_BUFFER_OK is not None:
        return _SINGLE_BUFFER_OK
    try:
        a = jnp.zeros((2 * _SUBLANE, _LANE), jnp.float32)
        r = jnp.ones((_SUBLANE, _LANE), jnp.float32)
        out = pl.pallas_call(
            _probe_kernel,
            out_shape=jax.ShapeDtypeStruct((2 * _SUBLANE, _LANE), jnp.float32),
            grid=(2,),
            in_specs=[
                pl.BlockSpec((_SUBLANE, _LANE), lambda t: (t, 0)),
                pl.BlockSpec((_SUBLANE, _LANE), lambda t: (0, 0),
                             pipeline_mode=pl.Buffered(1)),
            ],
            out_specs=pl.BlockSpec((_SUBLANE, _LANE), lambda t: (t, 0)),
        )(a, r)
        ok = bool(jax.block_until_ready(jnp.all(out == 1.0)))
    except Exception:
        ok = False
    _SINGLE_BUFFER_OK = ok
    return ok


def _vmem_capacity_bytes():
    """Physical VMEM of the current chip (conservative 64 MiB fallback)."""
    try:
        info = pltpu.get_tpu_info()
        return int(getattr(info, "vmem_capacity_bytes", 64 * 1024 * 1024))
    except Exception:
        return 64 * 1024 * 1024


# -----------------------------------------------------------------------------
# Static configuration (resolved OUTSIDE jit: probes hardware, picks tile sizes)
# -----------------------------------------------------------------------------
_LstmCfg = namedtuple(
    "_LstmCfg",
    ["mxu_dtype", "gx_dtype", "hp", "bp", "tc", "unroll",
     "single_buf", "vmem_limit", "proj_precision"])


def _resolve_config(T, B, H, x_dtype, mxu_dtype, time_chunk, unroll,
                    proj_precision):
    hp = max(_round_up(H, _LANE), _LANE)          # per-gate lane-dense padding
    bp = _round_up(max(B, 1), _SUBLANE)

    mxu = None if mxu_dtype is None else jnp.dtype(mxu_dtype)
    gx_dtype = jnp.dtype(jnp.float32) if mxu is None else mxu
    gx_item = gx_dtype.itemsize
    rt_item = 4 if mxu is None else mxu.itemsize
    out_item = jnp.dtype(x_dtype).itemsize

    # Generation-aware VMEM budget: ~48 MiB on v7x (64 MiB physical),
    # ~96 MiB on v5e/v6e (128 MiB physical).
    cap = max(32 * 2**20, (_vmem_capacity_bytes() * 3) // 4)

    single_buf = _single_buffer_supported()
    res_bufs = 1 if single_buf else 2
    resident = res_bufs * (hp * 4 * hp * rt_item + 2 * bp * hp * 4)  # R.T + y0/c0
    scratch = 2 * bp * hp * 4                                        # carried state

    # Streamed (double-buffered) bytes per time step: Gx chunk + y/c outputs.
    stream_per_t = 2 * bp * (4 * hp * gx_item + 2 * hp * out_item)
    if time_chunk is not None:
        tc = max(1, int(time_chunk))
    else:
        stream_budget = max(stream_per_t, (cap - resident - scratch) * 2 // 3)
        tc = int(max(1, min(64, T, stream_budget // stream_per_t)))

    if unroll is not None:
        unr = max(1, min(int(unroll), tc))
    else:
        # Live values per unrolled step ~ 6*bp*hp f32 (4 gate slabs + c + y);
        # back off the unroll factor before it blows the 256 KiB vreg file.
        step_bytes = 6 * bp * hp * 4
        if step_bytes <= 32 * 1024:
            unr = min(tc, 8)
        elif step_bytes <= 96 * 1024:
            unr = min(tc, 4)
        else:
            unr = min(tc, 2)

    vmem_est = tc * stream_per_t + resident + scratch
    vmem_limit = int(min(cap, max(vmem_est * 3 // 2, 32 * 2**20)))
    # TODO(synk): for very large H on v7x (resident R.T approaching the cap) the
    # 4H axis of R.T should itself be tiled inside the kernel; not implemented.

    return _LstmCfg(mxu_dtype=mxu, gx_dtype=gx_dtype, hp=hp, bp=bp, tc=tc,
                    unroll=unr, single_buf=single_buf, vmem_limit=vmem_limit,
                    proj_precision=proj_precision)


# -----------------------------------------------------------------------------
# Kernel: one grid step == one chunk of `tc` LSTM time steps
# -----------------------------------------------------------------------------
def _lstm_chunk_kernel(gx_ref, rt_ref, y0_ref, c0_ref,
                       y_out_ref, c_out_ref,
                       y_state, c_state, *, unroll):
    """gx_ref : (tc, Bp, 4*Hp)  x@W.T + b, per-gate 128-lane padded (f32 or bf16)
    rt_ref : (Hp, 4*Hp)       R.T, gate-padded (grid-invariant / resident)
    y0_ref, c0_ref : (Bp, Hp) initial state (only read on chunk 0)
    y_out_ref, c_out_ref : (tc, Bp, Hp) lane-dense outputs
    y_state, c_state : (Bp, Hp) f32 VMEM scratch carrying the recurrence
    """
    tchunk = pl.program_id(0)
    tc = gx_ref.shape[0]
    hp = y_state.shape[-1]
    rt_dtype = rt_ref.dtype

    @pl.when(tchunk == 0)
    def _():
        y_state[...] = y0_ref[...].astype(jnp.float32)
        c_state[...] = c0_ref[...].astype(jnp.float32)

    def sigmoid(v):
        # sigmoid(x) == 0.5*tanh(0.5*x) + 0.5 : 1 EUP push instead of exp+recip.
        return 0.5 * jnp.tanh(0.5 * v) + 0.5

    def gate_pre(i, ym, k):
        # Per-gate 128-lane-aligned column slab of R.T streamed from VMEM inside
        # the step (no (Hp,4Hp) value held live across the unrolled loop).
        rec = jnp.dot(ym, rt_ref[:, k * hp:(k + 1) * hp],
                      preferred_element_type=jnp.float32)
        return gx_ref[i, :, k * hp:(k + 1) * hp].astype(jnp.float32) + rec

    def step(i, carry):
        y_prev, c_prev = carry
        ym = y_prev.astype(rt_dtype)
        # o-gate dot first: its EUP nonlinearity overlaps the remaining MXU dots.
        pre_o = gate_pre(i, ym, 3)
        pre_i = gate_pre(i, ym, 0)
        pre_f = gate_pre(i, ym, 1)
        pre_g = gate_pre(i, ym, 2)
        o_g = sigmoid(pre_o)
        i_g = sigmoid(pre_i)
        f_g = sigmoid(pre_f)
        g_g = jnp.tanh(pre_g)
        c_new = f_g * c_prev + i_g * g_g          # f32 elementwise math
        y_new = o_g * jnp.tanh(c_new)
        y_out_ref[i] = y_new.astype(y_out_ref.dtype)
        c_out_ref[i] = c_new.astype(c_out_ref.dtype)
        return y_new, c_new

    y_fin, c_fin = lax.fori_loop(0, tc, step,
                                 (y_state[...], c_state[...]),
                                 unroll=unroll)
    y_state[...] = y_fin
    c_state[...] = c_fin


# -----------------------------------------------------------------------------
# Wrapper
# -----------------------------------------------------------------------------
@partial(jax.jit, static_argnames=("cfg",))
def _lstm_forward_impl(x, y0, c0, W, R, bW, bR, *, cfg):
    T, B, I = x.shape
    H = W.shape[0] // 4
    out_dtype = x.dtype
    Hp, Bp, Tc = cfg.hp, cfg.bp, cfg.tc
    Tp = _round_up(T, Tc)
    n_chunks = Tp // Tc

    # ---- Pad the SMALL tensors (weights/bias/x/state) to the per-gate layout
    #      BEFORE the hoisted matmul, so Gx is produced already padded. ----
    Wp = jnp.pad(W.reshape(4, H, I),
                 ((0, 0), (0, Hp - H), (0, 0))).reshape(4 * Hp, I)
    bias = jnp.pad((bW + bR).astype(jnp.float32).reshape(4, H),
                   ((0, 0), (0, Hp - H))).reshape(4 * Hp)
    rt = jnp.pad(R.T.reshape(H, 4, H),
                 ((0, Hp - H), (0, 0), (0, Hp - H))).reshape(Hp, 4 * Hp)
    xp = jnp.pad(x, ((0, Tp - T), (0, Bp - B), (0, 0)))
    y0p = jnp.pad(y0, ((0, Bp - B), (0, Hp - H))).astype(jnp.float32)
    c0p = jnp.pad(c0, ((0, Bp - B), (0, Hp - H))).astype(jnp.float32)

    if cfg.mxu_dtype is not None:
        xp = xp.astype(cfg.mxu_dtype)
        Wp = Wp.astype(cfg.mxu_dtype)
        rt = rt.astype(cfg.mxu_dtype)

    # ---- 1. Hoisted input projection: one large MXU matmul, f32 accumulate,
    #         bias fused, then stored in gx_dtype (bf16 on the bf16 path). ----
    gx = jnp.dot(xp.reshape(Tp * Bp, I), Wp.T,
                 preferred_element_type=jnp.float32,
                 precision=cfg.proj_precision)
    gx = (gx + bias[None, :]).astype(cfg.gx_dtype).reshape(Tp, Bp, 4 * Hp)

    # ---- 2. Serial recurrence, chunked over time, one Pallas call. ----
    resident_kwargs = {}
    if cfg.single_buf:
        # Grid-invariant operands: single-buffer them (frees VMEM, esp. on v7x).
        resident_kwargs["pipeline_mode"] = pl.Buffered(1)

    grid_spec = pltpu.PrefetchScalarGridSpec(
        num_scalar_prefetch=0,
        grid=(n_chunks,),
        in_specs=[
            pl.BlockSpec((Tc, Bp, 4 * Hp), lambda t: (t, 0, 0)),            # Gx
            pl.BlockSpec((Hp, 4 * Hp), lambda t: (0, 0), **resident_kwargs),  # R.T
            pl.BlockSpec((Bp, Hp), lambda t: (0, 0), **resident_kwargs),      # y0
            pl.BlockSpec((Bp, Hp), lambda t: (0, 0), **resident_kwargs),      # c0
        ],
        out_specs=[
            pl.BlockSpec((Tc, Bp, Hp), lambda t: (t, 0, 0)),                 # y
            pl.BlockSpec((Tc, Bp, Hp), lambda t: (t, 0, 0)),                 # c
        ],
        scratch_shapes=[
            pltpu.VMEM((Bp, Hp), jnp.float32),                               # y carry
            pltpu.VMEM((Bp, Hp), jnp.float32),                               # c carry
        ],
    )

    # TODO(synk): when several independent sequences / directions / layers are
    # available, fuse their batches so Bp >= 128 (fills MXU rows) and add a
    # leading "parallel" grid axis to use the second TensorCore on v7x; a single
    # recurrence is inherently serial.
    y_pad, c_pad = pl.pallas_call(
        partial(_lstm_chunk_kernel, unroll=cfg.unroll),
        out_shape=(jax.ShapeDtypeStruct((Tp, Bp, Hp), out_dtype),
                   jax.ShapeDtypeStruct((Tp, Bp, Hp), out_dtype)),
        grid_spec=grid_spec,
        compiler_params=pltpu.CompilerParams(
            dimension_semantics=("arbitrary",),   # time carries the recurrence
            vmem_limit_bytes=cfg.vmem_limit),
    )(gx, rt, y0p, c0p)

    return y_pad[:T, :B, :H], c_pad[:T, :B, :H]


def lstm_layer_forward(x, y0, c0, W, R, bW, bR, *, mxu_dtype=jnp.bfloat16,
                       time_chunk=None, unroll=None, proj_precision=None):
    """Pallas implementation of Layer.forward (SoftLayer activations, no dropout).

    Args:
      x : (T, B, I)  input sequence.        y0, c0 : (B, H) initial state.
      W : (4H, I) weight_ih.  R : (4H, H) weight_hh.  bW, bR : (4H,) biases.
      mxu_dtype:      dtype for MXU operands and the stored Gx stream
                      (bf16 default; None keeps everything f32).
      time_chunk:     time steps per grid step (default: VMEM-budget adaptive).
      unroll:         inner-loop unroll factor (default: vreg-pressure adaptive).
      proj_precision: lax.Precision for the hoisted projection (default: DEFAULT).

    Returns:
      (y, c): each (T, B, H) — stacked hidden / cell states y1..yT, c1..cT.

    Note: call this function directly (do not wrap it in jax.jit); the array
    work is already jitted internally and the config resolution (hardware probe,
    tile sizing) must run at Python level.
    """
    T, B, I = x.shape
    H = W.shape[0] // 4
    assert W.shape == (4 * H, I) and R.shape == (4 * H, H)
    cfg = _resolve_config(T, B, H, x.dtype, mxu_dtype, time_chunk, unroll,
                          proj_precision)
    return _lstm_forward_impl(x, y0, c0, W, R, bW, bR, cfg=cfg)


# -----------------------------------------------------------------------------
# Pure-JAX reference matching the PyTorch semantics (soft activations)
# -----------------------------------------------------------------------------
def _reference_lstm(x, y0, c0, W, R, bW, bR):
    H = R.shape[1]
    bias = bW + bR

    def step(carry, x_t):
        y_prev, c_prev = carry
        gates = x_t @ W.T + y_prev @ R.T + bias
        i_g = jax.nn.sigmoid(gates[:, 0 * H:1 * H])
        f_g = jax.nn.sigmoid(gates[:, 1 * H:2 * H])
        g_g = jnp.tanh(gates[:, 2 * H:3 * H])
        o_g = jax.nn.sigmoid(gates[:, 3 * H:4 * H])
        c_new = f_g * c_prev + i_g * g_g
        y_new = o_g * jnp.tanh(c_new)
        return (y_new, c_new), (y_new, c_new)

    (_, _), (ys, cs) = lax.scan(step, (y0, c0), x)
    return ys, cs


if __name__ == "__main__":
    # Small shapes consistent with the module: x is (T, B, input_size).
    T, B, I, H = 8, 8, 32, 32

    key = jax.random.PRNGKey(0)
    k_x, k_y0, k_c0, k_w, k_r, k_bw, k_br = jax.random.split(key, 7)

    rsh = 1.0 / math.sqrt(H)  # same init range as the PyTorch module
    x = jax.random.normal(k_x, (T, B, I), dtype=jnp.float32)
    y0 = jax.random.normal(k_y0, (B, H), dtype=jnp.float32) * 0.1
    c0 = jax.random.normal(k_c0, (B, H), dtype=jnp.float32) * 0.1
    W = jax.random.uniform(k_w, (4 * H, I), minval=-rsh, maxval=rsh, dtype=jnp.float32)
    R = jax.random.uniform(k_r, (4 * H, H), minval=-rsh, maxval=rsh, dtype=jnp.float32)
    bW = jax.random.uniform(k_bw, (4 * H,), minval=-rsh, maxval=rsh, dtype=jnp.float32)
    bR = jax.random.uniform(k_br, (4 * H,), minval=-rsh, maxval=rsh, dtype=jnp.float32)

    # TODO(synk): the "hard" activation variant (HardLayer), recurrent-weight
    # dropout (rw_dropout) and the custom backward pass are not implemented;
    # only the SoftLayer forward path is exercised here.

    y_ref, c_ref = _reference_lstm(x, y0, c0, W, R, bW, bR)

    # f32 MXU path, single chunk — tight check against the f32 reference.
    y32, c32 = lstm_layer_forward(x, y0, c0, W, R, bW, bR, mxu_dtype=None)
    y32 = jax.block_until_ready(y32)
    c32 = jax.block_until_ready(c32)
    assert y32.shape == (T, B, H) and c32.shape == (T, B, H)
    assert jnp.allclose(y32, y_ref, atol=2e-4, rtol=2e-4)
    assert jnp.allclose(c32, c_ref, atol=2e-4, rtol=2e-4)

    # f32 path, multi-chunk grid (T not a multiple of the chunk) + partial unroll
    # — exercises the carried-state scratch across grid steps and time padding.
    y_mc, c_mc = lstm_layer_forward(x, y0, c0, W, R, bW, bR, mxu_dtype=None,
                                    time_chunk=3, unroll=2)
    y_mc = jax.block_until_ready(y_mc)
    c_mc = jax.block_until_ready(c_mc)
    assert jnp.allclose(y_mc, y_ref, atol=2e-4, rtol=2e-4)
    assert jnp.allclose(c_mc, c_ref, atol=2e-4, rtol=2e-4)

    # bf16 MXU operands + bf16 Gx stream (f32 accumulation / gate math) — looser.
    y16, c16 = lstm_layer_forward(x, y0, c0, W, R, bW, bR, mxu_dtype=jnp.bfloat16)
    y16 = jax.block_until_ready(y16)
    c16 = jax.block_until_ready(c16)
    assert y16.shape == (T, B, H) and c16.shape == (T, B, H)
    assert jnp.allclose(y16, y_ref, atol=5e-2, rtol=5e-2)
    assert jnp.allclose(c16, c_ref, atol=5e-2, rtol=5e-2)

    print("KERNEL_OK")
</pallas_src>

<mosaic_0001>
module attributes {stable_mosaic.version = 11 : i64} {
  func.func @_probe_kernel(%arg0: i32, %arg1: memref<8x128xf32, #tpu.memory_space<vmem>>, %arg2: memref<8x128xf32, #tpu.memory_space<vmem>>, %arg3: memref<8x128xf32, #tpu.memory_space<vmem>>) attributes {dimension_semantics = [#tpu.dimension_semantics<arbitrary>], iteration_bounds = array<i64: 2>, scalar_prefetch = 0 : i64, scratch_operands = 0 : i64, tpu.core_type = #tpu.core_type<tc>, window_params = [{transform_indices = @transform_0, window_bounds = array<i64: 8, 128>}, {pipeline_mode = #tpu.pipeline_mode<synchronous>, transform_indices = @transform_1, window_bounds = array<i64: 8, 128>}, {transform_indices = @transform_2, window_bounds = array<i64: 8, 128>}]} {
    %c0 = arith.constant 0 : index
    %c0_0 = arith.constant 0 : index
    %0 = vector.load %arg1[%c0, %c0_0] : memref<8x128xf32, #tpu.memory_space<vmem>>, vector<8x128xf32>
    %c0_1 = arith.constant 0 : index
    %c0_2 = arith.constant 0 : index
    %1 = vector.load %arg2[%c0_1, %c0_2] : memref<8x128xf32, #tpu.memory_space<vmem>>, vector<8x128xf32>
    %2 = arith.addf %0, %1 : vector<8x128xf32>
    %c0_3 = arith.constant 0 : index
    %c0_4 = arith.constant 0 : index
    %3 = vector.load %arg3[%c0_3, %c0_4] : memref<8x128xf32, #tpu.memory_space<vmem>>, vector<8x128xf32>
    tpu.vector_store %arg3[%c0_3, %c0_4], %2 {strides = array<i32>} : memref<8x128xf32, #tpu.memory_space<vmem>>, vector<8x128xf32>,
    return
  }
  func.func @transform_0(%arg0: i32) -> (i32, i32) {
    %c0_i32 = arith.constant 0 : i32
    %c0_i32_0 = arith.constant 0 : i32
    return %arg0, %c0_i32 : i32, i32
  }
  func.func @transform_1(%arg0: i32) -> (i32, i32) {
    %c0_i32 = arith.constant 0 : i32
    %c0_i32_0 = arith.constant 0 : i32
    %c0_i32_1 = arith.constant 0 : i32
    return %c0_i32, %c0_i32_0 : i32, i32
  }
  func.func @transform_2(%arg0: i32) -> (i32, i32) {
    %c0_i32 = arith.constant 0 : i32
    %c0_i32_0 = arith.constant 0 : i32
    return %arg0, %c0_i32 : i32, i32
  }
}

module attributes {stable_mosaic.version = 11 : i64} {
  func.func @_lstm_chunk_kernel(%arg0: i32, %arg1: memref<8x8x512xf32, #tpu.memory_space<vmem>>, %arg2: memref<128x512xf32, #tpu.memory_space<vmem>>, %arg3: memref<8x128xf32, #tpu.memory_space<vmem>>, %arg4: memref<8x128xf32, #tpu.memory_space<vmem>>, %arg5: memref<8x8x128xf32, #tpu.memory_space<vmem>>, %arg6: memref<8x8x128xf32, #tpu.memory_space<vmem>>, %arg7: memref<8x128xf32, #tpu.memory_space<vmem>>, %arg8: memref<8x128xf32, #tpu.memory_space<vmem>>) attributes {dimension_semantics = [#tpu.dimension_semantics<arbitrary>], iteration_bounds = array<i64: 1>, scalar_prefetch = 0 : i64, scratch_operands = 2 : i64, tpu.core_type = #tpu.core_type<tc>, window_params = [{transform_indices = @transform_0, window_bounds = array<i64: 8, 8, 512>}, {pipeline_mode = #tpu.pipeline_mode<synchronous>, transform_indices = @transform_1, window_bounds = array<i64: 128, 512>}, {pipeline_mode = #tpu.pipeline_mode<synchronous>, transform_indices = @transform_2, window_bounds = array<i64: 8, 128>}, {pipeline_mode = #tpu.pipeline_mode<synchronous>, transform_indices = @transform_3, window_bounds = array<i64: 8, 128>}, {transform_indices = @transform_4, window_bounds = array<i64: 8, 8, 128>}, {transform_indices = @transform_5, window_bounds = array<i64: 8, 8, 128>}]} {
    %c0_i32 = arith.constant 0 : i32
    %0 = arith.cmpi eq, %arg0, %c0_i32 : i32
    %1 = arith.extui %0 : i1 to i32
    %c0_i32_0 = arith.constant 0 : i32
    %2 = arith.cmpi ne, %1, %c0_i32_0 : i32
    scf.if %2 {
      %c0_269 = arith.constant 0 : index
      %c0_270 = arith.constant 0 : index
      %479 = vector.load %arg3[%c0_269, %c0_270] : memref<8x128xf32, #tpu.memory_space<vmem>>, vector<8x128xf32>
      %c0_271 = arith.constant 0 : index
      %c0_272 = arith.constant 0 : index
      %480 = vector.load %arg7[%c0_271, %c0_272] : memref<8x128xf32, #tpu.memory_space<vmem>>, vector<8x128xf32>
      tpu.vector_store %arg7[%c0_271, %c0_272], %479 {strides = array<i32>} : memref<8x128xf32, #tpu.memory_space<vmem>>, vector<8x128xf32>,
      %c0_273 = arith.constant 0 : index
      %c0_274 = arith.constant 0 : index
      %481 = vector.load %arg4[%c0_273, %c0_274] : memref<8x128xf32, #tpu.memory_space<vmem>>, vector<8x128xf32>
      %c0_275 = arith.constant 0 : index
      %c0_276 = arith.constant 0 : index
      %482 = vector.load %arg8[%c0_275, %c0_276] : memref<8x128xf32, #tpu.memory_space<vmem>>, vector<8x128xf32>
      tpu.vector_store %arg8[%c0_275, %c0_276], %481 {strides = array<i32>} : memref<8x128xf32, #tpu.memory_space<vmem>>, vector<8x128xf32>,
    } else {
    }
    %c0 = arith.constant 0 : index
    %c0_1 = arith.constant 0 : index
    %3 = vector.load %arg7[%c0, %c0_1] : memref<8x128xf32, #tpu.memory_space<vmem>>, vector<8x128xf32>
    %c0_2 = arith.constant 0 : index
    %c0_3 = arith.constant 0 : index
    %4 = vector.load %arg8[%c0_2, %c0_3] : memref<8x128xf32, #tpu.memory_space<vmem>>, vector<8x128xf32>
    %c0_i32_4 = arith.constant 0 : i32
    %c0_5 = arith.constant 0 : index
    %c384 = arith.constant 384 : index
    %5 = vector.load %arg2[%c0_5, %c384] : memref<128x512xf32, #tpu.memory_space<vmem>>, vector<128x128xf32>
    %cst = arith.constant dense<0.000000e+00> : vector<8x128xf32>
    %6 = tpu.matmul %3, %5, %cst {dimension_numbers = #tpu.dot_dimension_numbers<[1], [0], [0], [1], [0, 0, 1, 1], [], []>} : vector<8x128xf32>, vector<128x128xf32>, vector<8x128xf32> -> vector<8x128xf32>
    %7 = arith.index_cast %c0_i32_4 : i32 to index
    %c0_6 = arith.constant 0 : index
    %c384_7 = arith.constant 384 : index
    %8 = vector.load %arg1[%7, %c0_6, %c384_7] : memref<8x8x512xf32, #tpu.memory_space<vmem>>, vector<1x8x128xf32>
    %9 = vector.shape_cast %8 : vector<1x8x128xf32> to vector<8x128xf32>
    %10 = arith.addf %9, %6 : vector<8x128xf32>
    %c0_8 = arith.constant 0 : index
    %c0_9 = arith.constant 0 : index
    %11 = vector.load %arg2[%c0_8, %c0_9] : memref<128x512xf32, #tpu.memory_space<vmem>>, vector<128x128xf32>
    %cst_10 = arith.constant dense<0.000000e+00> : vector<8x128xf32>
    %12 = tpu.matmul %3, %11, %cst_10 {dimension_numbers = #tpu.dot_dimension_numbers<[1], [0], [0], [1], [0, 0, 1, 1], [], []>} : vector<8x128xf32>, vector<128x128xf32>, vector<8x128xf32> -> vector<8x128xf32>
    %13 = arith.index_cast %c0_i32_4 : i32 to index
    %c0_11 = arith.constant 0 : index
    %c0_12 = arith.constant 0 : index
    %14 = vector.load %arg1[%13, %c0_11, %c0_12] : memref<8x8x512xf32, #tpu.memory_space<vmem>>, vector<1x8x128xf32>
    %15 = vector.shape_cast %14 : vector<1x8x128xf32> to vector<8x128xf32>
    %16 = arith.addf %15, %12 : vector<8x128xf32>
    %c0_13 = arith.constant 0 : index
    %c128 = arith.constant 128 : index
    %17 = vector.load %arg2[%c0_13, %c128] : memref<128x512xf32, #tpu.memory_space<vmem>>, vector<128x128xf32>
    %cst_14 = arith.constant dense<0.000000e+00> : vector<8x128xf32>
    %18 = tpu.matmul %3, %17, %cst_14 {dimension_numbers = #tpu.dot_dimension_numbers<[1], [0], [0], [1], [0, 0, 1, 1], [], []>} : vector<8x128xf32>, vector<128x128xf32>, vector<8x128xf32> -> vector<8x128xf32>
    %19 = arith.index_cast %c0_i32_4 : i32 to index
    %c0_15 = arith.constant 0 : index
    %c128_16 = arith.constant 128 : index
    %20 = vector.load %arg1[%19, %c0_15, %c128_16] : memref<8x8x512xf32, #tpu.memory_space<vmem>>, vector<1x8x128xf32>
    %21 = vector.shape_cast %20 : vector<1x8x128xf32> to vector<8x128xf32>
    %22 = arith.addf %21, %18 : vector<8x128xf32>
    %c0_17 = arith.constant 0 : index
    %c256 = arith.constant 256 : index
    %23 = vector.load %arg2[%c0_17, %c256] : memref<128x512xf32, #tpu.memory_space<vmem>>, vector<128x128xf32>
    %cst_18 = arith.constant dense<0.000000e+00> : vector<8x128xf32>
    %24 = tpu.matmul %3, %23, %cst_18 {dimension_numbers = #tpu.dot_dimension_numbers<[1], [0], [0], [1], [0, 0, 1, 1], [], []>} : vector<8x128xf32>, vector<128x128xf32>, vector<8x128xf32> -> vector<8x128xf32>
    %25 = arith.index_cast %c0_i32_4 : i32 to index
    %c0_19 = arith.constant 0 : index
    %c256_20 = arith.constant 256 : index
    %26 = vector.load %arg1[%25, %c0_19, %c256_20] : memref<8x8x512xf32, #tpu.memory_space<vmem>>, vector<1x8x128xf32>
    %27 = vector.shape_cast %26 : vector<1x8x128xf32> to vector<8x128xf32>
    %28 = arith.addf %27, %24 : vector<8x128xf32>
    %cst_21 = arith.constant 5.000000e-01 : f32
    %29 = vector.broadcast %cst_21 : f32 to vector<8x128xf32>
    %30 = arith.mulf %29, %10 : vector<8x128xf32>
    %31 = math.tanh %30 : vector<8x128xf32>
    %cst_22 = arith.constant 5.000000e-01 : f32
    %32 = vector.broadcast %cst_22 : f32 to vector<8x128xf32>
    %33 = arith.mulf %32, %31 : vector<8x128xf32>
    %cst_23 = arith.constant 5.000000e-01 : f32
    %34 = vector.broadcast %cst_23 : f32 to vector<8x128xf32>
    %35 = arith.addf %33, %34 : vector<8x128xf32>
    %cst_24 = arith.constant 5.000000e-01 : f32
    %36 = vector.broadcast %cst_24 : f32 to vector<8x128xf32>
    %37 = arith.mulf %36, %16 : vector<8x128xf32>
    %38 = math.tanh %37 : vector<8x128xf32>
    %cst_25 = arith.constant 5.000000e-01 : f32
    %39 = vector.broadcast %cst_25 : f32 to vector<8x128xf32>
    %40 = arith.mulf %39, %38 : vector<8x128xf32>
    %cst_26 = arith.constant 5.000000e-01 : f32
    %41 = vector.broadcast %cst_26 : f32 to vector<8x128xf32>
    %42 = arith.addf %40, %41 : vector<8x128xf32>
    %cst_27 = arith.constant 5.000000e-01 : f32
    %43 = vector.broadcast %cst_27 : f32 to vector<8x128xf32>
    %44 = arith.mulf %43, %22 : vector<8x128xf32>
    %45 = math.tanh %44 : vector<8x128xf32>
    %cst_28 = arith.constant 5.000000e-01 : f32
    %46 = vector.broadcast %cst_28 : f32 to vector<8x128xf32>
    %47 = arith.mulf %46, %45 : vector<8x128xf32>
    %cst_29 = arith.constant 5.000000e-01 : f32
    %48 = vector.broadcast %cst_29 : f32 to vector<8x128xf32>
    %49 = arith.addf %47, %48 : vector<8x128xf32>
    %50 = math.tanh %28 : vector<8x128xf32>
    %51 = arith.mulf %49, %4 : vector<8x128xf32>
    %52 = arith.mulf %42, %50 : vector<8x128xf32>
    %53 = arith.addf %51, %52 : vector<8x128xf32>
    %54 = math.tanh %53 : vector<8x128xf32>
    %55 = arith.mulf %35, %54 : vector<8x128xf32>
    %56 = arith.index_cast %c0_i32_4 : i32 to index
    %c0_30 = arith.constant 0 : index
    %c0_31 = arith.constant 0 : index
    %57 = vector.load %arg5[%56, %c0_30, %c0_31] : memref<8x8x128xf32, #tpu.memory_space<vmem>>, vector<1x8x128xf32>
    %58 = vector.shape_cast %57 : vector<1x8x128xf32> to vector<8x128xf32>
    %59 = vector.shape_cast %55 : vector<8x128xf32> to vector<1x8x128xf32>
    tpu.vector_store %arg5[%56, %c0_30, %c0_31], %59 {strides = array<i32>} : memref<8x8x128xf32, #tpu.memory_space<vmem>>, vector<1x8x128xf32>,
    %60 = arith.index_cast %c0_i32_4 : i32 to index
    %c0_32 = arith.constant 0 : index
    %c0_33 = arith.constant 0 : index
    %61 = vector.load %arg6[%60, %c0_32, %c0_33] : memref<8x8x128xf32, #tpu.memory_space<vmem>>, vector<1x8x128xf32>
    %62 = vector.shape_cast %61 : vector<1x8x128xf32> to vector<8x128xf32>
    %63 = vector.shape_cast %53 : vector<8x128xf32> to vector<1x8x128xf32>
    tpu.vector_store %arg6[%60, %c0_32, %c0_33], %63 {strides = array<i32>} : memref<8x8x128xf32, #tpu.memory_space<vmem>>, vector<1x8x128xf32>,
    %c1_i32 = arith.constant 1 : i32
    %c0_34 = arith.constant 0 : index
    %c384_35 = arith.constant 384 : index
    %64 = vector.load %arg2[%c0_34, %c384_35] : memref<128x512xf32, #tpu.memory_space<vmem>>, vector<128x128xf32>
    %cst_36 = arith.constant dense<0.000000e+00> : vector<8x128xf32>
    %65 = tpu.matmul %55, %64, %cst_36 {dimension_numbers = #tpu.dot_dimension_numbers<[1], [0], [0], [1], [0, 0, 1, 1], [], []>} : vector<8x128xf32>, vector<128x128xf32>, vector<8x128xf32> -> vector<8x128xf32>
    %66 = arith.index_cast %c1_i32 : i32 to index
    %c0_37 = arith.constant 0 : index
    %c384_38 = arith.constant 384 : index
    %67 = vector.load %arg1[%66, %c0_37, %c384_38] : memref<8x8x512xf32, #tpu.memory_space<vmem>>, vector<1x8x128xf32>
    %68 = vector.shape_cast %67 : vector<1x8x128xf32> to vector<8x128xf32>
    %69 = arith.addf %68, %65 : vector<8x128xf32>
    %c0_39 = arith.constant 0 : index
    %c0_40 = arith.constant 0 : index
    %70 = vector.load %arg2[%c0_39, %c0_40] : memref<128x512xf32, #tpu.memory_space<vmem>>, vector<128x128xf32>
    %cst_41 = arith.constant dense<0.000000e+00> : vector<8x128xf32>
    %71 = tpu.matmul %55, %70, %cst_41 {dimension_numbers = #tpu.dot_dimension_numbers<[1], [0], [0], [1], [0, 0, 1, 1], [], []>} : vector<8x128xf32>, vector<128x128xf32>, vector<8x128xf32> -> vector<8x128xf32>
    %72 = arith.index_cast %c1_i32 : i32 to index
    %c0_42 = arith.constant 0 : index
    %c0_43 = arith.constant 0 : index
    %73 = vector.load %arg1[%72, %c0_42, %c0_43] : memref<8x8x512xf32, #tpu.memory_space<vmem>>, vector<1x8x128xf32>
    %74 = vector.shape_cast %73 : vector<1x8x128xf32> to vector<8x128xf32>
    %75 = arith.addf %74, %71 : vector<8x128xf32>
    %c0_44 = arith.constant 0 : index
    %c128_45 = arith.constant 128 : index
    %76 = vector.load %arg2[%c0_44, %c128_45] : memref<128x512xf32, #tpu.memory_space<vmem>>, vector<128x128xf32>
    %cst_46 = arith.constant dense<0.000000e+00> : vector<8x128xf32>
    %77 = tpu.matmul %55, %76, %cst_46 {dimension_numbers = #tpu.dot_dimension_numbers<[1], [0], [0], [1], [0, 0, 1, 1], [], []>} : vector<8x128xf32>, vector<128x128xf32>, vector<8x128xf32> -> vector<8x128xf32>
    %78 = arith.index_cast %c1_i32 : i32 to index
    %c0_47 = arith.constant 0 : index
    %c128_48 = arith.constant 128 : index
    %79 = vector.load %arg1[%78, %c0_47, %c128_48] : memref<8x8x512xf32, #tpu.memory_space<vmem>>, vector<1x8x128xf32>
    %80 = vector.shape_cast %79 : vector<1x8x128xf32> to vector<8x128xf32>
    %81 = arith.addf %80, %77 : vector<8x128xf32>
    %c0_49 = arith.constant 0 : index
    %c256_50 = arith.constant 256 : index
    %82 = vector.load %arg2[%c0_49, %c256_50] : memref<128x512xf32, #tpu.memory_space<vmem>>, vector<128x128xf32>
    %cst_51 = arith.constant dense<0.000000e+00> : vector<8x128xf32>
    %83 = tpu.matmul %55, %82, %cst_51 {dimension_numbers = #tpu.dot_dimension_numbers<[1], [0], [0], [1], [0, 0, 1, 1], [], []>} : vector<8x128xf32>, vector<128x128xf32>, vector<8x128xf32> -> vector<8x128xf32>
    %84 = arith.index_cast %c1_i32 : i32 to index
    %c0_52 = arith.constant 0 : index
    %c256_53 = arith.constant 256 : index
    %85 = vector.load %arg1[%84, %c0_52, %c256_53] : memref<8x8x512xf32, #tpu.memory_space<vmem>>, vector<1x8x128xf32>
    %86 = vector.shape_cast %85 : vector<1x8x128xf32> to vector<8x128xf32>
    %87 = arith.addf %86, %83 : vector<8x128xf32>
    %cst_54 = arith.constant 5.000000e-01 : f32
    %88 = vector.broadcast %cst_54 : f32 to vector<8x128xf32>
    %89 = arith.mulf %88, %69 : vector<8x128xf32>
    %90 = math.tanh %89 : vector<8x128xf32>
    %cst_55 = arith.constant 5.000000e-01 : f32
    %91 = vector.broadcast %cst_55 : f32 to vector<8x128xf32>
    %92 = arith.mulf %91, %90 : vector<8x128xf32>
    %cst_56 = arith.constant 5.000000e-01 : f32
    %93 = vector.broadcast %cst_56 : f32 to vector<8x128xf32>
    %94 = arith.addf %92, %93 : vector<8x128xf32>
    %cst_57 = arith.constant 5.000000e-01 : f32
    %95 = vector.broadcast %cst_57 : f32 to vector<8x128xf32>
    %96 = arith.mulf %95, %75 : vector<8x128xf32>
    %97 = math.tanh %96 : vector<8x128xf32>
    %cst_58 = arith.constant 5.000000e-01 : f32
    %98 = vector.broadcast %cst_58 : f32 to vector<8x128xf32>
    %99 = arith.mulf %98, %97 : vector<8x128xf32>
    %cst_59 = arith.constant 5.000000e-01 : f32
    %100 = vector.broadcast %cst_59 : f32 to vector<8x128xf32>
    %101 = arith.addf %99, %100 : vector<8x128xf32>
    %cst_60 = arith.constant 5.000000e-01 : f32
    %102 = vector.broadcast %cst_60 : f32 to vector<8x128xf32>
    %103 = arith.mulf %102, %81 : vector<8x128xf32>
    %104 = math.tanh %103 : vector<8x128xf32>
    %cst_61 = arith.constant 5.000000e-01 : f32
    %105 = vector.broadcast %cst_61 : f32 to vector<8x128xf32>
    %106 = arith.mulf %105, %104 : vector<8x128xf32>
    %cst_62 = arith.constant 5.000000e-01 : f32
    %107 = vector.broadcast %cst_62 : f32 to vector<8x128xf32>
    %108 = arith.addf %106, %107 : vector<8x128xf32>
    %109 = math.tanh %87 : vector<8x128xf32>
    %110 = arith.mulf %108, %53 : vector<8x128xf32>
    %111 = arith.mulf %101, %109 : vector<8x128xf32>
    %112 = arith.addf %110, %111 : vector<8x128xf32>
    %113 = math.tanh %112 : vector<8x128xf32>
    %114 = arith.mulf %94, %113 : vector<8x128xf32>
    %115 = arith.index_cast %c1_i32 : i32 to index
    %c0_63 = arith.constant 0 : index
    %c0_64 = arith.constant 0 : index
    %116 = vector.load %arg5[%115, %c0_63, %c0_64] : memref<8x8x128xf32, #tpu.memory_space<vmem>>, vector<1x8x128xf32>
    %117 = vector.shape_cast %116 : vector<1x8x128xf32> to vector<8x128xf32>
    %118 = vector.shape_cast %114 : vector<8x128xf32> to vector<1x8x128xf32>
    tpu.vector_store %arg5[%115, %c0_63, %c0_64], %118 {strides = array<i32>} : memref<8x8x128xf32, #tpu.memory_space<vmem>>, vector<1x8x128xf32>,
    %119 = arith.index_cast %c1_i32 : i32 to index
    %c0_65 = arith.constant 0 : index
    %c0_66 = arith.constant 0 : index
    %120 = vector.load %arg6[%119, %c0_65, %c0_66] : memref<8x8x128xf32, #tpu.memory_space<vmem>>, vector<1x8x128xf32>
    %121 = vector.shape_cast %120 : vector<1x8x128xf32> to vector<8x128xf32>
    %122 = vector.shape_cast %112 : vector<8x128xf32> to vector<1x8x128xf32>
    tpu.vector_store %arg6[%119, %c0_65, %c0_66], %122 {strides = array<i32>} : memref<8x8x128xf32, #tpu.memory_space<vmem>>, vector<1x8x128xf32>,
    %c2_i32 = arith.constant 2 : i32
    %c0_67 = arith.constant 0 : index
    %c384_68 = arith.constant 384 : index
    %123 = vector.load %arg2[%c0_67, %c384_68] : memref<128x512xf32, #tpu.memory_space<vmem>>, vector<128x128xf32>
    %cst_69 = arith.constant dense<0.000000e+00> : vector<8x128xf32>
    %124 = tpu.matmul %114, %123, %cst_69 {dimension_numbers = #tpu.dot_dimension_numbers<[1], [0], [0], [1], [0, 0, 1, 1], [], []>} : vector<8x128xf32>, vector<128x128xf32>, vector<8x128xf32> -> vector<8x128xf32>
    %125 = arith.index_cast %c2_i32 : i32 to index
    %c0_70 = arith.constant 0 : index
    %c384_71 = arith.constant 384 : index
    %126 = vector.load %arg1[%125, %c0_70, %c384_71] : memref<8x8x512xf32, #tpu.memory_space<vmem>>, vector<1x8x128xf32>
    %127 = vector.shape_cast %126 : vector<1x8x128xf32> to vector<8x128xf32>
    %128 = arith.addf %127, %124 : vector<8x128xf32>
    %c0_72 = arith.constant 0 : index
    %c0_73 = arith.constant 0 : index
    %129 = vector.load %arg2[%c0_72, %c0_73] : memref<128x512xf32, #tpu.memory_space<vmem>>, vector<128x128xf32>
    %cst_74 = arith.constant dense<0.000000e+00> : vector<8x128xf32>
    %130 = tpu.matmul %114, %129, %cst_74 {dimension_numbers = #tpu.dot_dimension_numbers<[1], [0], [0], [1], [0, 0, 1, 1], [], []>} : vector<8x128xf32>, vector<128x128xf32>, vector<8x128xf32> -> vector<8x128xf32>
    %131 = arith.index_cast %c2_i32 : i32 to index
    %c0_75 = arith.constant 0 : index
    %c0_76 = arith.constant 0 : index
    %132 = vector.load %arg1[%131, %c0_75, %c0_76] : memref<8x8x512xf32, #tpu.memory_space<vmem>>, vector<1x8x128xf32>
    %133 = vector.shape_cast %132 : vector<1x8x128xf32> to vector<8x128xf32>
    %134 = arith.addf %133, %130 : vector<8x128xf32>
    %c0_77 = arith.constant 0 : index
    %c128_78 = arith.constant 128 : index
    %135 = vector.load %arg2[%c0_77, %c128_78] : memref<128x512xf32, #tpu.memory_space<vmem>>, vector<128x128xf32>
    %cst_79 = arith.constant dense<0.000000e+00> : vector<8x128xf32>
    %136 = tpu.matmul %114, %135, %cst_79 {dimension_numbers = #tpu.dot_dimension_numbers<[1], [0], [0], [1], [0, 0, 1, 1], [], []>} : vector<8x128xf32>, vector<128x128xf32>, vector<8x128xf32> -> vector<8x128xf32>
    %137 = arith.index_cast %c2_i32 : i32 to index
    %c0_80 = arith.constant 0 : index
    %c128_81 = arith.constant 128 : index
    %138 = vector.load %arg1[%137, %c0_80, %c128_81] : memref<8x8x512xf32, #tpu.memory_space<vmem>>, vector<1x8x128xf32>
    %139 = vector.shape_cast %138 : vector<1x8x128xf32> to vector<8x128xf32>
    %140 = arith.addf %139, %136 : vector<8x128xf32>
    %c0_82 = arith.constant 0 : index
    %c256_83 = arith.constant 256 : index
    %141 = vector.load %arg2[%c0_82, %c256_83] : memref<128x512xf32, #tpu.memory_space<vmem>>, vector<128x128xf32>
    %cst_84 = arith.constant dense<0.000000e+00> : vector<8x128xf32>
    %142 = tpu.matmul %114, %141, %cst_84 {dimension_numbers = #tpu.dot_dimension_numbers<[1], [0], [0], [1], [0, 0, 1, 1], [], []>} : vector<8x128xf32>, vector<128x128xf32>, vector<8x128xf32> -> vector<8x128xf32>
    %143 = arith.index_cast %c2_i32 : i32 to index
    %c0_85 = arith.constant 0 : index
    %c256_86 = arith.constant 256 : index
    %144 = vector.load %arg1[%143, %c0_85, %c256_86] : memref<8x8x512xf32, #tpu.memory_space<vmem>>, vector<1x8x128xf32>
    %145 = vector.shape_cast %144 : vector<1x8x128xf32> to vector<8x128xf32>
    %146 = arith.addf %145, %142 : vector<8x128xf32>
    %cst_87 = arith.constant 5.000000e-01 : f32
    %147 = vector.broadcast %cst_87 : f32 to vector<8x128xf32>
    %148 = arith.mulf %147, %128 : vector<8x128xf32>
    %149 = math.tanh %148 : vector<8x128xf32>
    %cst_88 = arith.constant 5.000000e-01 : f32
    %150 = vector.broadcast %cst_88 : f32 to vector<8x128xf32>
    %151 = arith.mulf %150, %149 : vector<8x128xf32>
    %cst_89 = arith.constant 5.000000e-01 : f32
    %152 = vector.broadcast %cst_89 : f32 to vector<8x128xf32>
    %153 = arith.addf %151, %152 : vector<8x128xf32>
    %cst_90 = arith.constant 5.000000e-01 : f32
    %154 = vector.broadcast %cst_90 : f32 to vector<8x128xf32>
    %155 = arith.mulf %154, %134 : vector<8x128xf32>
    %156 = math.tanh %155 : vector<8x128xf32>
    %cst_91 = arith.constant 5.000000e-01 : f32
    %157 = vector.broadcast %cst_91 : f32 to vector<8x128xf32>
    %158 = arith.mulf %157, %156 : vector<8x128xf32>
    %cst_92 = arith.constant 5.000000e-01 : f32
    %159 = vector.broadcast %cst_92 : f32 to vector<8x128xf32>
    %160 = arith.addf %158, %159 : vector<8x128xf32>
    %cst_93 = arith.constant 5.000000e-01 : f32
    %161 = vector.broadcast %cst_93 : f32 to vector<8x128xf32>
    %162 = arith.mulf %161, %140 : vector<8x128xf32>
    %163 = math.tanh %162 : vector<8x128xf32>
    %cst_94 = arith.constant 5.000000e-01 : f32
    %164 = vector.broadcast %cst_94 : f32 to vector<8x128xf32>
    %165 = arith.mulf %164, %163 : vector<8x128xf32>
    %cst_95 = arith.constant 5.000000e-01 : f32
    %166 = vector.broadcast %cst_95 : f32 to vector<8x128xf32>
    %167 = arith.addf %165, %166 : vector<8x128xf32>
    %168 = math.tanh %146 : vector<8x128xf32>
    %169 = arith.mulf %167, %112 : vector<8x128xf32>
    %170 = arith.mulf %160, %168 : vector<8x128xf32>
    %171 = arith.addf %169, %170 : vector<8x128xf32>
    %172 = math.tanh %171 : vector<8x128xf32>
    %173 = arith.mulf %153, %172 : vector<8x128xf32>
    %174 = arith.index_cast %c2_i32 : i32 to index
    %c0_96 = arith.constant 0 : index
    %c0_97 = arith.constant 0 : index
    %175 = vector.load %arg5[%174, %c0_96, %c0_97] : memref<8x8x128xf32, #tpu.memory_space<vmem>>, vector<1x8x128xf32>
    %176 = vector.shape_cast %175 : vector<1x8x128xf32> to vector<8x128xf32>
    %177 = vector.shape_cast %173 : vector<8x128xf32> to vector<1x8x128xf32>
    tpu.vector_store %arg5[%174, %c0_96, %c0_97], %177 {strides = array<i32>} : memref<8x8x128xf32, #tpu.memory_space<vmem>>, vector<1x8x128xf32>,
    %178 = arith.index_cast %c2_i32 : i32 to index
    %c0_98 = arith.constant 0 : index
    %c0_99 = arith.constant 0 : index
    %179 = vector.load %arg6[%178, %c0_98, %c0_99] : memref<8x8x128xf32, #tpu.memory_space<vmem>>, vector<1x8x128xf32>
    %180 = vector.shape_cast %179 : vector<1x8x128xf32> to vector<8x128xf32>
    %181 = vector.shape_cast %171 : vector<8x128xf32> to vector<1x8x128xf32>
    tpu.vector_store %arg6[%178, %c0_98, %c0_99], %181 {strides = array<i32>} : memref<8x8x128xf32, #tpu.memory_space<vmem>>, vector<1x8x128xf32>,
    %c3_i32 = arith.constant 3 : i32
    %c0_100 = arith.constant 0 : index
    %c384_101 = arith.constant 384 : index
    %182 = vector.load %arg2[%c0_100, %c384_101] : memref<128x512xf32, #tpu.memory_space<vmem>>, vector<128x128xf32>
    %cst_102 = arith.constant dense<0.000000e+00> : vector<8x128xf32>
    %183 = tpu.matmul %173, %182, %cst_102 {dimension_numbers = #tpu.dot_dimension_numbers<[1], [0], [0], [1], [0, 0, 1, 1], [], []>} : vector<8x128xf32>, vector<128x128xf32>, vector<8x128xf32> -> vector<8x128xf32>
    %184 = arith.index_cast %c3_i32 : i32 to index
    %c0_103 = arith.constant 0 : index
    %c384_104 = arith.constant 384 : index
    %185 = vector.load %arg1[%184, %c0_103, %c384_104] : memref<8x8x512xf32, #tpu.memory_space<vmem>>, vector<1x8x128xf32>
    %186 = vector.shape_cast %185 : vector<1x8x128xf32> to vector<8x128xf32>
    %187 = arith.addf %186, %183 : vector<8x128xf32>
    %c0_105 = arith.constant 0 : index
    %c0_106 = arith.constant 0 : index
    %188 = vector.load %arg2[%c0_105, %c0_106] : memref<128x512xf32, #tpu.memory_space<vmem>>, vector<128x128xf32>
    %cst_107 = arith.constant dense<0.000000e+00> : vector<8x128xf32>
    %189 = tpu.matmul %173, %188, %cst_107 {dimension_numbers = #tpu.dot_dimension_numbers<[1], [0], [0], [1], [0, 0, 1, 1], [], []>} : vector<8x128xf32>, vector<128x128xf32>, vector<8x128xf32> -> vector<8x128xf32>
    %190 = arith.index_cast %c3_i32 : i32 to index
    %c0_108 = arith.constant 0 : index
    %c0_109 = arith.constant 0 : index
    %191 = vector.load %arg1[%190, %c0_108, %c0_109] : memref<8x8x512xf32, #tpu.memory_space<vmem>>, vector<1x8x128xf32>
    %192 = vector.shape_cast %191 : vector<1x8x128xf32> to vector<8x128xf32>
    %193 = arith.addf %192, %189 : vector<8x128xf32>
    %c0_110 = arith.constant 0 : index
    %c128_111 = arith.constant 128 : index
    %194 = vector.load %arg2[%c0_110, %c128_111] : memref<128x512xf32, #tpu.memory_space<vmem>>, vector<128x128xf32>
    %cst_112 = arith.constant dense<0.000000e+00> : vector<8x128xf32>
    %195 = tpu.matmul %173, %194, %cst_112 {dimension_numbers = #tpu.dot_dimension_numbers<[1], [0], [0], [1], [0, 0, 1, 1], [], []>} : vector<8x128xf32>, vector<128x128xf32>, vector<8x128xf32> -> vector<8x128xf32>
    %196 = arith.index_cast %c3_i32 : i32 to index
    %c0_113 = arith.constant 0 : index
    %c128_114 = arith.constant 128 : index
    %197 = vector.load %arg1[%196, %c0_113, %c128_114] : memref<8x8x512xf32, #tpu.memory_space<vmem>>, vector<1x8x128xf32>
    %198 = vector.shape_cast %197 : vector<1x8x128xf32> to vector<8x128xf32>
    %199 = arith.addf %198, %195 : vector<8x128xf32>
    %c0_115 = arith.constant 0 : index
    %c256_116 = arith.constant 256 : index
    %200 = vector.load %arg2[%c0_115, %c256_116] : memref<128x512xf32, #tpu.memory_space<vmem>>, vector<128x128xf32>
    %cst_117 = arith.constant dense<0.000000e+00> : vector<8x128xf32>
    %201 = tpu.matmul %173, %200, %cst_117 {dimension_numbers = #tpu.dot_dimension_numbers<[1], [0], [0], [1], [0, 0, 1, 1], [], []>} : vector<8x128xf32>, vector<128x128xf32>, vector<8x128xf32> -> vector<8x128xf32>
    %202 = arith.index_cast %c3_i32 : i32 to index
    %c0_118 = arith.constant 0 : index
    %c256_119 = arith.constant 256 : index
    %203 = vector.load %arg1[%202, %c0_118, %c256_119] : memref<8x8x512xf32, #tpu.memory_space<vmem>>, vector<1x8x128xf32>
    %204 = vector.shape_cast %203 : vector<1x8x128xf32> to vector<8x128xf32>
    %205 = arith.addf %204, %201 : vector<8x128xf32>
    %cst_120 = arith.constant 5.000000e-01 : f32
    %206 = vector.broadcast %cst_120 : f32 to vector<8x128xf32>
    %207 = arith.mulf %206, %187 : vector<8x128xf32>
    %208 = math.tanh %207 : vector<8x128xf32>
    %cst_121 = arith.constant 5.000000e-01 : f32
    %209 = vector.broadcast %cst_121 : f32 to vector<8x128xf32>
    %210 = arith.mulf %209, %208 : vector<8x128xf32>
    %cst_122 = arith.constant 5.000000e-01 : f32
    %211 = vector.broadcast %cst_122 : f32 to vector<8x128xf32>
    %212 = arith.addf %210, %211 : vector<8x128xf32>
    %cst_123 = arith.constant 5.000000e-01 : f32
    %213 = vector.broadcast %cst_123 : f32 to vector<8x128xf32>
    %214 = arith.mulf %213, %193 : vector<8x128xf32>
    %215 = math.tanh %214 : vector<8x128xf32>
    %cst_124 = arith.constant 5.000000e-01 : f32
    %216 = vector.broadcast %cst_124 : f32 to vector<8x128xf32>
    %217 = arith.mulf %216, %215 : vector<8x128xf32>
    %cst_125 = arith.constant 5.000000e-01 : f32
    %218 = vector.broadcast %cst_125 : f32 to vector<8x128xf32>
    %219 = arith.addf %217, %218 : vector<8x128xf32>
    %cst_126 = arith.constant 5.000000e-01 : f32
    %220 = vector.broadcast %cst_126 : f32 to vector<8x128xf32>
    %221 = arith.mulf %220, %199 : vector<8x128xf32>
    %222 = math.tanh %221 : vector<8x128xf32>
    %cst_127 = arith.constant 5.000000e-01 : f32
    %223 = vector.broadcast %cst_127 : f32 to vector<8x128xf32>
    %224 = arith.mulf %223, %222 : vector<8x128xf32>
    %cst_128 = arith.constant 5.000000e-01 : f32
    %225 = vector.broadcast %cst_128 : f32 to vector<8x128xf32>
    %226 = arith.addf %224, %225 : vector<8x128xf32>
    %227 = math.tanh %205 : vector<8x128xf32>
    %228 = arith.mulf %226, %171 : vector<8x128xf32>
    %229 = arith.mulf %219, %227 : vector<8x128xf32>
    %230 = arith.addf %228, %229 : vector<8x128xf32>
    %231 = math.tanh %230 : vector<8x128xf32>
    %232 = arith.mulf %212, %231 : vector<8x128xf32>
    %233 = arith.index_cast %c3_i32 : i32 to index
    %c0_129 = arith.constant 0 : index
    %c0_130 = arith.constant 0 : index
    %234 = vector.load %arg5[%233, %c0_129, %c0_130] : memref<8x8x128xf32, #tpu.memory_space<vmem>>, vector<1x8x128xf32>
    %235 = vector.shape_cast %234 : vector<1x8x128xf32> to vector<8x128xf32>
    %236 = vector.shape_cast %232 : vector<8x128xf32> to vector<1x8x128xf32>
    tpu.vector_store %arg5[%233, %c0_129, %c0_130], %236 {strides = array<i32>} : memref<8x8x128xf32, #tpu.memory_space<vmem>>, vector<1x8x128xf32>,
    %237 = arith.index_cast %c3_i32 : i32 to index
    %c0_131 = arith.constant 0 : index
    %c0_132 = arith.constant 0 : index
    %238 = vector.load %arg6[%237, %c0_131, %c0_132] : memref<8x8x128xf32, #tpu.memory_space<vmem>>, vector<1x8x128xf32>
    %239 = vector.shape_cast %238 : vector<1x8x128xf32> to vector<8x128xf32>
    %240 = vector.shape_cast %230 : vector<8x128xf32> to vector<1x8x128xf32>
    tpu.vector_store %arg6[%237, %c0_131, %c0_132], %240 {strides = array<i32>} : memref<8x8x128xf32, #tpu.memory_space<vmem>>, vector<1x8x128xf32>,
    %c4_i32 = arith.constant 4 : i32
    %c0_133 = arith.constant 0 : index
    %c384_134 = arith.constant 384 : index
    %241 = vector.load %arg2[%c0_133, %c384_134] : memref<128x512xf32, #tpu.memory_space<vmem>>, vector<128x128xf32>
    %cst_135 = arith.constant dense<0.000000e+00> : vector<8x128xf32>
    %242 = tpu.matmul %232, %241, %cst_135 {dimension_numbers = #tpu.dot_dimension_numbers<[1], [0], [0], [1], [0, 0, 1, 1], [], []>} : vector<8x128xf32>, vector<128x128xf32>, vector<8x128xf32> -> vector<8x128xf32>
    %243 = arith.index_cast %c4_i32 : i32 to index
    %c0_136 = arith.constant 0 : index
    %c384_137 = arith.constant 384 : index
    %244 = vector.load %arg1[%243, %c0_136, %c384_137] : memref<8x8x512xf32, #tpu.memory_space<vmem>>, vector<1x8x128xf32>
    %245 = vector.shape_cast %244 : vector<1x8x128xf32> to vector<8x128xf32>
    %246 = arith.addf %245, %242 : vector<8x128xf32>
    %c0_138 = arith.constant 0 : index
    %c0_139 = arith.constant 0 : index
    %247 = vector.load %arg2[%c0_138, %c0_139] : memref<128x512xf32, #tpu.memory_space<vmem>>, vector<128x128xf32>
    %cst_140 = arith.constant dense<0.000000e+00> : vector<8x128xf32>
    %248 = tpu.matmul %232, %247, %cst_140 {dimension_numbers = #tpu.dot_dimension_numbers<[1], [0], [0], [1], [0, 0, 1, 1], [], []>} : vector<8x128xf32>, vector<128x128xf32>, vector<8x128xf32> -> vector<8x128xf32>
    %249 = arith.index_cast %c4_i32 : i32 to index
    %c0_141 = arith.constant 0 : index
    %c0_142 = arith.constant 0 : index
    %250 = vector.load %arg1[%249, %c0_141, %c0_142] : memref<8x8x512xf32, #tpu.memory_space<vmem>>, vector<1x8x128xf32>
    %251 = vector.shape_cast %250 : vector<1x8x128xf32> to vector<8x128xf32>
    %252 = arith.addf %251, %248 : vector<8x128xf32>
    %c0_143 = arith.constant 0 : index
    %c128_144 = arith.constant 128 : index
    %253 = vector.load %arg2[%c0_143, %c128_144] : memref<128x512xf32, #tpu.memory_space<vmem>>, vector<128x128xf32>
    %cst_145 = arith.constant dense<0.000000e+00> : vector<8x128xf32>
    %254 = tpu.matmul %232, %253, %cst_145 {dimension_numbers = #tpu.dot_dimension_numbers<[1], [0], [0], [1], [0, 0, 1, 1], [], []>} : vector<8x128xf32>, vector<128x128xf32>, vector<8x128xf32> -> vector<8x128xf32>
    %255 = arith.index_cast %c4_i32 : i32 to index
    %c0_146 = arith.constant 0 : index
    %c128_147 = arith.constant 128 : index
    %256 = vector.load %arg1[%255, %c0_146, %c128_147] : memref<8x8x512xf32, #tpu.memory_space<vmem>>, vector<1x8x128xf32>
    %257 = vector.shape_cast %256 : vector<1x8x128xf32> to vector<8x128xf32>
    %258 = arith.addf %257, %254 : vector<8x128xf32>
    %c0_148 = arith.constant 0 : index
    %c256_149 = arith.constant 256 : index
    %259 = vector.load %arg2[%c0_148, %c256_149] : memref<128x512xf32, #tpu.memory_space<vmem>>, vector<128x128xf32>
    %cst_150 = arith.constant dense<0.000000e+00> : vector<8x128xf32>
    %260 = tpu.matmul %232, %259, %cst_150 {dimension_numbers = #tpu.dot_dimension_numbers<[1], [0], [0], [1], [0, 0, 1, 1], [], []>} : vector<8x128xf32>, vector<128x128xf32>, vector<8x128xf32> -> vector<8x128xf32>
    %261 = arith.index_cast %c4_i32 : i32 to index
    %c0_151 = arith.constant 0 : index
    %c256_152 = arith.constant 256 : index
    %262 = vector.load %arg1[%261, %c0_151, %c256_152] : memref<8x8x512xf32, #tpu.memory_space<vmem>>, vector<1x8x128xf32>
    %263 = vector.shape_cast %262 : vector<1x8x128xf32> to vector<8x128xf32>
    %264 = arith.addf %263, %260 : vector<8x128xf32>
    %cst_153 = arith.constant 5.000000e-01 : f32
    %265 = vector.broadcast %cst_153 : f32 to vector<8x128xf32>
    %266 = arith.mulf %265, %246 : vector<8x128xf32>
    %267 = math.tanh %266 : vector<8x128xf32>
    %cst_154 = arith.constant 5.000000e-01 : f32
    %268 = vector.broadcast %cst_154 : f32 to vector<8x128xf32>
    %269 = arith.mulf %268, %267 : vector<8x128xf32>
    %cst_155 = arith.constant 5.000000e-01 : f32
    %270 = vector.broadcast %cst_155 : f32 to vector<8x128xf32>
    %271 = arith.addf %269, %270 : vector<8x128xf32>
    %cst_156 = arith.constant 5.000000e-01 : f32
    %272 = vector.broadcast %cst_156 : f32 to vector<8x128xf32>
    %273 = arith.mulf %272, %252 : vector<8x128xf32>
    %274 = math.tanh %273 : vector<8x128xf32>
    %cst_157 = arith.constant 5.000000e-01 : f32
    %275 = vector.broadcast %cst_157 : f32 to vector<8x128xf32>
    %276 = arith.mulf %275, %274 : vector<8x128xf32>
    %cst_158 = arith.constant 5.000000e-01 : f32
    %277 = vector.broadcast %cst_158 : f32 to vector<8x128xf32>
    %278 = arith.addf %276, %277 : vector<8x128xf32>
    %cst_159 = arith.constant 5.000000e-01 : f32
    %279 = vector.broadcast %cst_159 : f32 to vector<8x128xf32>
    %280 = arith.mulf %279, %258 : vector<8x128xf32>
    %281 = math.tanh %280 : vector<8x128xf32>
    %cst_160 = arith.constant 5.000000e-01 : f32
    %282 = vector.broadcast %cst_160 : f32 to vector<8x128xf32>
    %283 = arith.mulf %282, %281 : vector<8x128xf32>
    %cst_161 = arith.constant 5.000000e-01 : f32
    %284 = vector.broadcast %cst_161 : f32 to vector<8x128xf32>
    %285 = arith.addf %283, %284 : vector<8x128xf32>
    %286 = math.tanh %264 : vector<8x128xf32>
    %287 = arith.mulf %285, %230 : vector<8x128xf32>
    %288 = arith.mulf %278, %286 : vector<8x128xf32>
    %289 = arith.addf %287, %288 : vector<8x128xf32>
    %290 = math.tanh %289 : vector<8x128xf32>
    %291 = arith.mulf %271, %290 : vector<8x128xf32>
    %292 = arith.index_cast %c4_i32 : i32 to index
    %c0_162 = arith.constant 0 : index
    %c0_163 = arith.constant 0 : index
    %293 = vector.load %arg5[%292, %c0_162, %c0_163] : memref<8x8x128xf32, #tpu.memory_space<vmem>>, vector<1x8x128xf32>
    %294 = vector.shape_cast %293 : vector<1x8x128xf32> to vector<8x128xf32>
    %295 = vector.shape_cast %291 : vector<8x128xf32> to vector<1x8x128xf32>
    tpu.vector_store %arg5[%292, %c0_162, %c0_163], %295 {strides = array<i32>} : memref<8x8x128xf32, #tpu.memory_space<vmem>>, vector<1x8x128xf32>,
    %296 = arith.index_cast %c4_i32 : i32 to index
    %c0_164 = arith.constant 0 : index
    %c0_165 = arith.constant 0 : index
    %297 = vector.load %arg6[%296, %c0_164, %c0_165] : memref<8x8x128xf32, #tpu.memory_space<vmem>>, vector<1x8x128xf32>
    %298 = vector.shape_cast %297 : vector<1x8x128xf32> to vector<8x128xf32>
    %299 = vector.shape_cast %289 : vector<8x128xf32> to vector<1x8x128xf32>
    tpu.vector_store %arg6[%296, %c0_164, %c0_165], %299 {strides = array<i32>} : memref<8x8x128xf32, #tpu.memory_space<vmem>>, vector<1x8x128xf32>,
    %c5_i32 = arith.constant 5 : i32
    %c0_166 = arith.constant 0 : index
    %c384_167 = arith.constant 384 : index
    %300 = vector.load %arg2[%c0_166, %c384_167] : memref<128x512xf32, #tpu.memory_space<vmem>>, vector<128x128xf32>
    %cst_168 = arith.constant dense<0.000000e+00> : vector<8x128xf32>
    %301 = tpu.matmul %291, %300, %cst_168 {dimension_numbers = #tpu.dot_dimension_numbers<[1], [0], [0], [1], [0, 0, 1, 1], [], []>} : vector<8x128xf32>, vector<128x128xf32>, vector<8x128xf32> -> vector<8x128xf32>
    %302 = arith.index_cast %c5_i32 : i32 to index
    %c0_169 = arith.constant 0 : index
    %c384_170 = arith.constant 384 : index
    %303 = vector.load %arg1[%302, %c0_169, %c384_170] : memref<8x8x512xf32, #tpu.memory_space<vmem>>, vector<1x8x128xf32>
    %304 = vector.shape_cast %303 : vector<1x8x128xf32> to vector<8x128xf32>
    %305 = arith.addf %304, %301 : vector<8x128xf32>
    %c0_171 = arith.constant 0 : index
    %c0_172 = arith.constant 0 : index
    %306 = vector.load %arg2[%c0_171, %c0_172] : memref<128x512xf32, #tpu.memory_space<vmem>>, vector<128x128xf32>
    %cst_173 = arith.constant dense<0.000000e+00> : vector<8x128xf32>
    %307 = tpu.matmul %291, %306, %cst_173 {dimension_numbers = #tpu.dot_dimension_numbers<[1], [0], [0], [1], [0, 0, 1, 1], [], []>} : vector<8x128xf32>, vector<128x128xf32>, vector<8x128xf32> -> vector<8x128xf32>
    %308 = arith.index_cast %c5_i32 : i32 to index
    %c0_174 = arith.constant 0 : index
    %c0_175 = arith.constant 0 : index
    %309 = vector.load %arg1[%308, %c0_174, %c0_175] : memref<8x8x512xf32, #tpu.memory_space<vmem>>, vector<1x8x128xf32>
    %310 = vector.shape_cast %309 : vector<1x8x128xf32> to vector<8x128xf32>
    %311 = arith.addf %310, %307 : vector<8x128xf32>
    %c0_176 = arith.constant 0 : index
    %c128_177 = arith.constant 128 : index
    %312 = vector.load %arg2[%c0_176, %c128_177] : memref<128x512xf32, #tpu.memory_space<vmem>>, vector<128x128xf32>
    %cst_178 = arith.constant dense<0.000000e+00> : vector<8x128xf32>
    %313 = tpu.matmul %291, %312, %cst_178 {dimension_numbers = #tpu.dot_dimension_numbers<[1], [0], [0], [1], [0, 0, 1, 1], [], []>} : vector<8x128xf32>, vector<128x128xf32>, vector<8x128xf32> -> vector<8x128xf32>
    %314 = arith.index_cast %c5_i32 : i32 to index
    %c0_179 = arith.constant 0 : index
    %c128_180 = arith.constant 128 : index
    %315 = vector.load %arg1[%314, %c0_179, %c128_180] : memref<8x8x512xf32, #tpu.memory_space<vmem>>, vector<1x8x128xf32>
    %316 = vector.shape_cast %315 : vector<1x8x128xf32> to vector<8x128xf32>
    %317 = arith.addf %316, %313 : vector<8x128xf32>
    %c0_181 = arith.constant 0 : index
    %c256_182 = arith.constant 256 : index
    %318 = vector.load %arg2[%c0_181, %c256_182] : memref<128x512xf32, #tpu.memory_space<vmem>>, vector<128x128xf32>
    %cst_183 = arith.constant dense<0.000000e+00> : vector<8x128xf32>
    %319 = tpu.matmul %291, %318, %cst_183 {dimension_numbers = #tpu.dot_dimension_numbers<[1], [0], [0], [1], [0, 0, 1, 1], [], []>} : vector<8x128xf32>, vector<128x128xf32>, vector<8x128xf32> -> vector<8x128xf32>
    %320 = arith.index_cast %c5_i32 : i32 to index
    %c0_184 = arith.constant 0 : index
    %c256_185 = arith.constant 256 : index
    %321 = vector.load %arg1[%320, %c0_184, %c256_185] : memref<8x8x512xf32, #tpu.memory_space<vmem>>, vector<1x8x128xf32>
    %322 = vector.shape_cast %321 : vector<1x8x128xf32> to vector<8x128xf32>
    %323 = arith.addf %322, %319 : vector<8x128xf32>
    %cst_186 = arith.constant 5.000000e-01 : f32
    %324 = vector.broadcast %cst_186 : f32 to vector<8x128xf32>
    %325 = arith.mulf %324, %305 : vector<8x128xf32>
    %326 = math.tanh %325 : vector<8x128xf32>
    %cst_187 = arith.constant 5.000000e-01 : f32
    %327 = vector.broadcast %cst_187 : f32 to vector<8x128xf32>
    %328 = arith.mulf %327, %326 : vector<8x128xf32>
    %cst_188 = arith.constant 5.000000e-01 : f32
    %329 = vector.broadcast %cst_188 : f32 to vector<8x128xf32>
    %330 = arith.addf %328, %329 : vector<8x128xf32>
    %cst_189 = arith.constant 5.000000e-01 : f32
    %331 = vector.broadcast %cst_189 : f32 to vector<8x128xf32>
    %332 = arith.mulf %331, %311 : vector<8x128xf32>
    %333 = math.tanh %332 : vector<8x128xf32>
    %cst_190 = arith.constant 5.000000e-01 : f32
    %334 = vector.broadcast %cst_190 : f32 to vector<8x128xf32>
    %335 = arith.mulf %334, %333 : vector<8x128xf32>
    %cst_191 = arith.constant 5.000000e-01 : f32
    %336 = vector.broadcast %cst_191 : f32 to vector<8x128xf32>
    %337 = arith.addf %335, %336 : vector<8x128xf32>
    %cst_192 = arith.constant 5.000000e-01 : f32
    %338 = vector.broadcast %cst_192 : f32 to vector<8x128xf32>
    %339 = arith.mulf %338, %317 : vector<8x128xf32>
    %340 = math.tanh %339 : vector<8x128xf32>
    %cst_193 = arith.constant 5.000000e-01 : f32
    %341 = vector.broadcast %cst_193 : f32 to vector<8x128xf32>
    %342 = arith.mulf %341, %340 : vector<8x128xf32>
    %cst_194 = arith.constant 5.000000e-01 : f32
    %343 = vector.broadcast %cst_194 : f32 to vector<8x128xf32>
    %344 = arith.addf %342, %343 : vector<8x128xf32>
    %345 = math.tanh %323 : vector<8x128xf32>
    %346 = arith.mulf %344, %289 : vector<8x128xf32>
    %347 = arith.mulf %337, %345 : vector<8x128xf32>
    %348 = arith.addf %346, %347 : vector<8x128xf32>
    %349 = math.tanh %348 : vector<8x128xf32>
    %350 = arith.mulf %330, %349 : vector<8x128xf32>
    %351 = arith.index_cast %c5_i32 : i32 to index
    %c0_195 = arith.constant 0 : index
    %c0_196 = arith.constant 0 : index
    %352 = vector.load %arg5[%351, %c0_195, %c0_196] : memref<8x8x128xf32, #tpu.memory_space<vmem>>, vector<1x8x128xf32>
    %353 = vector.shape_cast %352 : vector<1x8x128xf32> to vector<8x128xf32>
    %354 = vector.shape_cast %350 : vector<8x128xf32> to vector<1x8x128xf32>
    tpu.vector_store %arg5[%351, %c0_195, %c0_196], %354 {strides = array<i32>} : memref<8x8x128xf32, #tpu.memory_space<vmem>>, vector<1x8x128xf32>,
    %355 = arith.index_cast %c5_i32 : i32 to index
    %c0_197 = arith.constant 0 : index
    %c0_198 = arith.constant 0 : index
    %356 = vector.load %arg6[%355, %c0_197, %c0_198] : memref<8x8x128xf32, #tpu.memory_space<vmem>>, vector<1x8x128xf32>
    %357 = vector.shape_cast %356 : vector<1x8x128xf32> to vector<8x128xf32>
    %358 = vector.shape_cast %348 : vector<8x128xf32> to vector<1x8x128xf32>
    tpu.vector_store %arg6[%355, %c0_197, %c0_198], %358 {strides = array<i32>} : memref<8x8x128xf32, #tpu.memory_space<vmem>>, vector<1x8x128xf32>,
    %c6_i32 = arith.constant 6 : i32
    %c0_199 = arith.constant 0 : index
    %c384_200 = arith.constant 384 : index
    %359 = vector.load %arg2[%c0_199, %c384_200] : memref<128x512xf32, #tpu.memory_space<vmem>>, vector<128x128xf32>
    %cst_201 = arith.constant dense<0.000000e+00> : vector<8x128xf32>
    %360 = tpu.matmul %350, %359, %cst_201 {dimension_numbers = #tpu.dot_dimension_numbers<[1], [0], [0], [1], [0, 0, 1, 1], [], []>} : vector<8x128xf32>, vector<128x128xf32>, vector<8x128xf32> -> vector<8x128xf32>
    %361 = arith.index_cast %c6_i32 : i32 to index
    %c0_202 = arith.constant 0 : index
    %c384_203 = arith.constant 384 : index
    %362 = vector.load %arg1[%361, %c0_202, %c384_203] : memref<8x8x512xf32, #tpu.memory_space<vmem>>, vector<1x8x128xf32>
    %363 = vector.shape_cast %362 : vector<1x8x128xf32> to vector<8x128xf32>
    %364 = arith.addf %363, %360 : vector<8x128xf32>
    %c0_204 = arith.constant 0 : index
    %c0_205 = arith.constant 0 : index
    %365 = vector.load %arg2[%c0_204, %c0_205] : memref<128x512xf32, #tpu.memory_space<vmem>>, vector<128x128xf32>
    %cst_206 = arith.constant dense<0.000000e+00> : vector<8x128xf32>
    %366 = tpu.matmul %350, %365, %cst_206 {dimension_numbers = #tpu.dot_dimension_numbers<[1], [0], [0], [1], [0, 0, 1, 1], [], []>} : vector<8x128xf32>, vector<128x128xf32>, vector<8x128xf32> -> vector<8x128xf32>
    %367 = arith.index_cast %c6_i32 : i32 to index
    %c0_207 = arith.constant 0 : index
    %c0_208 = arith.constant 0 : index
    %368 = vector.load %arg1[%367, %c0_207, %c0_208] : memref<8x8x512xf32, #tpu.memory_space<vmem>>, vector<1x8x128xf32>
    %369 = vector.shape_cast %368 : vector<1x8x128xf32> to vector<8x128xf32>
    %370 = arith.addf %369, %366 : vector<8x128xf32>
    %c0_209 = arith.constant 0 : index
    %c128_210 = arith.constant 128 : index
    %371 = vector.load %arg2[%c0_209, %c128_210] : memref<128x512xf32, #tpu.memory_space<vmem>>, vector<128x128xf32>
    %cst_211 = arith.constant dense<0.000000e+00> : vector<8x128xf32>
    %372 = tpu.matmul %350, %371, %cst_211 {dimension_numbers = #tpu.dot_dimension_numbers<[1], [0], [0], [1], [0, 0, 1, 1], [], []>} : vector<8x128xf32>, vector<128x128xf32>, vector<8x128xf32> -> vector<8x128xf32>
    %373 = arith.index_cast %c6_i32 : i32 to index
    %c0_212 = arith.constant 0 : index
    %c128_213 = arith.constant 128 : index
    %374 = vector.load %arg1[%373, %c0_212, %c128_213] : memref<8x8x512xf32, #tpu.memory_space<vmem>>, vector<1x8x128xf32>
    %375 = vector.shape_cast %374 : vector<1x8x128xf32> to vector<8x128xf32>
    %376 = arith.addf %375, %372 : vector<8x128xf32>
    %c0_214 = arith.constant 0 : index
    %c256_215 = arith.constant 256 : index
    %377 = vector.load %arg2[%c0_214, %c256_215] : memref<128x512xf32, #tpu.memory_space<vmem>>, vector<128x128xf32>
    %cst_216 = arith.constant dense<0.000000e+00> : vector<8x128xf32>
    %378 = tpu.matmul %350, %377, %cst_216 {dimension_numbers = #tpu.dot_dimension_numbers<[1], [0], [0], [1], [0, 0, 1, 1], [], []>} : vector<8x128xf32>, vector<128x128xf32>, vector<8x128xf32> -> vector<8x128xf32>
    %379 = arith.index_cast %c6_i32 : i32 to index
    %c0_217 = arith.constant 0 : index
    %c256_218 = arith.constant 256 : index
    %380 = vector.load %arg1[%379, %c0_217, %c256_218] : memref<8x8x512xf32, #tpu.memory_space<vmem>>, vector<1x8x128xf32>
    %381 = vector.shape_cast %380 : vector<1x8x128xf32> to vector<8x128xf32>
    %382 = arith.addf %381, %378 : vector<8x128xf32>
    %cst_219 = arith.constant 5.000000e-01 : f32
    %383 = vector.broadcast %cst_219 : f32 to vector<8x128xf32>
    %384 = arith.mulf %383, %364 : vector<8x128xf32>
    %385 = math.tanh %384 : vector<8x128xf32>
    %cst_220 = arith.constant 5.000000e-01 : f32
    %386 = vector.broadcast %cst_220 : f32 to vector<8x128xf32>
    %387 = arith.mulf %386, %385 : vector<8x128xf32>
    %cst_221 = arith.constant 5.000000e-01 : f32
    %388 = vector.broadcast %cst_221 : f32 to vector<8x128xf32>
    %389 = arith.addf %387, %388 : vector<8x128xf32>
    %cst_222 = arith.constant 5.000000e-01 : f32
    %390 = vector.broadcast %cst_222 : f32 to vector<8x128xf32>
    %391 = arith.mulf %390, %370 : vector<8x128xf32>
    %392 = math.tanh %391 : vector<8x128xf32>
    %cst_223 = arith.constant 5.000000e-01 : f32
    %393 = vector.broadcast %cst_223 : f32 to vector<8x128xf32>
    %394 = arith.mulf %393, %392 : vector<8x128xf32>
    %cst_224 = arith.constant 5.000000e-01 : f32
    %395 = vector.broadcast %cst_224 : f32 to vector<8x128xf32>
    %396 = arith.addf %394, %395 : vector<8x128xf32>
    %cst_225 = arith.constant 5.000000e-01 : f32
    %397 = vector.broadcast %cst_225 : f32 to vector<8x128xf32>
    %398 = arith.mulf %397, %376 : vector<8x128xf32>
    %399 = math.tanh %398 : vector<8x128xf32>
    %cst_226 = arith.constant 5.000000e-01 : f32
    %400 = vector.broadcast %cst_226 : f32 to vector<8x128xf32>
    %401 = arith.mulf %400, %399 : vector<8x128xf32>
    %cst_227 = arith.constant 5.000000e-01 : f32
    %402 = vector.broadcast %cst_227 : f32 to vector<8x128xf32>
    %403 = arith.addf %401, %402 : vector<8x128xf32>
    %404 = math.tanh %382 : vector<8x128xf32>
    %405 = arith.mulf %403, %348 : vector<8x128xf32>
    %406 = arith.mulf %396, %404 : vector<8x128xf32>
    %407 = arith.addf %405, %406 : vector<8x128xf32>
    %408 = math.tanh %407 : vector<8x128xf32>
    %409 = arith.mulf %389, %408 : vector<8x128xf32>
    %410 = arith.index_cast %c6_i32 : i32 to index
    %c0_228 = arith.constant 0 : index
    %c0_229 = arith.constant 0 : index
    %411 = vector.load %arg5[%410, %c0_228, %c0_229] : memref<8x8x128xf32, #tpu.memory_space<vmem>>, vector<1x8x128xf32>
    %412 = vector.shape_cast %411 : vector<1x8x128xf32> to vector<8x128xf32>
    %413 = vector.shape_cast %409 : vector<8x128xf32> to vector<1x8x128xf32>
    tpu.vector_store %arg5[%410, %c0_228, %c0_229], %413 {strides = array<i32>} : memref<8x8x128xf32, #tpu.memory_space<vmem>>, vector<1x8x128xf32>,
    %414 = arith.index_cast %c6_i32 : i32 to index
    %c0_230 = arith.constant 0 : index
    %c0_231 = arith.constant 0 : index
    %415 = vector.load %arg6[%414, %c0_230, %c0_231] : memref<8x8x128xf32, #tpu.memory_space<vmem>>, vector<1x8x128xf32>
    %416 = vector.shape_cast %415 : vector<1x8x128xf32> to vector<8x128xf32>
    %417 = vector.shape_cast %407 : vector<8x128xf32> to vector<1x8x128xf32>
    tpu.vector_store %arg6[%414, %c0_230, %c0_231], %417 {strides = array<i32>} : memref<8x8x128xf32, #tpu.memory_space<vmem>>, vector<1x8x128xf32>,
    %c7_i32 = arith.constant 7 : i32
    %c0_232 = arith.constant 0 : index
    %c384_233 = arith.constant 384 : index
    %418 = vector.load %arg2[%c0_232, %c384_233] : memref<128x512xf32, #tpu.memory_space<vmem>>, vector<128x128xf32>
    %cst_234 = arith.constant dense<0.000000e+00> : vector<8x128xf32>
    %419 = tpu.matmul %409, %418, %cst_234 {dimension_numbers = #tpu.dot_dimension_numbers<[1], [0], [0], [1], [0, 0, 1, 1], [], []>} : vector<8x128xf32>, vector<128x128xf32>, vector<8x128xf32> -> vector<8x128xf32>
    %420 = arith.index_cast %c7_i32 : i32 to index
    %c0_235 = arith.constant 0 : index
    %c384_236 = arith.constant 384 : index
    %421 = vector.load %arg1[%420, %c0_235, %c384_236] : memref<8x8x512xf32, #tpu.memory_space<vmem>>, vector<1x8x128xf32>
    %422 = vector.shape_cast %421 : vector<1x8x128xf32> to vector<8x128xf32>
    %423 = arith.addf %422, %419 : vector<8x128xf32>
    %c0_237 = arith.constant 0 : index
    %c0_238 = arith.constant 0 : index
    %424 = vector.load %arg2[%c0_237, %c0_238] : memref<128x512xf32, #tpu.memory_space<vmem>>, vector<128x128xf32>
    %cst_239 = arith.constant dense<0.000000e+00> : vector<8x128xf32>
    %425 = tpu.matmul %409, %424, %cst_239 {dimension_numbers = #tpu.dot_dimension_numbers<[1], [0], [0], [1], [0, 0, 1, 1], [], []>} : vector<8x128xf32>, vector<128x128xf32>, vector<8x128xf32> -> vector<8x128xf32>
    %426 = arith.index_cast %c7_i32 : i32 to index
    %c0_240 = arith.constant 0 : index
    %c0_241 = arith.constant 0 : index
    %427 = vector.load %arg1[%426, %c0_240, %c0_241] : memref<8x8x512xf32, #tpu.memory_space<vmem>>, vector<1x8x128xf32>
    %428 = vector.shape_cast %427 : vector<1x8x128xf32> to vector<8x128xf32>
    %429 = arith.addf %428, %425 : vector<8x128xf32>
    %c0_242 = arith.constant 0 : index
    %c128_243 = arith.constant 128 : index
    %430 = vector.load %arg2[%c0_242, %c128_243] : memref<128x512xf32, #tpu.memory_space<vmem>>, vector<128x128xf32>
    %cst_244 = arith.constant dense<0.000000e+00> : vector<8x128xf32>
    %431 = tpu.matmul %409, %430, %cst_244 {dimension_numbers = #tpu.dot_dimension_numbers<[1], [0], [0], [1], [0, 0, 1, 1], [], []>} : vector<8x128xf32>, vector<128x128xf32>, vector<8x128xf32> -> vector<8x128xf32>
    %432 = arith.index_cast %c7_i32 : i32 to index
    %c0_245 = arith.constant 0 : index
    %c128_246 = arith.constant 128 : index
    %433 = vector.load %arg1[%432, %c0_245, %c128_246] : memref<8x8x512xf32, #tpu.memory_space<vmem>>, vector<1x8x128xf32>
    %434 = vector.shape_cast %433 : vector<1x8x128xf32> to vector<8x128xf32>
    %435 = arith.addf %434, %431 : vector<8x128xf32>
    %c0_247 = arith.constant 0 : index
    %c256_248 = arith.constant 256 : index
    %436 = vector.load %arg2[%c0_247, %c256_248] : memref<128x512xf32, #tpu.memory_space<vmem>>, vector<128x128xf32>
    %cst_249 = arith.constant dense<0.000000e+00> : vector<8x128xf32>
    %437 = tpu.matmul %409, %436, %cst_249 {dimension_numbers = #tpu.dot_dimension_numbers<[1], [0], [0], [1], [0, 0, 1, 1], [], []>} : vector<8x128xf32>, vector<128x128xf32>, vector<8x128xf32> -> vector<8x128xf32>
    %438 = arith.index_cast %c7_i32 : i32 to index
    %c0_250 = arith.constant 0 : index
    %c256_251 = arith.constant 256 : index
    %439 = vector.load %arg1[%438, %c0_250, %c256_251] : memref<8x8x512xf32, #tpu.memory_space<vmem>>, vector<1x8x128xf32>
    %440 = vector.shape_cast %439 : vector<1x8x128xf32> to vector<8x128xf32>
    %441 = arith.addf %440, %437 : vector<8x128xf32>
    %cst_252 = arith.constant 5.000000e-01 : f32
    %442 = vector.broadcast %cst_252 : f32 to vector<8x128xf32>
    %443 = arith.mulf %442, %423 : vector<8x128xf32>
    %444 = math.tanh %443 : vector<8x128xf32>
    %cst_253 = arith.constant 5.000000e-01 : f32
    %445 = vector.broadcast %cst_253 : f32 to vector<8x128xf32>
    %446 = arith.mulf %445, %444 : vector<8x128xf32>
    %cst_254 = arith.constant 5.000000e-01 : f32
    %447 = vector.broadcast %cst_254 : f32 to vector<8x128xf32>
    %448 = arith.addf %446, %447 : vector<8x128xf32>
    %cst_255 = arith.constant 5.000000e-01 : f32
    %449 = vector.broadcast %cst_255 : f32 to vector<8x128xf32>
    %450 = arith.mulf %449, %429 : vector<8x128xf32>
    %451 = math.tanh %450 : vector<8x128xf32>
    %cst_256 = arith.constant 5.000000e-01 : f32
    %452 = vector.broadcast %cst_256 : f32 to vector<8x128xf32>
    %453 = arith.mulf %452, %451 : vector<8x128xf32>
    %cst_257 = arith.constant 5.000000e-01 : f32
    %454 = vector.broadcast %cst_257 : f32 to vector<8x128xf32>
    %455 = arith.addf %453, %454 : vector<8x128xf32>
    %cst_258 = arith.constant 5.000000e-01 : f32
    %456 = vector.broadcast %cst_258 : f32 to vector<8x128xf32>
    %457 = arith.mulf %456, %435 : vector<8x128xf32>
    %458 = math.tanh %457 : vector<8x128xf32>
    %cst_259 = arith.constant 5.000000e-01 : f32
    %459 = vector.broadcast %cst_259 : f32 to vector<8x128xf32>
    %460 = arith.mulf %459, %458 : vector<8x128xf32>
    %cst_260 = arith.constant 5.000000e-01 : f32
    %461 = vector.broadcast %cst_260 : f32 to vector<8x128xf32>
    %462 = arith.addf %460, %461 : vector<8x128xf32>
    %463 = math.tanh %441 : vector<8x128xf32>
    %464 = arith.mulf %462, %407 : vector<8x128xf32>
    %465 = arith.mulf %455, %463 : vector<8x128xf32>
    %466 = arith.addf %464, %465 : vector<8x128xf32>
    %467 = math.tanh %466 : vector<8x128xf32>
    %468 = arith.mulf %448, %467 : vector<8x128xf32>
    %469 = arith.index_cast %c7_i32 : i32 to index
    %c0_261 = arith.constant 0 : index
    %c0_262 = arith.constant 0 : index
    %470 = vector.load %arg5[%469, %c0_261, %c0_262] : memref<8x8x128xf32, #tpu.memory_space<vmem>>, vector<1x8x128xf32>
    %471 = vector.shape_cast %470 : vector<1x8x128xf32> to vector<8x128xf32>
    %472 = vector.shape_cast %468 : vector<8x128xf32> to vector<1x8x128xf32>
    tpu.vector_store %arg5[%469, %c0_261, %c0_262], %472 {strides = array<i32>} : memref<8x8x128xf32, #tpu.memory_space<vmem>>, vector<1x8x128xf32>,
    %473 = arith.index_cast %c7_i32 : i32 to index
    %c0_263 = arith.constant 0 : index
    %c0_264 = arith.constant 0 : index
    %474 = vector.load %arg6[%473, %c0_263, %c0_264] : memref<8x8x128xf32, #tpu.memory_space<vmem>>, vector<1x8x128xf32>
    %475 = vector.shape_cast %474 : vector<1x8x128xf32> to vector<8x128xf32>
    %476 = vector.shape_cast %466 : vector<8x128xf32> to vector<1x8x128xf32>
    tpu.vector_store %arg6[%473, %c0_263, %c0_264], %476 {strides = array<i32>} : memref<8x8x128xf32, #tpu.memory_space<vmem>>, vector<1x8x128xf32>,
    %c8_i32 = arith.constant 8 : i32
    %c0_265 = arith.constant 0 : index
    %c0_266 = arith.constant 0 : index
    %477 = vector.load %arg7[%c0_265, %c0_266] : memref<8x128xf32, #tpu.memory_space<vmem>>, vector<8x128xf32>
    tpu.vector_store %arg7[%c0_265, %c0_266], %468 {strides = array<i32>} : memref<8x128xf32, #tpu.memory_space<vmem>>, vector<8x128xf32>,
    %c0_267 = arith.constant 0 : index
    %c0_268 = arith.constant 0 : index
    %478 = vector.load %arg8[%c0_267, %c0_268] : memref<8x128xf32, #tpu.memory_space<vmem>>, vector<8x128xf32>
    tpu.vector_store %arg8[%c0_267, %c0_268], %466 {strides = array<i32>} : memref<8x128xf32, #tpu.memory_space<vmem>>, vector<8x128xf32>,
    return
  }
  func.func @transform_0(%arg0: i32) -> (i32, i32, i32) {
    %c0_i32 = arith.constant 0 : i32
    %c0_i32_0 = arith.constant 0 : i32
    %c0_i32_1 = arith.constant 0 : i32
    return %arg0, %c0_i32, %c0_i32_0 : i32, i32, i32
  }
  func.func @transform_1(%arg0: i32) -> (i32, i32) {
    %c0_i32 = arith.constant 0 : i32
    %c0_i32_0 = arith.constant 0 : i32
    %c0_i32_1 = arith.constant 0 : i32
    return %c0_i32, %c0_i32_0 : i32, i32
  }
  func.func @transform_2(%arg0: i32) -> (i32, i32) {
    %c0_i32 = arith.constant 0 : i32
    %c0_i32_0 = arith.constant 0 : i32
    %c0_i32_1 = arith.constant 0 : i32
    return %c0_i32, %c0_i32_0 : i32, i32
  }
  func.func @transform_3(%arg0: i32) -> (i32, i32) {
    %c0_i32 = arith.constant 0 : i32
    %c0_i32_0 = arith.constant 0 : i32
    %c0_i32_1 = arith.constant 0 : i32
    return %c0_i32, %c0_i32_0 : i32, i32
  }
  func.func @transform_4(%arg0: i32) -> (i32, i32, i32) {
    %c0_i32 = arith.constant 0 : i32
    %c0_i32_0 = arith.constant 0 : i32
    %c0_i32_1 = arith.constant 0 : i32
    return %arg0, %c0_i32, %c0_i32_0 : i32, i32, i32
  }
  func.func @transform_5(%arg0: i32) -> (i32, i32, i32) {
    %c0_i32 = arith.constant 0 : i32
    %c0_i32_0 = arith.constant 0 : i32
    %c0_i32_1 = arith.constant 0 : i32
    return %arg0, %c0_i32, %c0_i32_0 : i32, i32, i32
  }
}

</mosaic_0001>

<bundles_post_ra>
// kernel: tpu_custom_call.1
= control target key start
LH: loop header
LB: loop body
LE: loop exit
PB: predicated region body
PF: predicated region fallthrough
CT: control target
= control target key end

     0   :  { %7 = vsyncpa [#allocation3], 0  ;;  %s690_s0 = inlined_call_operand.hbm [shape: f32[16,128], index: 0, kind: input, shape index: {}]   ;;  %s691_s1 = inlined_call_operand.hbm [shape: f32[8,128], index: 1, kind: input, shape index: {}]   ;;  %s692_s2 = inlined_call_operand.hbm [shape: f32[16,128], index: 2, kind: output, shape index: {}]  }
   0x1   :  { %9 = vsyncpa [#allocation3 + $0x1], 0 }
   0x2   :  { %10 = vsyncpa [#allocation6], 0 }
   0x3   :  { %11 = vsyncpa [#allocation4], 0 }
   0x4   :  { %13 = vsyncpa [#allocation4 + $0x1], 0  ;;  %s489_s9 = smov 0   ;;  %s491_s10 = smov 0  }
   0x5   :  { %s493_s11 = smov 0   ;;  %s495_s12 = smov 0  }
   0x6 LB: > { %s510_s13 = sadd.s32 4294967295, %s469_s12   ;;  %s270_s14 = sadd.s32 4294967294, %s469_s12   ;;  %s469_s12 = sphi %s495_s12, %s716_s12   ;;  %s465_s11 = sphi %s493_s11, %s715_s11   ;;  %s461_s10 = sphi %s491_s10, %s714_s10   ;;  %s457_s9 = sphi %s489_s9, %s713_s9  }
   0x7   : > { %p39_p0 = scmp.ne.s32.totalorder %s461_s10, %s457_s9  ;;  %p693_p1 = scmp.eq.s32.totalorder %s510_s13, 0 }
   0x8   : > { %p90_p3 = scmp.eq.s32.totalorder %s270_s14, 1  ;;  %p271_p5 = scmp.ge.s32.totalorder %s469_s12, 1 }
   0x9   : > { %p519_p4 = por %p693_p1, %p39_p0  ;;  %p97_p7 = scmp.lt.s32.totalorder %s469_s12, 3 }
   0xa   : > { %p524_p6 = por %p90_p3, %p39_p0  ;;  %s471_s18 = smov [#allocation5]  }
   0xb   : > { %s696_s15 = scalar_select %p519_p4, 1, 0 }
   0xc   : > { %s697_s16 = scalar_select %p524_p6, 1, 0 }
   0xd   : > { %p529_p8 = pnand %p271_p5, %p97_p7  ;;  %s110_s19 = sshll.u32 %s471_s18, 4  ;;  %s111_s19 = int_to_ptr.vmem [resolvable:$true] %s110_s19 }
   0xe   : > { %s537_s20 = sadd.s32 1, %s469_s12   ;;  %s26_s24 = sadd.s32 1, %s465_s11 }
   0xf   : > { %s698_s17 = scalar_select %p529_p8, 1, 0 }
  0x10   : > { %p292_p10 = pneg %p529_p8  ;;  %s23_s22 = ssub.s32 %s469_s12, %s537_s20 }
  0x11   : > { %p547_p12 = scmp.eq.s32.totalorder %s23_s22, 0  ;;  %s341_s27 = scalar_lea.hbm %s691_s1, 128 }
  0x12   : > { %p541_p11 = pnand %p292_p10, %p693_p1  ;;  %p342_p0 = scmp.ne.s32.totalorder %s691_s1, %s341_s27 }
  0x13   : > { %s700_s23 = scalar_select %p547_p12, 1, 0 }
  0x14   : > { %p343_p3 = pneg %p541_p11  ;;  %p348_p10 = scmp.lt.u32.totalorder %s341_s27, %s691_s1 }
  0x16   : > { %p344_p5 = pnand %p343_p3, %p342_p0 }
  0x18   : > { %p345_p7 = pneg %p344_p5 }
  0x1a   : > { %p350_p9 = pnand %p348_p10, %p345_p7 }
  0x1c   : > { %353 = shalt.err (!%p350_p9)
}
  0x1d   : > { %s354_s4 = scalar_lea.vmem %s111_s19, 128  ;;  %p362_p6 = scmp.lt.s32.totalorder %s111_s19, %s111_s19 }
  0x1e   : > { %p355_p1 = scmp.ne.s32.totalorder %s111_s19, %s354_s4  ;;  %p363_p4 = scmp.lt.s32.totalorder %s354_s4, %s354_s4 }
  0x20   : > { %p357_p2 = pnand %p355_p1, %p343_p3  ;;  %p364_p8 = por %p363_p4, %p362_p6 }
  0x22   : > { %p358_p13 = pneg %p357_p2 }
  0x24   : > { %p365_p12 = pnand %p364_p8, %p358_p13 }
  0x26   : > { %368 = shalt.err (!%p365_p12)
}
  0x27   : > { %295 = dma.hbm_to_vmem [thread:$0]  (!%p541_p11), %s691_s1, 128, %s111_s19, [#allocation6]  }
  0x28   : > { %p701_p1 = scmp.ne.s32.totalorder %s700_s23, 0  ;;  %p34_p2 = scmp.eq.s32.totalorder %s469_s12, 0 }
  0x29   : > { %p702_p4 = scmp.ne.s32.totalorder %s465_s11, %s461_s10  ;;  %p703_p6 = scmp.eq.s32.totalorder %s510_s13, 1 }
  0x2a   : > { %s573_s7 = scalar_select %p701_p1, %s465_s11, %s26_s24  }
  0x2b   : > { %p581_p8 = por %p703_p6, %p702_p4  ;;  %p305_p9 = scmp.lt.s32.totalorder %s469_s12, 2 }
  0x2c   : > { %s121_s14 = sand.u32 1, %s465_s11   ;;  %p705_p12 = pmov %p702_p4 }
  0x2d   : > { %s274_s18 = sshll.u32 %s121_s14, 3  ;;  %s275_s21 = sshll.u32 %s469_s12, 7 }
  0x2e   : > { %p35_p13 = por %p34_p2, %p705_p12  ;;  %s594_s19 = scalar_lea.hbm %s690_s0, %s275_s21 }
  0x2f   : > { %s125_s23 = scalar_lea.vmem [#allocation2], %s274_s18  ;;  %s122_s27 = scalar_lea.sflag [#allocation3], %s121_s14 }
  0x30   : > { %s132_s24 = sshll.u32 %s125_s23, 4  ;;  %p596_p11 = pnand %p305_p9, %p35_p13  ;;  %s600_s24 = int_to_ptr.vmem [resolvable:$true] %s132_s24 }
  0x31   : > { %s369_s28 = scalar_lea.hbm %s594_s19, 128  ;;  %s374_s3 = scalar_lea.hbm %s690_s0, 256 }
  0x32   : > { %p370_p0 = scmp.ne.s32.totalorder %s594_s19, %s369_s28  ;;  %p371_p3 = pneg %p596_p11 }
  0x33   : > { %p375_p10 = scmp.lt.u32.totalorder %s594_s19, %s690_s0  ;;  %p376_p1 = scmp.lt.u32.totalorder %s374_s3, %s369_s28 }
  0x34   : > { %p372_p5 = pnand %p371_p3, %p370_p0  ;;  %p378_p4 = scmp.lt.u32.totalorder %s369_s28, %s594_s19 }
  0x35   : > { %p377_p2 = por %p376_p1, %p375_p10 }
  0x36   : > { %p373_p7 = pneg %p372_p5 }
  0x37   : > { %p379_p6 = por %p378_p4, %p377_p2 }
  0x39   : > { %p380_p9 = pnand %p379_p6, %p373_p7 }
  0x3b   : > { %383 = shalt.err (!%p380_p9)
}
  0x3c   : > { %s384_s6 = scalar_lea.vmem %s600_s24, 128  ;;  %s472_s14 = smov [#allocation2]  }
  0x3d   : > { %p385_p12 = scmp.ne.s32.totalorder %s600_s24, %s384_s6  ;;  %s389_s18 = sshll.u32 %s472_s14, 4  ;;  %s390_s18 = int_to_ptr.vmem [resolvable:$false] %s389_s18 }
  0x3e   : > { %s391_s21 = scalar_lea.vmem %s390_s18, 256  ;;  %p392_p5 = scmp.lt.s32.totalorder %s600_s24, %s390_s18 }
  0x3f   : > { %p387_p13 = pnand %p385_p12, %p371_p3  ;;  %p393_p10 = scmp.lt.s32.totalorder %s391_s21, %s384_s6 }
  0x41   : > { %p388_p0 = pneg %p387_p13  ;;  %p394_p1 = por %p393_p10, %p392_p5 }
  0x43   : > { %p395_p2 = pnand %p394_p1, %p388_p0 }
  0x45   : > { %398 = shalt.err (!%p395_p2)
}
  0x46   : > { %299 = dma.hbm_to_vmem [thread:$0]  (!%p596_p11), %s594_s19, 128, %s600_s24, %s122_s27  }
  0x47   : > { %p707_p7 = scmp.ne.s32.totalorder %s698_s17, 0 }
  0x48   : > { %s630_s22 = sand.u32 (!%p707_p7), 1, %s461_s10   ;;  %p708_p3 = scmp.ne.s32.totalorder (!%p707_p7), %s696_s15, 0 }
  0x49   : > { %141 = sbr.rel (%p707_p7) target bundleno = 109 (0x6d), region = 28  ;;  %s277_s25 = sshll.u32 (!%p707_p7), %s630_s22, 3 }
  0x4a   : > { %s144_s23 = scalar_lea.sflag (!%p707_p7), [#allocation3], %s630_s22  ;;  %s147_s28 = scalar_lea.vmem (!%p707_p7), [#allocation2], %s277_s25 }
  0x50   : > { %444 = dma.done.wait (%p708_p3), %s144_s23, 128  }
  0x51   : > { %446 = vsyncadd (%p708_p3), %s144_s23, 4294967168  ;;  %p709_p4 = scmp.eq.s32.totalorder %s510_s13, 0 }
  0x53   : > { %448 = dma.done.wait (%p709_p4), [#allocation6], 128   ;;  %p710_p11 = pmov %p709_p4 }
  0x54   : > { %s171_s17 = scalar_lea.vmem [#allocation7], %s277_s25  ;;  %s281_s24 = sshll.u32 %s510_s13, 7  ;;  %v172_v0 = vld [vmem:[%s147_s28] sm:$0xff]  ;;  %v173_v1 = vld [vmem:[#allocation5] sm:$0xff] }
  0x55   : > { %450 = vsyncadd (%p710_p11), [#allocation6], 4294967168  ;;  %s190_s19 = sshll.u32 %s171_s17, 4  ;;  %v174_v2 = vadd.f32 %v173_v1, %v172_v0  ;;  %s648_s27 = scalar_lea.hbm %s692_s2, %s281_s24  ;;  %s643_s19 = int_to_ptr.vmem [resolvable:$true] %s190_s19 }
  0x56   : > { %s177_s29 = scalar_lea.sflag [#allocation4], %s630_s22  ;;  %s399_s30 = scalar_lea.vmem %s643_s19, 128 }
  0x57   : > { %175 = vst [vmem:[%s171_s17] sm:$0xff] %v174_v2  ;;  %p400_p6 = scmp.ne.s32.totalorder %s643_s19, %s399_s30  ;;  %s473_s13 = smov [#allocation7]  }
  0x58   : > { %s403_s3 = sshll.u32 %s473_s13, 4  ;;  %s404_s3 = int_to_ptr.vmem [resolvable:$false] %s403_s3 }
  0x59   : > { %p401_p9 = pnand %p400_p6, %p581_p8  ;;  %s405_s4 = scalar_lea.vmem %s404_s3, 256 }
  0x5a   : > { %p406_p13 = scmp.lt.s32.totalorder %s643_s19, %s404_s3  ;;  %p407_p0 = scmp.lt.s32.totalorder %s405_s4, %s399_s30 }
  0x5b   : > { %p402_p12 = pneg %p401_p9 }
  0x5c   : > { %p408_p5 = por %p407_p0, %p406_p13 }
  0x5e   : > { %p409_p10 = pnand %p408_p5, %p402_p12 }
  0x60   : > { %412 = shalt.err (!%p409_p10)
}
  0x61   : > { %s413_s5 = scalar_lea.hbm %s648_s27, 128  ;;  %s417_s18 = scalar_lea.hbm %s692_s2, 256 }
  0x62   : > { %p414_p1 = scmp.ne.s32.totalorder %s648_s27, %s413_s5  ;;  %p418_p3 = scmp.lt.u32.totalorder %s648_s27, %s692_s2 }
  0x63   : > { %p419_p4 = scmp.lt.u32.totalorder %s417_s18, %s413_s5  ;;  %p421_p6 = scmp.lt.u32.totalorder %s413_s5, %s648_s27 }
  0x64   : > { %p415_p2 = pnand %p414_p1, %p581_p8 }
  0x65   : > { %p420_p11 = por %p419_p4, %p418_p3 }
  0x66   : > { %p416_p7 = pneg %p415_p2 }
  0x67   : > { %p422_p9 = por %p421_p6, %p420_p11 }
  0x69   : > { %p423_p12 = pnand %p422_p9, %p416_p7 }
  0x6b   : > { %426 = shalt.err (!%p423_p12)
}
  0x6c   : > { %290 = dma.vmem_to_hbm [thread:$0]  (%p581_p8), %s643_s19, 128, %s648_s27, %s177_s29  }
  0x6d PF: > { %s202_s25 = sand.u32 1, %s457_s9   ;;  %p711_p13 = scmp.ne.s32.totalorder %s697_s16, 0 }
  0x6e   : > { %p712_p0 = scmp.ge.s32.totalorder %s469_s12, 2  ;;  %s203_s23 = scalar_lea.sflag [#allocation4], %s202_s25 }
  0x70   : > { %p301_p5 = pnand %p712_p0, %p711_p13 }
  0x72   : > { %452 = dma.done.wait (!%p301_p5), %s203_s23, 128  }
  0x73   : > { %454 = vsyncadd (!%p301_p5), %s203_s23, 4294967168  ;;  %p16_p10 = scmp.ge.s32.totalorder %s537_s20, 4   ;;  %s713_s9 = smov %s461_s10 }
  0x74   : > { %s714_s10 = smov %s465_s11  ;;  %s715_s11 = smov %s573_s7 }
  0x75   : > { %s716_s12 = smov %s537_s20  ;;  %18 = sbr.rel (!%p16_p10) target bundleno = 6 (0x6), region = 77 }
  0x7c   :  { %208 = vsyncpa [#allocation3], 1 }
  0x7d   :  { %210 = vsyncpa [#allocation3 + $0x1], 1 }
  0x7e   :  { %211 = vsyncpa [#allocation6], 1 }
  0x7f   :  { %212 = vsyncpa [#allocation4], 1 }
  0x80   :  { %214 = vsyncpa [#allocation4 + $0x1], 1 }

// kernel: _lstm_forward_impl.1
= control target key start
LH: loop header
LB: loop body
LE: loop exit
PB: predicated region body
PF: predicated region fallthrough
CT: control target
= control target key end

     0   :  { %11 = vsyncpa [#allocation5], 0  ;;  %v5657_v3 = vmov 0.0|0.0   ;;  %vm5658_vm0 = vmmov 0   ;;  %v5659_v11 = vmov 0.0   ;;  %s7219_s0 = inlined_call_operand.vmem [shape: f32[8,8,512], index: 0, kind: input, shape index: {}]   ;;  %s7220_s1 = inlined_call_operand.vmem [shape: f32[128,512], index: 1, kind: input, shape index: {}]   ;;  %s7221_s2 = inlined_call_operand.vmem [shape: f32[8,128], index: 2, kind: input, shape index: {}]   ;;  %s7222_s3 = inlined_call_operand.vmem [shape: f32[8,128], index: 3, kind: input, shape index: {}]   ;;  %s7223_s4 = inlined_call_operand.hbm [shape: f32[8,8,128], index: 4, kind: output, shape index: {0}]   ;;  %s7224_s5 = inlined_call_operand.hbm [shape: f32[8,8,128], index: 5, kind: output, shape index: {1}]  }
   0x1   :  { %v31_v0 = vld [vmem:[%s7220_s1 + $0x18] sm:$0xff]  ;;  %v119_v2 = vld [vmem:[%s7220_s1] sm:$0xff]  ;;  %4754 = vmatprep.subr.bf16.mxu0 %v5657_v3  ;;  %4778 = vmatprep.subr.bf16.mxu1 %v5657_v3 }
   0x2   :  { %v32_v1 = vld [vmem:[%s7220_s1 + $0x38] sm:$0xff]  ;;  %v120_v5 = vld [vmem:[%s7220_s1 + $0x20] sm:$0xff]  ;;  %3666 = vmatprep.mubr.msk.f32.mxu0 %vm5658_vm0, %v5659_v11  ;;  %3701 = vmatprep.mubr.msk.f32.mxu1 %vm5658_vm0, %v5659_v11 }
   0x3   :  { %v5705_v4 = vpack.c.bf16 %v32_v1, %v31_v0  ;;  %v33_v6 = vld [vmem:[%s7220_s1 + $0x58] sm:$0xff]  ;;  %v5716_v8 = vpack.c.bf16 %v120_v5, %v119_v2  ;;  %v121_v9 = vld [vmem:[%s7220_s1 + $0x40] sm:$0xff] }
   0x4   :  { %v34_v7 = vld [vmem:[%s7220_s1 + $0x78] sm:$0xff]  ;;  %v122_v10 = vld [vmem:[%s7220_s1 + $0x60] sm:$0xff] }
   0x5   :  { %4756 = vmatpush3.bf16.msra.mxu0 %v5705_v4  ;;  %v5729_v12 = vpack.c.bf16 %v34_v7, %v33_v6  ;;  %4780 = vmatpush3.bf16.msra.mxu1 %v5716_v8  ;;  %v5733_v13 = vpack.c.bf16 %v122_v10, %v121_v9  ;;  %v35_v14 = vld [vmem:[%s7220_s1 + $0x98] sm:$0xff]  ;;  %v123_v16 = vld [vmem:[%s7220_s1 + $0x80] sm:$0xff] }
   0x6   :  { %4757 = vmatprep.subr.bf16.mxu0 %v5657_v3  ;;  %v36_v15 = vld [vmem:[%s7220_s1 + $0xb8] sm:$0xff]  ;;  %4781 = vmatprep.subr.bf16.mxu1 %v5657_v3  ;;  %v124_v17 = vld [vmem:[%s7220_s1 + $0xa0] sm:$0xff] }
   0x7   :  { %v5749_v18 = vpack.c.bf16 %v36_v15, %v35_v14  ;;  %v5753_v19 = vpack.c.bf16 %v124_v17, %v123_v16  ;;  %v37_v20 = vld [vmem:[%s7220_s1 + $0xd8] sm:$0xff]  ;;  %v125_v22 = vld [vmem:[%s7220_s1 + $0xc0] sm:$0xff] }
   0x8   :  { %v38_v21 = vld [vmem:[%s7220_s1 + $0xf8] sm:$0xff]  ;;  %v126_v23 = vld [vmem:[%s7220_s1 + $0xe0] sm:$0xff] }
   0x9   :  { %4759 = vmatpush3.bf16.msra.mxu0 %v5729_v12  ;;  %4783 = vmatpush3.bf16.msra.mxu1 %v5733_v13  ;;  %v5769_v24 = vpack.c.bf16 %v38_v21, %v37_v20  ;;  %v5773_v25 = vpack.c.bf16 %v126_v23, %v125_v22  ;;  %v39_v26 = vld [vmem:[%s7220_s1 + $0x118] sm:$0xff]  ;;  %v127_v28 = vld [vmem:[%s7220_s1 + $0x100] sm:$0xff] }
   0xa   :  { %4760 = vmatprep.subr.bf16.mxu0 %v5657_v3  ;;  %4784 = vmatprep.subr.bf16.mxu1 %v5657_v3  ;;  %v40_v27 = vld [vmem:[%s7220_s1 + $0x138] sm:$0xff]  ;;  %v128_v29 = vld [vmem:[%s7220_s1 + $0x120] sm:$0xff] }
   0xb   :  { %v5789_v30 = vpack.c.bf16 %v40_v27, %v39_v26  ;;  %v5793_v31 = vpack.c.bf16 %v128_v29, %v127_v28  ;;  %v41_v32 = vld [vmem:[%s7220_s1 + $0x158] sm:$0xff]  ;;  %v129_v34 = vld [vmem:[%s7220_s1 + $0x140] sm:$0xff] }
   0xc   :  { %v42_v33 = vld [vmem:[%s7220_s1 + $0x178] sm:$0xff]  ;;  %v130_v35 = vld [vmem:[%s7220_s1 + $0x160] sm:$0xff] }
   0xd   :  { %4762 = vmatpush3.bf16.msra.mxu0 %v5749_v18  ;;  %4786 = vmatpush3.bf16.msra.mxu1 %v5753_v19  ;;  %v5809_v36 = vpack.c.bf16 %v42_v33, %v41_v32  ;;  %v5813_v37 = vpack.c.bf16 %v130_v35, %v129_v34  ;;  %v43_v38 = vld [vmem:[%s7220_s1 + $0x198] sm:$0xff]  ;;  %v131_v40 = vld [vmem:[%s7220_s1 + $0x180] sm:$0xff] }
   0xe   :  { %4763 = vmatprep.subr.bf16.mxu0 %v5657_v3  ;;  %4787 = vmatprep.subr.bf16.mxu1 %v5657_v3  ;;  %v44_v39 = vld [vmem:[%s7220_s1 + $0x1b8] sm:$0xff]  ;;  %v132_v41 = vld [vmem:[%s7220_s1 + $0x1a0] sm:$0xff] }
  0x11   :  { %4765 = vmatpush3.bf16.msra.mxu0 %v5769_v24  ;;  %4789 = vmatpush3.bf16.msra.mxu1 %v5773_v25 }
  0x12   :  { %4766 = vmatprep.subr.bf16.mxu0 %v5657_v3  ;;  %4790 = vmatprep.subr.bf16.mxu1 %v5657_v3 }
  0x15   :  { %4768 = vmatpush3.bf16.msra.mxu0 %v5789_v30  ;;  %4792 = vmatpush3.bf16.msra.mxu1 %v5793_v31 }
  0x16   :  { %4769 = vmatprep.subr.bf16.mxu0 %v5657_v3  ;;  %4793 = vmatprep.subr.bf16.mxu1 %v5657_v3 }
  0x17   :  { %12 = vsyncpa [#allocation7], 0  ;;  %v5829_v42 = vpack.c.bf16 %v44_v39, %v43_v38  ;;  %v5833_v43 = vpack.c.bf16 %v132_v41, %v131_v40  ;;  %v45_v44 = vld [vmem:[%s7220_s1 + $0x1d8] sm:$0xff]  ;;  %v133_v46 = vld [vmem:[%s7220_s1 + $0x1c0] sm:$0xff]  ;;  %s5660_s18 = smov [#allocation6]  }
  0x18   :  { %v46_v45 = vld [vmem:[%s7220_s1 + $0x1f8] sm:$0xff]  ;;  %v134_v47 = vld [vmem:[%s7220_s1 + $0x1e0] sm:$0xff]  ;;  %v207_v50 = vld [vmem:[%s7220_s1 + $0x8] sm:$0xff]  ;;  %s3047_s19 = sshll.u32 %s5660_s18, 4  ;;  %s3048_s19 = int_to_ptr.vmem [resolvable:$true] %s3047_s19 }
  0x19   :  { %4771 = vmatpush3.bf16.msra.mxu0 %v5809_v36  ;;  %4795 = vmatpush3.bf16.msra.mxu1 %v5813_v37  ;;  %v5849_v48 = vpack.c.bf16 %v46_v45, %v45_v44  ;;  %v5853_v49 = vpack.c.bf16 %v134_v47, %v133_v46  ;;  %v208_v51 = vld [vmem:[%s7220_s1 + $0x28] sm:$0xff]  ;;  %v295_v52 = vld [vmem:[%s7220_s1 + $0x10] sm:$0xff]  ;;  %v5872_v54 = vld [vmem:[%s7221_s2] sm:$0xff]  ;;  %p5614_p1 = scmp.lt.s32.totalorder %s3048_s19, %s3048_s19 }
  0x1a   :  { %4772 = vmatprep.subr.bf16.mxu0 %v5657_v3  ;;  %4796 = vmatprep.subr.bf16.mxu1 %v5657_v3  ;;  %v296_v53 = vld [vmem:[%s7220_s1 + $0x30] sm:$0xff]  ;;  %v5874_v55 = vpack.c.bf16 %v208_v51, %v207_v50  ;;  %v209_v57 = vld [vmem:[%s7220_s1 + $0x48] sm:$0xff] }
  0x1b   :  { %v5878_v56 = vpack.c.bf16 %v296_v53, %v295_v52  ;;  %v210_v58 = vld [vmem:[%s7220_s1 + $0x68] sm:$0xff]  ;;  %v297_v59 = vld [vmem:[%s7220_s1 + $0x50] sm:$0xff] }
  0x1c   :  { %v298_v60 = vld [vmem:[%s7220_s1 + $0x70] sm:$0xff]  ;;  %v5896_v61 = vpack.c.bf16 %v210_v58, %v209_v57  ;;  %v211_v63 = vld [vmem:[%s7220_s1 + $0x88] sm:$0xff] }
  0x1d   :  { %4774 = vmatpush3.bf16.msra.mxu0 %v5829_v42  ;;  %4798 = vmatpush3.bf16.msra.mxu1 %v5833_v43  ;;  %v5900_v62 = vpack.c.bf16 %v298_v60, %v297_v59  ;;  %v212_v0 = vld [vmem:[%s7220_s1 + $0xa8] sm:$0xff]  ;;  %v299_v1 = vld [vmem:[%s7220_s1 + $0x90] sm:$0xff]  ;;  %v205_v59 = vld [vmem:[%s7219_s0] sm:$0xff] }
  0x1e   :  { %4775 = vmatprep.subr.bf16.mxu0 %v5657_v3  ;;  %4799 = vmatprep.subr.bf16.mxu1 %v5657_v3  ;;  %v300_v2 = vld [vmem:[%s7220_s1 + $0xb0] sm:$0xff]  ;;  %v5920_v5 = vpack.c.bf16 %v212_v0, %v211_v63  ;;  %v213_v7 = vld [vmem:[%s7220_s1 + $0xc8] sm:$0xff] }
  0x1f   :  { %v5924_v6 = vpack.c.bf16 %v300_v2, %v299_v1  ;;  %v214_v9 = vld [vmem:[%s7220_s1 + $0xe8] sm:$0xff]  ;;  %v301_v10 = vld [vmem:[%s7220_s1 + $0xd0] sm:$0xff] }
  0x20   :  { %v302_v14 = vld [vmem:[%s7220_s1 + $0xf0] sm:$0xff]  ;;  %v5940_v15 = vpack.c.bf16 %v214_v9, %v213_v7  ;;  %v215_v17 = vld [vmem:[%s7220_s1 + $0x108] sm:$0xff] }
  0x21   :  { %4777 = vmatpush3.bf16.msra.mxu0 %v5849_v48  ;;  %4801 = vmatpush3.bf16.msra.mxu1 %v5853_v49  ;;  %v5944_v16 = vpack.c.bf16 %v302_v14, %v301_v10  ;;  %v216_v20 = vld [vmem:[%s7220_s1 + $0x128] sm:$0xff]  ;;  %v303_v21 = vld [vmem:[%s7220_s1 + $0x110] sm:$0xff] }
  0x22   :  { %4802 = vmatprep.subr.bf16.mxu0 %v5657_v3  ;;  %4826 = vmatprep.subr.bf16.mxu1 %v5657_v3  ;;  %v304_v22 = vld [vmem:[%s7220_s1 + $0x130] sm:$0xff]  ;;  %v5960_v23 = vpack.c.bf16 %v216_v20, %v215_v17  ;;  %v217_v27 = vld [vmem:[%s7220_s1 + $0x148] sm:$0xff] }
  0x23   :  { %v5964_v26 = vpack.c.bf16 %v304_v22, %v303_v21  ;;  %v218_v28 = vld [vmem:[%s7220_s1 + $0x168] sm:$0xff]  ;;  %v305_v29 = vld [vmem:[%s7220_s1 + $0x150] sm:$0xff]  ;;  %v117_v21 = vld [vmem:[%s7219_s0 + $0x18] sm:$0xff] }
  0x24   :  { %3667 = vmatmul.mubr.f32.vlgmr.msra.gmra.mrb[0].mxu0 %v5872_v54  ;;  %3702 = vmatmul.mubr.f32.vlgmr.msra.gmra.mrb[0].mxu1 %v5872_v54  ;;  %v306_v32 = vld [vmem:[%s7220_s1 + $0x170] sm:$0xff]  ;;  %v5980_v33 = vpack.c.bf16 %v218_v28, %v217_v27  ;;  %v219_v35 = vld [vmem:[%s7220_s1 + $0x188] sm:$0xff] }
  0x25   :  { %4804 = vmatpush3.bf16.msra.mxu0 %v5874_v55  ;;  %4828 = vmatpush3.bf16.msra.mxu1 %v5878_v56  ;;  %v5984_v34 = vpack.c.bf16 %v306_v32, %v305_v29  ;;  %v220_v38 = vld [vmem:[%s7220_s1 + $0x1a8] sm:$0xff]  ;;  %v307_v39 = vld [vmem:[%s7220_s1 + $0x190] sm:$0xff] }
  0x26   :  { %4805 = vmatprep.subr.bf16.mxu0 %v5657_v3  ;;  %4829 = vmatprep.subr.bf16.mxu1 %v5657_v3  ;;  %v308_v40 = vld [vmem:[%s7220_s1 + $0x1b0] sm:$0xff]  ;;  %v6000_v41 = vpack.c.bf16 %v220_v38, %v219_v35  ;;  %v221_v45 = vld [vmem:[%s7220_s1 + $0x1c8] sm:$0xff] }
  0x27   :  { %3736 = vmatprep.mubr.msk.f32.mxu0 %vm5658_vm0, %v5659_v11  ;;  %3771 = vmatprep.mubr.msk.f32.mxu1 %vm5658_vm0, %v5659_v11  ;;  %v6004_v44 = vpack.c.bf16 %v308_v40, %v307_v39  ;;  %v222_v46 = vld [vmem:[%s7220_s1 + $0x1e8] sm:$0xff]  ;;  %v309_v47 = vld [vmem:[%s7220_s1 + $0x1d0] sm:$0xff] }
  0x28   :  { %v310_v50 = vld [vmem:[%s7220_s1 + $0x1f0] sm:$0xff]  ;;  %v6020_v51 = vpack.c.bf16 %v222_v46, %v221_v45  ;;  %v293_v0 = vld [vmem:[%s7219_s0 + $0x8] sm:$0xff]  ;;  %v27_v45 = vld [vmem:[%s7222_s3] sm:$0xff] }
  0x29   :  { %4807 = vmatpush3.bf16.msra.mxu0 %v5896_v61  ;;  %4831 = vmatpush3.bf16.msra.mxu1 %v5900_v62  ;;  %v6024_v52 = vpack.c.bf16 %v310_v50, %v309_v47  ;;  %v381_v1 = vld [vmem:[%s7219_s0 + $0x10] sm:$0xff] }
  0x2a   :  { %4808 = vmatprep.subr.bf16.mxu0 %v5657_v3  ;;  %4832 = vmatprep.subr.bf16.mxu1 %v5657_v3 }
  0x2d   :  { %4810 = vmatpush3.bf16.msra.mxu0 %v5920_v5  ;;  %4834 = vmatpush3.bf16.msra.mxu1 %v5924_v6 }
  0x2e   :  { %4811 = vmatprep.subr.bf16.mxu0 %v5657_v3  ;;  %4835 = vmatprep.subr.bf16.mxu1 %v5657_v3 }
  0x31   :  { %4813 = vmatpush3.bf16.msra.mxu0 %v5940_v15  ;;  %4837 = vmatpush3.bf16.msra.mxu1 %v5944_v16 }
  0x32   :  { %4814 = vmatprep.subr.bf16.mxu0 %v5657_v3  ;;  %4838 = vmatprep.subr.bf16.mxu1 %v5657_v3 }
  0x35   :  { %4816 = vmatpush3.bf16.msra.mxu0 %v5960_v23  ;;  %4840 = vmatpush3.bf16.msra.mxu1 %v5964_v26 }
  0x36   :  { %4817 = vmatprep.subr.bf16.mxu0 %v5657_v3  ;;  %4841 = vmatprep.subr.bf16.mxu1 %v5657_v3 }
  0x39   :  { %4819 = vmatpush3.bf16.msra.mxu0 %v5980_v33  ;;  %4843 = vmatpush3.bf16.msra.mxu1 %v5984_v34 }
  0x3a   :  { %4820 = vmatprep.subr.bf16.mxu0 %v5657_v3  ;;  %4844 = vmatprep.subr.bf16.mxu1 %v5657_v3 }
  0x3d   :  { %4822 = vmatpush3.bf16.msra.mxu0 %v6000_v41  ;;  %4846 = vmatpush3.bf16.msra.mxu1 %v6004_v44 }
  0x3e   :  { %4823 = vmatprep.subr.bf16.mxu0 %v5657_v3  ;;  %4847 = vmatprep.subr.bf16.mxu1 %v5657_v3 }
  0x41   :  { %4825 = vmatpush3.bf16.msra.mxu0 %v6020_v51  ;;  %4849 = vmatpush3.bf16.msra.mxu1 %v6024_v52 }
  0x42   :  { %4850 = vmatprep.subr.bf16.mxu0 %v5657_v3  ;;  %4874 = vmatprep.subr.bf16.mxu1 %v5657_v3 }
  0x44   :  { %3737 = vmatmul.mubr.f32.vlgmr.msra.gmra.mrb[2].mxu0 %v5872_v54  ;;  %3772 = vmatmul.mubr.f32.vlgmr.msra.gmra.mrb[2].mxu1 %v5872_v54 }
  0x45   :  { %4852 = vmatpush3.bf16.msra.mxu0 %v5705_v4  ;;  %4876 = vmatpush3.bf16.msra.mxu1 %v5716_v8 }
  0x46   :  { %4853 = vmatprep.subr.bf16.mxu0 %v5657_v3  ;;  %4877 = vmatprep.subr.bf16.mxu1 %v5657_v3 }
  0x47   :  { %3806 = vmatprep.mubr.msk.f32.mxu0 %vm5658_vm0, %v5659_v11  ;;  %3841 = vmatprep.mubr.msk.f32.mxu1 %vm5658_vm0, %v5659_v11 }
  0x49   :  { %4855 = vmatpush3.bf16.msra.mxu0 %v5729_v12  ;;  %4879 = vmatpush3.bf16.msra.mxu1 %v5733_v13 }
  0x4a   :  { %4856 = vmatprep.subr.bf16.mxu0 %v5657_v3  ;;  %4880 = vmatprep.subr.bf16.mxu1 %v5657_v3 }
  0x4d   :  { %4858 = vmatpush3.bf16.msra.mxu0 %v5749_v18  ;;  %4882 = vmatpush3.bf16.msra.mxu1 %v5753_v19 }
  0x4e   :  { %4859 = vmatprep.subr.bf16.mxu0 %v5657_v3  ;;  %4883 = vmatprep.subr.bf16.mxu1 %v5657_v3 }
  0x51   :  { %4861 = vmatpush3.bf16.msra.mxu0 %v5769_v24  ;;  %4885 = vmatpush3.bf16.msra.mxu1 %v5773_v25 }
  0x52   :  { %4862 = vmatprep.subr.bf16.mxu0 %v5657_v3  ;;  %4886 = vmatprep.subr.bf16.mxu1 %v5657_v3 }
  0x55   :  { %4864 = vmatpush3.bf16.msra.mxu0 %v5789_v30  ;;  %4888 = vmatpush3.bf16.msra.mxu1 %v5793_v31 }
  0x56   :  { %4865 = vmatprep.subr.bf16.mxu0 %v5657_v3  ;;  %4889 = vmatprep.subr.bf16.mxu1 %v5657_v3 }
  0x59   :  { %4867 = vmatpush3.bf16.msra.mxu0 %v5809_v36  ;;  %4891 = vmatpush3.bf16.msra.mxu1 %v5813_v37 }
  0x5a   :  { %4868 = vmatprep.subr.bf16.mxu0 %v5657_v3  ;;  %4892 = vmatprep.subr.bf16.mxu1 %v5657_v3 }
  0x5d   :  { %4870 = vmatpush3.bf16.msra.mxu0 %v5829_v42  ;;  %4894 = vmatpush3.bf16.msra.mxu1 %v5833_v43 }
  0x5e   :  { %4871 = vmatprep.subr.bf16.mxu0 %v5657_v3  ;;  %4895 = vmatprep.subr.bf16.mxu1 %v5657_v3 }
  0x61   :  { %4873 = vmatpush3.bf16.msra.mxu0 %v5849_v48  ;;  %4897 = vmatpush3.bf16.msra.mxu1 %v5853_v49 }
  0x62   :  { %4898 = vmatprep.subr.bf16.mxu0 %v5657_v3  ;;  %4922 = vmatprep.subr.bf16.mxu1 %v5657_v3 }
  0xf7   :  { %v113_v53 = vpop.f32.mrb[0].mxu0  ;;  %v201_v57 = vpop.f32.mrb[0].mxu1 }
  0xf8   :  { %v3668_v54 = vpop.f32.mrb[1].mxu0  ;;  %v3703_v58 = vpop.f32.mrb[1].mxu1  ;;  %v206_v60 = vadd.f32 %v205_v59, %v201_v57  ;;  %v118_v27 = vadd.f32 %v117_v21, %v113_v53 }
  0xfa   :  { %v387_v63 = vmul.f32 0.5, %v206_v60  ;;  %v383_v29 = vmul.f32 0.5, %v118_v27 }
  0xfc   :  { %5529 = vtanh.f32 %v387_v63  ;;  %v3062_v63 = vld [vmem:[%s7219_s0 + $0x38] sm:$0xff] }
 0x106   :  { %v5530_v22 = vpop.eup %5529 }
 0x107   :  { %v389_v28 = vmul.f32 0.5, %v5530_v22 }
 0x109   :  { %v390_v32 = vadd.f32 0.5, %v389_v28 }
 0x117   :  { %v289_v2 = vpop.f32.mrb[2].mxu0  ;;  %v377_v9 = vpop.f32.mrb[2].mxu1 }
 0x118   :  { %v294_v7 = vadd.f32 %v293_v0, %v289_v2  ;;  %v3738_v10 = vpop.f32.mrb[3].mxu0  ;;  %v382_v14 = vadd.f32 %v381_v1, %v377_v9  ;;  %v3773_v17 = vpop.f32.mrb[3].mxu1 }
 0x11a   :  { %v391_v20 = vmul.f32 0.5, %v294_v7  ;;  %5531 = vtanh.f32 %v382_v14 }
 0x11c   :  { %5533 = vtanh.f32 %v391_v20 }
 0x11d   :  { %5535 = vtanh.f32 %v383_v29 }
 0x124   :  { %v5532_v35 = vpop.eup %5531 }
 0x125   :  { %v397_v39 = vmul.f32 %v5532_v35, %v390_v32 }
 0x126   :  { %v5534_v38 = vpop.eup %5533 }
 0x127   :  { %v393_v40 = vmul.f32 0.5, %v5534_v38  ;;  %v5536_v53 = vpop.eup %5535  ;;  %v1247_v38 = vld [vmem:[%s7220_s1 + $0xa0] sm:$0xff] }
 0x128   :  { %v385_v54 = vmul.f32 0.5, %v5536_v53 }
 0x129   :  { %v394_v46 = vadd.f32 0.5, %v393_v40  ;;  %v1159_v40 = vld [vmem:[%s7220_s1 + $0xd8] sm:$0xff] }
 0x12a   :  { %v386_v57 = vadd.f32 0.5, %v385_v54  ;;  %v1161_v54 = vld [vmem:[%s7220_s1 + $0x118] sm:$0xff] }
 0x12b   :  { %v396_v47 = vmul.f32 %v394_v46, %v27_v45  ;;  %v1160_v45 = vld [vmem:[%s7220_s1 + $0xf8] sm:$0xff]  ;;  %v1248_v46 = vld [vmem:[%s7220_s1 + $0xc0] sm:$0xff] }
 0x12d   :  { %v6084_v50 = vadd.f32 %v397_v39, %v396_v47  ;;  %v6286_v47 = vpack.c.bf16 %v1160_v45, %v1159_v40 }
 0x12f   :  { %5537 = vtanh.f32 %v6084_v50  ;;  %402 = vst [vmem:[#allocation6] sm:$0xff] %v6084_v50 }
 0x139   :  { %v5538_v58 = vpop.eup %5537 }
 0x13a   :  { %v400_v59 = vmul.f32 %v5538_v58, %v386_v57  ;;  %v1162_v57 = vld [vmem:[%s7220_s1 + $0x138] sm:$0xff]  ;;  %v1250_v58 = vld [vmem:[%s7220_s1 + $0x100] sm:$0xff] }
 0x13c   :  { %401 = vst [vmem:[#allocation4] sm:$0xff] %v400_v59  ;;  %3807 = vmatmul.mubr.f32.vlgmr.msra.gmra.mrb[4].mxu0 %v400_v59  ;;  %3842 = vmatmul.mubr.f32.vlgmr.msra.gmra.mrb[4].mxu1 %v400_v59 }
 0x13d   :  { %4900 = vmatpush3.bf16.msra.mxu0 %v5874_v55  ;;  %4924 = vmatpush3.bf16.msra.mxu1 %v5878_v56 }
 0x13e   :  { %4901 = vmatprep.subr.bf16.mxu0 %v5657_v3  ;;  %4925 = vmatprep.subr.bf16.mxu1 %v5657_v3 }
 0x13f   :  { %3876 = vmatprep.mubr.msk.f32.mxu0 %vm5658_vm0, %v5659_v11  ;;  %3911 = vmatprep.mubr.msk.f32.mxu1 %vm5658_vm0, %v5659_v11 }
 0x141   :  { %4903 = vmatpush3.bf16.msra.mxu0 %v5896_v61  ;;  %4927 = vmatpush3.bf16.msra.mxu1 %v5900_v62 }
 0x142   :  { %4904 = vmatprep.subr.bf16.mxu0 %v5657_v3  ;;  %4928 = vmatprep.subr.bf16.mxu1 %v5657_v3 }
 0x145   :  { %4906 = vmatpush3.bf16.msra.mxu0 %v5920_v5  ;;  %4930 = vmatpush3.bf16.msra.mxu1 %v5924_v6 }
 0x146   :  { %4907 = vmatprep.subr.bf16.mxu0 %v5657_v3  ;;  %4931 = vmatprep.subr.bf16.mxu1 %v5657_v3 }
 0x149   :  { %4909 = vmatpush3.bf16.msra.mxu0 %v5940_v15  ;;  %4933 = vmatpush3.bf16.msra.mxu1 %v5944_v16 }
 0x14a   :  { %4910 = vmatprep.subr.bf16.mxu0 %v5657_v3  ;;  %4934 = vmatprep.subr.bf16.mxu1 %v5657_v3 }
 0x14d   :  { %4912 = vmatpush3.bf16.msra.mxu0 %v5960_v23  ;;  %4936 = vmatpush3.bf16.msra.mxu1 %v5964_v26 }
 0x14e   :  { %4913 = vmatprep.subr.bf16.mxu0 %v5657_v3  ;;  %4937 = vmatprep.subr.bf16.mxu1 %v5657_v3 }
 0x151   :  { %4915 = vmatpush3.bf16.msra.mxu0 %v5980_v33  ;;  %4939 = vmatpush3.bf16.msra.mxu1 %v5984_v34 }
 0x152   :  { %4916 = vmatprep.subr.bf16.mxu0 %v5657_v3  ;;  %4940 = vmatprep.subr.bf16.mxu1 %v5657_v3 }
 0x155   :  { %4918 = vmatpush3.bf16.msra.mxu0 %v6000_v41  ;;  %4942 = vmatpush3.bf16.msra.mxu1 %v6004_v44 }
 0x156   :  { %4919 = vmatprep.subr.bf16.mxu0 %v5657_v3  ;;  %4943 = vmatprep.subr.bf16.mxu1 %v5657_v3 }
 0x159   :  { %4921 = vmatpush3.bf16.msra.mxu0 %v6020_v51  ;;  %4945 = vmatpush3.bf16.msra.mxu1 %v6024_v52 }
 0x15a   :  { %4946 = vmatprep.subr.bf16.mxu0 %v5657_v3  ;;  %4970 = vmatprep.subr.bf16.mxu1 %v5657_v3 }
 0x15c   :  { %3877 = vmatmul.mubr.f32.vlgmr.msra.gmra.mrb[6].mxu0 %v400_v59  ;;  %3912 = vmatmul.mubr.f32.vlgmr.msra.gmra.mrb[6].mxu1 %v400_v59  ;;  %v6306_v59 = vpack.c.bf16 %v1162_v57, %v1161_v54 }
 0x15d   :  { %4948 = vmatpush3.bf16.msra.mxu0 %v5705_v4  ;;  %4972 = vmatpush3.bf16.msra.mxu1 %v5716_v8 }
 0x15e   :  { %4949 = vmatprep.subr.bf16.mxu0 %v5657_v3  ;;  %4973 = vmatprep.subr.bf16.mxu1 %v5657_v3 }
 0x15f   :  { %3946 = vmatprep.mubr.msk.f32.mxu0 %vm5658_vm0, %v5659_v11  ;;  %3981 = vmatprep.mubr.msk.f32.mxu1 %vm5658_vm0, %v5659_v11 }
 0x161   :  { %4951 = vmatpush3.bf16.msra.mxu0 %v5729_v12  ;;  %4975 = vmatpush3.bf16.msra.mxu1 %v5733_v13 }
 0x162   :  { %4952 = vmatprep.subr.bf16.mxu0 %v5657_v3  ;;  %4976 = vmatprep.subr.bf16.mxu1 %v5657_v3 }
 0x165   :  { %4954 = vmatpush3.bf16.msra.mxu0 %v5749_v18  ;;  %4978 = vmatpush3.bf16.msra.mxu1 %v5753_v19  ;;  %v3063_v18 = vld [vmem:[%s7219_s0 + $0x20] sm:$0xff] }
 0x166   :  { %4955 = vmatprep.subr.bf16.mxu0 %v5657_v3  ;;  %4979 = vmatprep.subr.bf16.mxu1 %v5657_v3 }
 0x169   :  { %4957 = vmatpush3.bf16.msra.mxu0 %v5769_v24  ;;  %4981 = vmatpush3.bf16.msra.mxu1 %v5773_v25  ;;  %v3064_v25 = vld [vmem:[%s7219_s0 + $0x28] sm:$0xff] }
 0x16a   :  { %4958 = vmatprep.subr.bf16.mxu0 %v5657_v3  ;;  %4982 = vmatprep.subr.bf16.mxu1 %v5657_v3 }
 0x16d   :  { %4960 = vmatpush3.bf16.msra.mxu0 %v5789_v30  ;;  %4984 = vmatpush3.bf16.msra.mxu1 %v5793_v31  ;;  %v3065_v30 = vld [vmem:[%s7219_s0 + $0x30] sm:$0xff] }
 0x16e   :  { %4961 = vmatprep.subr.bf16.mxu0 %v5657_v3  ;;  %4985 = vmatprep.subr.bf16.mxu1 %v5657_v3 }
 0x171   :  { %4963 = vmatpush3.bf16.msra.mxu0 %v5809_v36  ;;  %4987 = vmatpush3.bf16.msra.mxu1 %v5813_v37 }
 0x172   :  { %4964 = vmatprep.subr.bf16.mxu0 %v5657_v3  ;;  %4988 = vmatprep.subr.bf16.mxu1 %v5657_v3 }
 0x175   :  { %4966 = vmatpush3.bf16.msra.mxu0 %v5829_v42  ;;  %4990 = vmatpush3.bf16.msra.mxu1 %v5833_v43 }
 0x176   :  { %4967 = vmatprep.subr.bf16.mxu0 %v5657_v3  ;;  %4991 = vmatprep.subr.bf16.mxu1 %v5657_v3 }
 0x179   :  { %4969 = vmatpush3.bf16.msra.mxu0 %v5849_v48  ;;  %4993 = vmatpush3.bf16.msra.mxu1 %v5853_v49 }
 0x17a   :  { %4994 = vmatprep.subr.bf16.mxu0 %v5657_v3  ;;  %5018 = vmatprep.subr.bf16.mxu1 %v5657_v3 }
 0x20f   :  { %v485_v4 = vpop.f32.mrb[4].mxu0  ;;  %v574_v8 = vpop.f32.mrb[4].mxu1 }
 0x210   :  { %v3808_v12 = vpop.f32.mrb[5].mxu0  ;;  %v3843_v13 = vpop.f32.mrb[5].mxu1  ;;  %v579_v19 = vadd.f32 %v3063_v18, %v574_v8  ;;  %v491_v0 = vadd.f32 %v3062_v63, %v485_v4  ;;  %v1251_v4 = vld [vmem:[%s7220_s1 + $0x120] sm:$0xff] }
 0x211   :  { %v6311_v8 = vpack.c.bf16 %v1251_v4, %v1250_v58  ;;  %v1163_v12 = vld [vmem:[%s7220_s1 + $0x158] sm:$0xff]  ;;  %v1252_v18 = vld [vmem:[%s7220_s1 + $0x140] sm:$0xff]  ;;  %v1330_v58 = vld [vmem:[%s7220_s1 + $0x8] sm:$0xff] }
 0x212   :  { %v760_v24 = vmul.f32 0.5, %v579_v19  ;;  %v756_v2 = vmul.f32 0.5, %v491_v0  ;;  %v1164_v13 = vld [vmem:[%s7220_s1 + $0x178] sm:$0xff]  ;;  %v1257_v63 = vld [vmem:[%s7220_s1 + $0x1e0] sm:$0xff]  ;;  %v1331_v4 = vld [vmem:[%s7220_s1 + $0x28] sm:$0xff] }
 0x213   :  { %v6326_v19 = vpack.c.bf16 %v1164_v13, %v1163_v12  ;;  %v1419_v12 = vld [vmem:[%s7220_s1 + $0x30] sm:$0xff] }
 0x214   :  { %5539 = vtanh.f32 %v760_v24  ;;  %v1253_v24 = vld [vmem:[%s7220_s1 + $0x160] sm:$0xff] }
 0x21e   :  { %v5540_v60 = vpop.eup %5539 }
 0x21f   :  { %v762_v1 = vmul.f32 0.5, %v5540_v60  ;;  %v1256_v60 = vld [vmem:[%s7220_s1 + $0x1c0] sm:$0xff] }
 0x221   :  { %v763_v7 = vadd.f32 0.5, %v762_v1  ;;  %v6370_v1 = vpack.c.bf16 %v1257_v63, %v1256_v60 }
 0x22f   :  { %v662_v31 = vpop.f32.mrb[6].mxu0  ;;  %v750_v36 = vpop.f32.mrb[6].mxu1 }
 0x230   :  { %v667_v37 = vadd.f32 %v3064_v25, %v662_v31  ;;  %v755_v42 = vadd.f32 %v3065_v30, %v750_v36  ;;  %v3878_v43 = vpop.f32.mrb[7].mxu0  ;;  %v3913_v48 = vpop.f32.mrb[7].mxu1  ;;  %v6331_v25 = vpack.c.bf16 %v1253_v24, %v1252_v18  ;;  %v1165_v30 = vld [vmem:[%s7220_s1 + $0x198] sm:$0xff]  ;;  %v1254_v36 = vld [vmem:[%s7220_s1 + $0x180] sm:$0xff]  ;;  %v6406_v24 = vpack.c.bf16 %v1331_v4, %v1330_v58  ;;  %v1344_v58 = vld [vmem:[%s7220_s1 + $0x1c8] sm:$0xff] }
 0x231   :  { %v1166_v31 = vld [vmem:[%s7220_s1 + $0x1b8] sm:$0xff]  ;;  %v1345_v4 = vld [vmem:[%s7220_s1 + $0x1e8] sm:$0xff] }
 0x232   :  { %v764_v49 = vmul.f32 0.5, %v667_v37  ;;  %5541 = vtanh.f32 %v755_v42  ;;  %v6343_v37 = vpack.c.bf16 %v1166_v31, %v1165_v30  ;;  %v1255_v42 = vld [vmem:[%s7220_s1 + $0x1a0] sm:$0xff]  ;;  %v1167_v48 = vld [vmem:[%s7220_s1 + $0x1d8] sm:$0xff]  ;;  %v1332_v31 = vld [vmem:[%s7220_s1 + $0x48] sm:$0xff] }
 0x233   :  { %v6350_v43 = vpack.c.bf16 %v1255_v42, %v1254_v36  ;;  %v1333_v42 = vld [vmem:[%s7220_s1 + $0x68] sm:$0xff] }
 0x234   :  { %5543 = vtanh.f32 %v764_v49  ;;  %v1168_v49 = vld [vmem:[%s7220_s1 + $0x1f8] sm:$0xff]  ;;  %v6429_v60 = vpack.c.bf16 %v1333_v42, %v1332_v31 }
 0x235   :  { %5545 = vtanh.f32 %v756_v2  ;;  %v6366_v0 = vpack.c.bf16 %v1168_v49, %v1167_v48  ;;  %v1420_v48 = vld [vmem:[%s7220_s1 + $0x50] sm:$0xff] }
 0x236   :  { %v1421_v49 = vld [vmem:[%s7220_s1 + $0x70] sm:$0xff] }
 0x237   :  { %v6431_v63 = vpack.c.bf16 %v1421_v49, %v1420_v48  ;;  %v3071_v49 = vld [vmem:[%s7219_s0 + $0x60] sm:$0xff] }
 0x23c   :  { %v5542_v9 = vpop.eup %5541 }
 0x23d   :  { %v770_v10 = vmul.f32 %v5542_v9, %v763_v7 }
 0x23e   :  { %v5544_v14 = vpop.eup %5543 }
 0x23f   :  { %v766_v17 = vmul.f32 0.5, %v5544_v14  ;;  %v5546_v27 = vpop.eup %5545  ;;  %v3067_v14 = vld [vmem:[%s7219_s0 + $0x40] sm:$0xff] }
 0x240   :  { %v758_v28 = vmul.f32 0.5, %v5546_v27  ;;  %v3069_v27 = vld [vmem:[%s7219_s0 + $0x50] sm:$0xff] }
 0x241   :  { %v767_v20 = vadd.f32 0.5, %v766_v17 }
 0x242   :  { %v759_v29 = vadd.f32 0.5, %v758_v28 }
 0x243   :  { %v769_v21 = vmul.f32 %v767_v20, %v6084_v50  ;;  %v1249_v50 = vld [vmem:[%s7220_s1 + $0xe0] sm:$0xff] }
 0x244   :  { %v6291_v53 = vpack.c.bf16 %v1249_v50, %v1248_v46 }
 0x245   :  { %v6173_v22 = vadd.f32 %v770_v10, %v769_v21  ;;  %v3068_v21 = vld [vmem:[%s7219_s0 + $0x48] sm:$0xff] }
 0x247   :  { %5547 = vtanh.f32 %v6173_v22  ;;  %777 = vst [vmem:[#allocation6 + $0x8] sm:$0xff] %v6173_v22 }
 0x251   :  { %v5548_v32 = vpop.eup %5547 }
 0x252   :  { %v773_v35 = vmul.f32 %v5548_v32, %v759_v29 }
 0x254   :  { %775 = vst [vmem:[#allocation4 + $0x8] sm:$0xff] %v773_v35  ;;  %3947 = vmatmul.mubr.f32.vlgmr.msra.gmra.mrb[8].mxu0 %v773_v35  ;;  %3982 = vmatmul.mubr.f32.vlgmr.msra.gmra.mrb[8].mxu1 %v773_v35 }
 0x255   :  { %4996 = vmatpush3.bf16.msra.mxu0 %v5874_v55  ;;  %5020 = vmatpush3.bf16.msra.mxu1 %v5878_v56  ;;  %v1153_v55 = vld [vmem:[%s7220_s1 + $0x18] sm:$0xff] }
 0x256   :  { %4997 = vmatprep.subr.bf16.mxu0 %v5657_v3  ;;  %5021 = vmatprep.subr.bf16.mxu1 %v5657_v3  ;;  %v1154_v56 = vld [vmem:[%s7220_s1 + $0x38] sm:$0xff] }
 0x257   :  { %4016 = vmatprep.mubr.msk.f32.mxu0 %vm5658_vm0, %v5659_v11  ;;  %4051 = vmatprep.mubr.msk.f32.mxu1 %vm5658_vm0, %v5659_v11 }
 0x259   :  { %4999 = vmatpush3.bf16.msra.mxu0 %v5896_v61  ;;  %5023 = vmatpush3.bf16.msra.mxu1 %v5900_v62  ;;  %v1242_v61 = vld [vmem:[%s7220_s1] sm:$0xff]  ;;  %v6226_v62 = vpack.c.bf16 %v1154_v56, %v1153_v55 }
 0x25a   :  { %5000 = vmatprep.subr.bf16.mxu0 %v5657_v3  ;;  %5024 = vmatprep.subr.bf16.mxu1 %v5657_v3 }
 0x25d   :  { %5002 = vmatpush3.bf16.msra.mxu0 %v5920_v5  ;;  %5026 = vmatpush3.bf16.msra.mxu1 %v5924_v6  ;;  %v1243_v5 = vld [vmem:[%s7220_s1 + $0x20] sm:$0xff] }
 0x25e   :  { %5003 = vmatprep.subr.bf16.mxu0 %v5657_v3  ;;  %5027 = vmatprep.subr.bf16.mxu1 %v5657_v3  ;;  %v6231_v6 = vpack.c.bf16 %v1243_v5, %v1242_v61 }
 0x261   :  { %5005 = vmatpush3.bf16.msra.mxu0 %v5940_v15  ;;  %5029 = vmatpush3.bf16.msra.mxu1 %v5944_v16  ;;  %v1155_v15 = vld [vmem:[%s7220_s1 + $0x58] sm:$0xff] }
 0x262   :  { %5006 = vmatprep.subr.bf16.mxu0 %v5657_v3  ;;  %5030 = vmatprep.subr.bf16.mxu1 %v5657_v3  ;;  %v1156_v16 = vld [vmem:[%s7220_s1 + $0x78] sm:$0xff] }
 0x265   :  { %5008 = vmatpush3.bf16.msra.mxu0 %v5960_v23  ;;  %5032 = vmatpush3.bf16.msra.mxu1 %v5964_v26  ;;  %v1244_v23 = vld [vmem:[%s7220_s1 + $0x40] sm:$0xff]  ;;  %v6246_v26 = vpack.c.bf16 %v1156_v16, %v1155_v15  ;;  %v3066_v15 = vld [vmem:[%s7219_s0 + $0x58] sm:$0xff] }
 0x266   :  { %5009 = vmatprep.subr.bf16.mxu0 %v5657_v3  ;;  %5033 = vmatprep.subr.bf16.mxu1 %v5657_v3 }
 0x269   :  { %5011 = vmatpush3.bf16.msra.mxu0 %v5980_v33  ;;  %5035 = vmatpush3.bf16.msra.mxu1 %v5984_v34  ;;  %v1245_v33 = vld [vmem:[%s7220_s1 + $0x60] sm:$0xff] }
 0x26a   :  { %5012 = vmatprep.subr.bf16.mxu0 %v5657_v3  ;;  %5036 = vmatprep.subr.bf16.mxu1 %v5657_v3  ;;  %v6251_v34 = vpack.c.bf16 %v1245_v33, %v1244_v23 }
 0x26d   :  { %5014 = vmatpush3.bf16.msra.mxu0 %v6000_v41  ;;  %5038 = vmatpush3.bf16.msra.mxu1 %v6004_v44  ;;  %v1157_v41 = vld [vmem:[%s7220_s1 + $0x98] sm:$0xff] }
 0x26e   :  { %5015 = vmatprep.subr.bf16.mxu0 %v5657_v3  ;;  %5039 = vmatprep.subr.bf16.mxu1 %v5657_v3  ;;  %v1158_v44 = vld [vmem:[%s7220_s1 + $0xb8] sm:$0xff] }
 0x271   :  { %5017 = vmatpush3.bf16.msra.mxu0 %v6020_v51  ;;  %5041 = vmatpush3.bf16.msra.mxu1 %v6024_v52  ;;  %v1246_v51 = vld [vmem:[%s7220_s1 + $0x80] sm:$0xff]  ;;  %v6266_v52 = vpack.c.bf16 %v1158_v44, %v1157_v41 }
 0x272   :  { %5042 = vmatprep.subr.bf16.mxu0 %v5657_v3  ;;  %5066 = vmatprep.subr.bf16.mxu1 %v5657_v3  ;;  %v6271_v39 = vpack.c.bf16 %v1247_v38, %v1246_v51 }
 0x274   :  { %4017 = vmatmul.mubr.f32.vlgmr.msra.gmra.mrb[10].mxu0 %v773_v35  ;;  %4052 = vmatmul.mubr.f32.vlgmr.msra.gmra.mrb[10].mxu1 %v773_v35 }
 0x275   :  { %4086 = vmatprep.mubr.msk.f32.mxu0 %vm5658_vm0, %v5659_v11  ;;  %4121 = vmatprep.mubr.msk.f32.mxu1 %vm5658_vm0, %v5659_v11 }
 0x276   :  { %5044 = vmatpush3.bf16.msra.mxu0 %v6226_v62  ;;  %5068 = vmatpush3.bf16.msra.mxu1 %v6231_v6 }
 0x277   :  { %5045 = vmatprep.subr.bf16.mxu0 %v5657_v3  ;;  %5069 = vmatprep.subr.bf16.mxu1 %v5657_v3 }
 0x27a   :  { %5047 = vmatpush3.bf16.msra.mxu0 %v6246_v26  ;;  %5071 = vmatpush3.bf16.msra.mxu1 %v6251_v34 }
 0x27b   :  { %5048 = vmatprep.subr.bf16.mxu0 %v5657_v3  ;;  %5072 = vmatprep.subr.bf16.mxu1 %v5657_v3 }
 0x27e   :  { %5050 = vmatpush3.bf16.msra.mxu0 %v6266_v52  ;;  %5074 = vmatpush3.bf16.msra.mxu1 %v6271_v39 }
 0x27f   :  { %5051 = vmatprep.subr.bf16.mxu0 %v5657_v3  ;;  %5075 = vmatprep.subr.bf16.mxu1 %v5657_v3 }
 0x282   :  { %5053 = vmatpush3.bf16.msra.mxu0 %v6286_v47  ;;  %5077 = vmatpush3.bf16.msra.mxu1 %v6291_v53 }
 0x283   :  { %5054 = vmatprep.subr.bf16.mxu0 %v5657_v3  ;;  %5078 = vmatprep.subr.bf16.mxu1 %v5657_v3 }
 0x286   :  { %5056 = vmatpush3.bf16.msra.mxu0 %v6306_v59  ;;  %5080 = vmatpush3.bf16.msra.mxu1 %v6311_v8 }
 0x287   :  { %5057 = vmatprep.subr.bf16.mxu0 %v5657_v3  ;;  %5081 = vmatprep.subr.bf16.mxu1 %v5657_v3 }
 0x28a   :  { %5059 = vmatpush3.bf16.msra.mxu0 %v6326_v19  ;;  %5083 = vmatpush3.bf16.msra.mxu1 %v6331_v25 }
 0x28b   :  { %5060 = vmatprep.subr.bf16.mxu0 %v5657_v3  ;;  %5084 = vmatprep.subr.bf16.mxu1 %v5657_v3 }
 0x28e   :  { %5062 = vmatpush3.bf16.msra.mxu0 %v6343_v37  ;;  %5086 = vmatpush3.bf16.msra.mxu1 %v6350_v43 }
 0x28f   :  { %5063 = vmatprep.subr.bf16.mxu0 %v5657_v3  ;;  %5087 = vmatprep.subr.bf16.mxu1 %v5657_v3 }
 0x292   :  { %5065 = vmatpush3.bf16.msra.mxu0 %v6366_v0  ;;  %5089 = vmatpush3.bf16.msra.mxu1 %v6370_v1 }
 0x293   :  { %5090 = vmatprep.subr.bf16.mxu0 %v5657_v3  ;;  %5114 = vmatprep.subr.bf16.mxu1 %v5657_v3 }
 0x327   :  { %v860_v2 = vpop.f32.mrb[8].mxu0  ;;  %v949_v7 = vpop.f32.mrb[8].mxu1 }
 0x328   :  { %v3948_v9 = vpop.f32.mrb[9].mxu0  ;;  %v3983_v10 = vpop.f32.mrb[9].mxu1  ;;  %v954_v17 = vadd.f32 %v3067_v14, %v949_v7  ;;  %v866_v16 = vadd.f32 %v3066_v15, %v860_v2  ;;  %v1334_v2 = vld [vmem:[%s7220_s1 + $0x88] sm:$0xff] }
 0x329   :  { %v1335_v7 = vld [vmem:[%s7220_s1 + $0xa8] sm:$0xff]  ;;  %v1422_v9 = vld [vmem:[%s7220_s1 + $0x90] sm:$0xff] }
 0x32a   :  { %v1135_v20 = vmul.f32 0.5, %v954_v17  ;;  %v1131_v33 = vmul.f32 0.5, %v866_v16  ;;  %v1423_v10 = vld [vmem:[%s7220_s1 + $0xb0] sm:$0xff]  ;;  %v6453_v14 = vpack.c.bf16 %v1335_v7, %v1334_v2  ;;  %v1340_v16 = vld [vmem:[%s7220_s1 + $0x148] sm:$0xff] }
 0x32b   :  { %v6455_v17 = vpack.c.bf16 %v1423_v10, %v1422_v9  ;;  %v3072_v9 = vld [vmem:[%s7219_s0 + $0x68] sm:$0xff]  ;;  %v3073_v10 = vld [vmem:[%s7219_s0 + $0x70] sm:$0xff] }
 0x32c   :  { %5549 = vtanh.f32 %v1135_v20  ;;  %v1336_v20 = vld [vmem:[%s7220_s1 + $0xc8] sm:$0xff] }
 0x336   :  { %v5550_v5 = vpop.eup %5549 }
 0x337   :  { %v1137_v23 = vmul.f32 0.5, %v5550_v5 }
 0x339   :  { %v1138_v41 = vadd.f32 0.5, %v1137_v23  ;;  %v1341_v23 = vld [vmem:[%s7220_s1 + $0x168] sm:$0xff] }
 0x347   :  { %v1037_v28 = vpop.f32.mrb[10].mxu0  ;;  %v1125_v29 = vpop.f32.mrb[10].mxu1 }
 0x348   :  { %v1042_v32 = vadd.f32 %v3068_v21, %v1037_v28  ;;  %v1130_v35 = vadd.f32 %v3069_v27, %v1125_v29  ;;  %v4018_v55 = vpop.f32.mrb[11].mxu0  ;;  %v4053_v56 = vpop.f32.mrb[11].mxu1  ;;  %v1337_v21 = vld [vmem:[%s7220_s1 + $0xe8] sm:$0xff]  ;;  %v1424_v27 = vld [vmem:[%s7220_s1 + $0xd0] sm:$0xff] }
 0x349   :  { %v1425_v28 = vld [vmem:[%s7220_s1 + $0xf0] sm:$0xff]  ;;  %v6473_v29 = vpack.c.bf16 %v1337_v21, %v1336_v20  ;;  %v1339_v55 = vld [vmem:[%s7220_s1 + $0x128] sm:$0xff] }
 0x34a   :  { %v1139_v61 = vmul.f32 0.5, %v1042_v32  ;;  %5551 = vtanh.f32 %v1130_v35  ;;  %v6475_v32 = vpack.c.bf16 %v1425_v28, %v1424_v27  ;;  %v1338_v35 = vld [vmem:[%s7220_s1 + $0x108] sm:$0xff]  ;;  %v1426_v56 = vld [vmem:[%s7220_s1 + $0x110] sm:$0xff] }
 0x34b   :  { %v6493_v5 = vpack.c.bf16 %v1339_v55, %v1338_v35 }
 0x34c   :  { %5553 = vtanh.f32 %v1139_v61  ;;  %v1427_v61 = vld [vmem:[%s7220_s1 + $0x130] sm:$0xff] }
 0x34d   :  { %5555 = vtanh.f32 %v1131_v33  ;;  %v6495_v15 = vpack.c.bf16 %v1427_v61, %v1426_v56  ;;  %v1428_v33 = vld [vmem:[%s7220_s1 + $0x150] sm:$0xff] }
 0x354   :  { %v5552_v44 = vpop.eup %5551 }
 0x355   :  { %v1145_v51 = vmul.f32 %v5552_v44, %v1138_v41  ;;  %v1429_v41 = vld [vmem:[%s7220_s1 + $0x170] sm:$0xff]  ;;  %v6513_v44 = vpack.c.bf16 %v1341_v23, %v1340_v16  ;;  %v3070_v16 = vld [vmem:[%s7219_s0 + $0x78] sm:$0xff] }
 0x356   :  { %v5554_v38 = vpop.eup %5553 }
 0x357   :  { %v1141_v40 = vmul.f32 0.5, %v5554_v38  ;;  %v5556_v54 = vpop.eup %5555  ;;  %v1342_v38 = vld [vmem:[%s7220_s1 + $0x188] sm:$0xff] }
 0x358   :  { %v1133_v57 = vmul.f32 0.5, %v5556_v54 }
 0x359   :  { %v1142_v45 = vadd.f32 0.5, %v1141_v40  ;;  %v1343_v40 = vld [vmem:[%s7220_s1 + $0x1a8] sm:$0xff] }
 0x35a   :  { %v1134_v13 = vadd.f32 0.5, %v1133_v57  ;;  %v6533_v54 = vpack.c.bf16 %v1343_v40, %v1342_v38 }
 0x35b   :  { %v1144_v46 = vmul.f32 %v1142_v45, %v6173_v22  ;;  %v1418_v22 = vld [vmem:[%s7220_s1 + $0x10] sm:$0xff] }
 0x35c   :  { %v6408_v30 = vpack.c.bf16 %v1419_v12, %v1418_v22  ;;  %v1430_v45 = vld [vmem:[%s7220_s1 + $0x190] sm:$0xff] }
 0x35d   :  { %v6390_v50 = vadd.f32 %v1145_v51, %v1144_v46  ;;  %v6515_v51 = vpack.c.bf16 %v1429_v41, %v1428_v33  ;;  %v1431_v46 = vld [vmem:[%s7220_s1 + $0x1b0] sm:$0xff] }
 0x35e   :  { %v6535_v57 = vpack.c.bf16 %v1431_v46, %v1430_v45  ;;  %v1432_v22 = vld [vmem:[%s7220_s1 + $0x1d0] sm:$0xff] }
 0x35f   :  { %5557 = vtanh.f32 %v6390_v50  ;;  %1152 = vst [vmem:[#allocation6 + $0x10] sm:$0xff] %v6390_v50  ;;  %v1433_v12 = vld [vmem:[%s7220_s1 + $0x1f0] sm:$0xff] }
 0x369   :  { %v5558_v18 = vpop.eup %5557 }
 0x36a   :  { %v6413_v36 = vmul.f32 %v5558_v18, %v1134_v13  ;;  %v6553_v13 = vpack.c.bf16 %v1345_v4, %v1344_v58  ;;  %v6555_v18 = vpack.c.bf16 %v1433_v12, %v1432_v22 }
 0x36c   :  { %1150 = vst [vmem:[#allocation4 + $0x10] sm:$0xff] %v6413_v36  ;;  %4087 = vmatmul.mubr.f32.vlgmr.msra.gmra.mrb[12].mxu0 %v6413_v36  ;;  %4122 = vmatmul.mubr.f32.vlgmr.msra.gmra.mrb[12].mxu1 %v6413_v36 }
 0x36d   :  { %5092 = vmatpush3.bf16.msra.mxu0 %v6406_v24  ;;  %5116 = vmatpush3.bf16.msra.mxu1 %v6408_v30 }
 0x36e   :  { %5093 = vmatprep.subr.bf16.mxu0 %v5657_v3  ;;  %5117 = vmatprep.subr.bf16.mxu1 %v5657_v3 }
 0x36f   :  { %4156 = vmatprep.mubr.msk.f32.mxu0 %vm5658_vm0, %v5659_v11  ;;  %4191 = vmatprep.mubr.msk.f32.mxu1 %vm5658_vm0, %v5659_v11 }
 0x371   :  { %5095 = vmatpush3.bf16.msra.mxu0 %v6429_v60  ;;  %5119 = vmatpush3.bf16.msra.mxu1 %v6431_v63 }
 0x372   :  { %5096 = vmatprep.subr.bf16.mxu0 %v5657_v3  ;;  %5120 = vmatprep.subr.bf16.mxu1 %v5657_v3 }
 0x375   :  { %5098 = vmatpush3.bf16.msra.mxu0 %v6453_v14  ;;  %5122 = vmatpush3.bf16.msra.mxu1 %v6455_v17 }
 0x376   :  { %5099 = vmatprep.subr.bf16.mxu0 %v5657_v3  ;;  %5123 = vmatprep.subr.bf16.mxu1 %v5657_v3 }
 0x379   :  { %5101 = vmatpush3.bf16.msra.mxu0 %v6473_v29  ;;  %5125 = vmatpush3.bf16.msra.mxu1 %v6475_v32 }
 0x37a   :  { %5102 = vmatprep.subr.bf16.mxu0 %v5657_v3  ;;  %5126 = vmatprep.subr.bf16.mxu1 %v5657_v3 }
 0x37d   :  { %5104 = vmatpush3.bf16.msra.mxu0 %v6493_v5  ;;  %5128 = vmatpush3.bf16.msra.mxu1 %v6495_v15 }
 0x37e   :  { %5105 = vmatprep.subr.bf16.mxu0 %v5657_v3  ;;  %5129 = vmatprep.subr.bf16.mxu1 %v5657_v3 }
 0x381   :  { %5107 = vmatpush3.bf16.msra.mxu0 %v6513_v44  ;;  %5131 = vmatpush3.bf16.msra.mxu1 %v6515_v51 }
 0x382   :  { %5108 = vmatprep.subr.bf16.mxu0 %v5657_v3  ;;  %5132 = vmatprep.subr.bf16.mxu1 %v5657_v3 }
 0x385   :  { %5110 = vmatpush3.bf16.msra.mxu0 %v6533_v54  ;;  %5134 = vmatpush3.bf16.msra.mxu1 %v6535_v57 }
 0x386   :  { %5111 = vmatprep.subr.bf16.mxu0 %v5657_v3  ;;  %5135 = vmatprep.subr.bf16.mxu1 %v5657_v3 }
 0x389   :  { %5113 = vmatpush3.bf16.msra.mxu0 %v6553_v13  ;;  %5137 = vmatpush3.bf16.msra.mxu1 %v6555_v18 }
 0x38a   :  { %5138 = vmatprep.subr.bf16.mxu0 %v5657_v3  ;;  %5162 = vmatprep.subr.bf16.mxu1 %v5657_v3 }
 0x38c   :  { %4157 = vmatmul.mubr.f32.vlgmr.msra.gmra.mrb[14].mxu0 %v6413_v36  ;;  %4192 = vmatmul.mubr.f32.vlgmr.msra.gmra.mrb[14].mxu1 %v6413_v36 }
 0x38d   :  { %5140 = vmatpush3.bf16.msra.mxu0 %v6226_v62  ;;  %5164 = vmatpush3.bf16.msra.mxu1 %v6231_v6 }
 0x38e   :  { %5141 = vmatprep.subr.bf16.mxu0 %v5657_v3  ;;  %5165 = vmatprep.subr.bf16.mxu1 %v5657_v3 }
 0x38f   :  { %4226 = vmatprep.mubr.msk.f32.mxu0 %vm5658_vm0, %v5659_v11  ;;  %4261 = vmatprep.mubr.msk.f32.mxu1 %vm5658_vm0, %v5659_v11 }
 0x391   :  { %5143 = vmatpush3.bf16.msra.mxu0 %v6246_v26  ;;  %5167 = vmatpush3.bf16.msra.mxu1 %v6251_v34 }
 0x392   :  { %5144 = vmatprep.subr.bf16.mxu0 %v5657_v3  ;;  %5168 = vmatprep.subr.bf16.mxu1 %v5657_v3 }
 0x395   :  { %5146 = vmatpush3.bf16.msra.mxu0 %v6266_v52  ;;  %5170 = vmatpush3.bf16.msra.mxu1 %v6271_v39 }
 0x396   :  { %5147 = vmatprep.subr.bf16.mxu0 %v5657_v3  ;;  %5171 = vmatprep.subr.bf16.mxu1 %v5657_v3 }
 0x399   :  { %5149 = vmatpush3.bf16.msra.mxu0 %v6286_v47  ;;  %5173 = vmatpush3.bf16.msra.mxu1 %v6291_v53 }
 0x39a   :  { %5150 = vmatprep.subr.bf16.mxu0 %v5657_v3  ;;  %5174 = vmatprep.subr.bf16.mxu1 %v5657_v3 }
 0x39d   :  { %5152 = vmatpush3.bf16.msra.mxu0 %v6306_v59  ;;  %5176 = vmatpush3.bf16.msra.mxu1 %v6311_v8 }
 0x39e   :  { %5153 = vmatprep.subr.bf16.mxu0 %v5657_v3  ;;  %5177 = vmatprep.subr.bf16.mxu1 %v5657_v3 }
 0x3a1   :  { %5155 = vmatpush3.bf16.msra.mxu0 %v6326_v19  ;;  %5179 = vmatpush3.bf16.msra.mxu1 %v6331_v25 }
 0x3a2   :  { %5156 = vmatprep.subr.bf16.mxu0 %v5657_v3  ;;  %5180 = vmatprep.subr.bf16.mxu1 %v5657_v3 }
 0x3a5   :  { %5158 = vmatpush3.bf16.msra.mxu0 %v6343_v37  ;;  %5182 = vmatpush3.bf16.msra.mxu1 %v6350_v43 }
 0x3a6   :  { %5159 = vmatprep.subr.bf16.mxu0 %v5657_v3  ;;  %5183 = vmatprep.subr.bf16.mxu1 %v5657_v3 }
 0x3a9   :  { %5161 = vmatpush3.bf16.msra.mxu0 %v6366_v0  ;;  %5185 = vmatpush3.bf16.msra.mxu1 %v6370_v1 }
 0x3aa   :  { %5186 = vmatprep.subr.bf16.mxu0 %v5657_v3  ;;  %5210 = vmatprep.subr.bf16.mxu1 %v5657_v3 }
 0x43f   :  { %v1235_v31 = vpop.f32.mrb[12].mxu0  ;;  %v1324_v36 = vpop.f32.mrb[12].mxu1 }
 0x440   :  { %v4088_v42 = vpop.f32.mrb[13].mxu0  ;;  %v4123_v48 = vpop.f32.mrb[13].mxu1  ;;  %v1329_v2 = vadd.f32 %v3071_v49, %v1324_v36  ;;  %v1241_v23 = vadd.f32 %v3070_v16, %v1235_v31 }
 0x442   :  { %v1510_v7 = vmul.f32 0.5, %v1329_v2  ;;  %v1506_v41 = vmul.f32 0.5, %v1241_v23  ;;  %v3074_v2 = vld [vmem:[%s7219_s0 + $0x98] sm:$0xff] }
 0x444   :  { %5559 = vtanh.f32 %v1510_v7 }
 0x44e   :  { %v5560_v61 = vpop.eup %5559 }
 0x44f   :  { %v1512_v33 = vmul.f32 0.5, %v5560_v61 }
 0x451   :  { %v1513_v38 = vadd.f32 0.5, %v1512_v33 }
 0x45f   :  { %v1412_v20 = vpop.f32.mrb[14].mxu0  ;;  %v1500_v21 = vpop.f32.mrb[14].mxu1 }
 0x460   :  { %v1417_v27 = vadd.f32 %v3072_v9, %v1412_v20  ;;  %v1505_v28 = vadd.f32 %v3073_v10, %v1500_v21  ;;  %v4158_v35 = vpop.f32.mrb[15].mxu0  ;;  %v4193_v55 = vpop.f32.mrb[15].mxu1 }
 0x462   :  { %v1514_v56 = vmul.f32 0.5, %v1417_v27  ;;  %5561 = vtanh.f32 %v1505_v28 }
 0x464   :  { %5563 = vtanh.f32 %v1514_v56 }
 0x465   :  { %5565 = vtanh.f32 %v1506_v41 }
 0x46c   :  { %v5562_v40 = vpop.eup %5561 }
 0x46d   :  { %v1520_v45 = vmul.f32 %v5562_v40, %v1513_v38  ;;  %v2372_v40 = vld [vmem:[%s7220_s1 + $0xa0] sm:$0xff] }
 0x46e   :  { %v5564_v46 = vpop.eup %5563 }
 0x46f   :  { %v1516_v58 = vmul.f32 0.5, %v5564_v46  ;;  %v5566_v36 = vpop.eup %5565  ;;  %v2284_v46 = vld [vmem:[%s7220_s1 + $0xd8] sm:$0xff] }
 0x470   :  { %v1508_v42 = vmul.f32 0.5, %v5566_v36 }
 0x471   :  { %v1517_v4 = vadd.f32 0.5, %v1516_v58  ;;  %v2285_v58 = vld [vmem:[%s7220_s1 + $0xf8] sm:$0xff] }
 0x472   :  { %v1509_v31 = vadd.f32 0.5, %v1508_v42  ;;  %v2286_v42 = vld [vmem:[%s7220_s1 + $0x118] sm:$0xff] }
 0x473   :  { %v1519_v22 = vmul.f32 %v1517_v4, %v6390_v50  ;;  %v2373_v4 = vld [vmem:[%s7220_s1 + $0xc0] sm:$0xff] }
 0x475   :  { %v6614_v12 = vadd.f32 %v1520_v45, %v1519_v22  ;;  %v6816_v22 = vpack.c.bf16 %v2285_v58, %v2284_v46 }
 0x477   :  { %5567 = vtanh.f32 %v6614_v12  ;;  %1527 = vst [vmem:[#allocation6 + $0x18] sm:$0xff] %v6614_v12 }
 0x481   :  { %v5568_v48 = vpop.eup %5567 }
 0x482   :  { %v1523_v49 = vmul.f32 %v5568_v48, %v1509_v31  ;;  %v2287_v31 = vld [vmem:[%s7220_s1 + $0x138] sm:$0xff]  ;;  %v2375_v48 = vld [vmem:[%s7220_s1 + $0x100] sm:$0xff] }
 0x484   :  { %1525 = vst [vmem:[#allocation4 + $0x18] sm:$0xff] %v1523_v49  ;;  %4227 = vmatmul.mubr.f32.vlgmr.msra.gmra.mrb[16].mxu0 %v1523_v49  ;;  %4262 = vmatmul.mubr.f32.vlgmr.msra.gmra.mrb[16].mxu1 %v1523_v49 }
 0x485   :  { %5188 = vmatpush3.bf16.msra.mxu0 %v6406_v24  ;;  %5212 = vmatpush3.bf16.msra.mxu1 %v6408_v30 }
 0x486   :  { %5189 = vmatprep.subr.bf16.mxu0 %v5657_v3  ;;  %5213 = vmatprep.subr.bf16.mxu1 %v5657_v3 }
 0x487   :  { %4296 = vmatprep.mubr.msk.f32.mxu0 %vm5658_vm0, %v5659_v11  ;;  %4331 = vmatprep.mubr.msk.f32.mxu1 %vm5658_vm0, %v5659_v11 }
 0x489   :  { %5191 = vmatpush3.bf16.msra.mxu0 %v6429_v60  ;;  %5215 = vmatpush3.bf16.msra.mxu1 %v6431_v63 }
 0x48a   :  { %5192 = vmatprep.subr.bf16.mxu0 %v5657_v3  ;;  %5216 = vmatprep.subr.bf16.mxu1 %v5657_v3 }
 0x48d   :  { %5194 = vmatpush3.bf16.msra.mxu0 %v6453_v14  ;;  %5218 = vmatpush3.bf16.msra.mxu1 %v6455_v17 }
 0x48e   :  { %5195 = vmatprep.subr.bf16.mxu0 %v5657_v3  ;;  %5219 = vmatprep.subr.bf16.mxu1 %v5657_v3 }
 0x491   :  { %5197 = vmatpush3.bf16.msra.mxu0 %v6473_v29  ;;  %5221 = vmatpush3.bf16.msra.mxu1 %v6475_v32 }
 0x492   :  { %5198 = vmatprep.subr.bf16.mxu0 %v5657_v3  ;;  %5222 = vmatprep.subr.bf16.mxu1 %v5657_v3 }
 0x495   :  { %5200 = vmatpush3.bf16.msra.mxu0 %v6493_v5  ;;  %5224 = vmatpush3.bf16.msra.mxu1 %v6495_v15 }
 0x496   :  { %5201 = vmatprep.subr.bf16.mxu0 %v5657_v3  ;;  %5225 = vmatprep.subr.bf16.mxu1 %v5657_v3 }
 0x499   :  { %5203 = vmatpush3.bf16.msra.mxu0 %v6513_v44  ;;  %5227 = vmatpush3.bf16.msra.mxu1 %v6515_v51 }
 0x49a   :  { %5204 = vmatprep.subr.bf16.mxu0 %v5657_v3  ;;  %5228 = vmatprep.subr.bf16.mxu1 %v5657_v3 }
 0x49d   :  { %5206 = vmatpush3.bf16.msra.mxu0 %v6533_v54  ;;  %5230 = vmatpush3.bf16.msra.mxu1 %v6535_v57 }
 0x49e   :  { %5207 = vmatprep.subr.bf16.mxu0 %v5657_v3  ;;  %5231 = vmatprep.subr.bf16.mxu1 %v5657_v3 }
 0x4a1   :  { %5209 = vmatpush3.bf16.msra.mxu0 %v6553_v13  ;;  %5233 = vmatpush3.bf16.msra.mxu1 %v6555_v18 }
 0x4a2   :  { %5234 = vmatprep.subr.bf16.mxu0 %v5657_v3  ;;  %5258 = vmatprep.subr.bf16.mxu1 %v5657_v3 }
 0x4a4   :  { %4297 = vmatmul.mubr.f32.vlgmr.msra.gmra.mrb[18].mxu0 %v1523_v49  ;;  %4332 = vmatmul.mubr.f32.vlgmr.msra.gmra.mrb[18].mxu1 %v1523_v49  ;;  %v6836_v49 = vpack.c.bf16 %v2287_v31, %v2286_v42 }
 0x4a5   :  { %5236 = vmatpush3.bf16.msra.mxu0 %v6226_v62  ;;  %5260 = vmatpush3.bf16.msra.mxu1 %v6231_v6 }
 0x4a6   :  { %5237 = vmatprep.subr.bf16.mxu0 %v5657_v3  ;;  %5261 = vmatprep.subr.bf16.mxu1 %v5657_v3 }
 0x4a7   :  { %4366 = vmatprep.mubr.msk.f32.mxu0 %vm5658_vm0, %v5659_v11  ;;  %4401 = vmatprep.mubr.msk.f32.mxu1 %vm5658_vm0, %v5659_v11 }
 0x4a9   :  { %5239 = vmatpush3.bf16.msra.mxu0 %v6246_v26  ;;  %5263 = vmatpush3.bf16.msra.mxu1 %v6251_v34 }
 0x4aa   :  { %5240 = vmatprep.subr.bf16.mxu0 %v5657_v3  ;;  %5264 = vmatprep.subr.bf16.mxu1 %v5657_v3 }
 0x4ad   :  { %5242 = vmatpush3.bf16.msra.mxu0 %v6266_v52  ;;  %5266 = vmatpush3.bf16.msra.mxu1 %v6271_v39  ;;  %v3075_v52 = vld [vmem:[%s7219_s0 + $0x80] sm:$0xff] }
 0x4ae   :  { %5243 = vmatprep.subr.bf16.mxu0 %v5657_v3  ;;  %5267 = vmatprep.subr.bf16.mxu1 %v5657_v3 }
 0x4b1   :  { %5245 = vmatpush3.bf16.msra.mxu0 %v6286_v47  ;;  %5269 = vmatpush3.bf16.msra.mxu1 %v6291_v53  ;;  %v3076_v53 = vld [vmem:[%s7219_s0 + $0x88] sm:$0xff] }
 0x4b2   :  { %5246 = vmatprep.subr.bf16.mxu0 %v5657_v3  ;;  %5270 = vmatprep.subr.bf16.mxu1 %v5657_v3 }
 0x4b5   :  { %5248 = vmatpush3.bf16.msra.mxu0 %v6306_v59  ;;  %5272 = vmatpush3.bf16.msra.mxu1 %v6311_v8  ;;  %v3077_v59 = vld [vmem:[%s7219_s0 + $0x90] sm:$0xff] }
 0x4b6   :  { %5249 = vmatprep.subr.bf16.mxu0 %v5657_v3  ;;  %5273 = vmatprep.subr.bf16.mxu1 %v5657_v3 }
 0x4b9   :  { %5251 = vmatpush3.bf16.msra.mxu0 %v6326_v19  ;;  %5275 = vmatpush3.bf16.msra.mxu1 %v6331_v25 }
 0x4ba   :  { %5252 = vmatprep.subr.bf16.mxu0 %v5657_v3  ;;  %5276 = vmatprep.subr.bf16.mxu1 %v5657_v3 }
 0x4bd   :  { %5254 = vmatpush3.bf16.msra.mxu0 %v6343_v37  ;;  %5278 = vmatpush3.bf16.msra.mxu1 %v6350_v43 }
 0x4be   :  { %5255 = vmatprep.subr.bf16.mxu0 %v5657_v3  ;;  %5279 = vmatprep.subr.bf16.mxu1 %v5657_v3 }
 0x4c1   :  { %5257 = vmatpush3.bf16.msra.mxu0 %v6366_v0  ;;  %5281 = vmatpush3.bf16.msra.mxu1 %v6370_v1 }
 0x4c2   :  { %5282 = vmatprep.subr.bf16.mxu0 %v5657_v3  ;;  %5306 = vmatprep.subr.bf16.mxu1 %v5657_v3 }
 0x557   :  { %v1610_v62 = vpop.f32.mrb[16].mxu0  ;;  %v1699_v6 = vpop.f32.mrb[16].mxu1 }
 0x558   :  { %v4228_v26 = vpop.f32.mrb[17].mxu0  ;;  %v4263_v34 = vpop.f32.mrb[17].mxu1  ;;  %v1704_v39 = vadd.f32 %v3075_v52, %v1699_v6  ;;  %v1616_v7 = vadd.f32 %v3074_v2, %v1610_v62  ;;  %v2376_v62 = vld [vmem:[%s7220_s1 + $0x120] sm:$0xff] }
 0x559   :  { %v6841_v6 = vpack.c.bf16 %v2376_v62, %v2375_v48  ;;  %v2288_v26 = vld [vmem:[%s7220_s1 + $0x158] sm:$0xff]  ;;  %v2377_v52 = vld [vmem:[%s7220_s1 + $0x140] sm:$0xff]  ;;  %v2455_v48 = vld [vmem:[%s7220_s1 + $0x8] sm:$0xff] }
 0x55a   :  { %v1885_v47 = vmul.f32 0.5, %v1704_v39  ;;  %v1881_v10 = vmul.f32 0.5, %v1616_v7  ;;  %v2289_v34 = vld [vmem:[%s7220_s1 + $0x178] sm:$0xff]  ;;  %v2382_v2 = vld [vmem:[%s7220_s1 + $0x1e0] sm:$0xff]  ;;  %v2456_v62 = vld [vmem:[%s7220_s1 + $0x28] sm:$0xff] }
 0x55b   :  { %v6856_v39 = vpack.c.bf16 %v2289_v34, %v2288_v26  ;;  %v2544_v26 = vld [vmem:[%s7220_s1 + $0x30] sm:$0xff] }
 0x55c   :  { %5569 = vtanh.f32 %v1885_v47  ;;  %v2378_v47 = vld [vmem:[%s7220_s1 + $0x160] sm:$0xff] }
 0x566   :  { %v5570_v50 = vpop.eup %5569 }
 0x567   :  { %v1887_v9 = vmul.f32 0.5, %v5570_v50  ;;  %v2381_v50 = vld [vmem:[%s7220_s1 + $0x1c0] sm:$0xff] }
 0x569   :  { %v1888_v20 = vadd.f32 0.5, %v1887_v9  ;;  %v6900_v9 = vpack.c.bf16 %v2382_v2, %v2381_v50 }
 0x577   :  { %v1787_v8 = vpop.f32.mrb[18].mxu0  ;;  %v1875_v19 = vpop.f32.mrb[18].mxu1 }
 0x578   :  { %v1792_v25 = vadd.f32 %v3076_v53, %v1787_v8  ;;  %v1880_v37 = vadd.f32 %v3077_v59, %v1875_v19  ;;  %v4298_v43 = vpop.f32.mrb[19].mxu0  ;;  %v4333_v0 = vpop.f32.mrb[19].mxu1  ;;  %v6861_v53 = vpack.c.bf16 %v2378_v47, %v2377_v52  ;;  %v2290_v59 = vld [vmem:[%s7220_s1 + $0x198] sm:$0xff]  ;;  %v2379_v19 = vld [vmem:[%s7220_s1 + $0x180] sm:$0xff]  ;;  %v6936_v47 = vpack.c.bf16 %v2456_v62, %v2455_v48  ;;  %v2469_v48 = vld [vmem:[%s7220_s1 + $0x1c8] sm:$0xff] }
 0x579   :  { %v2291_v8 = vld [vmem:[%s7220_s1 + $0x1b8] sm:$0xff]  ;;  %v2470_v62 = vld [vmem:[%s7220_s1 + $0x1e8] sm:$0xff] }
 0x57a   :  { %v1889_v1 = vmul.f32 0.5, %v1792_v25  ;;  %5571 = vtanh.f32 %v1880_v37  ;;  %v6873_v25 = vpack.c.bf16 %v2291_v8, %v2290_v59  ;;  %v2380_v37 = vld [vmem:[%s7220_s1 + $0x1a0] sm:$0xff]  ;;  %v2292_v0 = vld [vmem:[%s7220_s1 + $0x1d8] sm:$0xff]  ;;  %v2457_v8 = vld [vmem:[%s7220_s1 + $0x48] sm:$0xff] }
 0x57b   :  { %v6880_v43 = vpack.c.bf16 %v2380_v37, %v2379_v19  ;;  %v2458_v37 = vld [vmem:[%s7220_s1 + $0x68] sm:$0xff] }
 0x57c   :  { %5573 = vtanh.f32 %v1889_v1  ;;  %v2293_v1 = vld [vmem:[%s7220_s1 + $0x1f8] sm:$0xff]  ;;  %v6959_v50 = vpack.c.bf16 %v2458_v37, %v2457_v8 }
 0x57d   :  { %5575 = vtanh.f32 %v1881_v10  ;;  %v6896_v7 = vpack.c.bf16 %v2293_v1, %v2292_v0  ;;  %v2545_v0 = vld [vmem:[%s7220_s1 + $0x50] sm:$0xff] }
 0x57e   :  { %v2546_v1 = vld [vmem:[%s7220_s1 + $0x70] sm:$0xff] }
 0x57f   :  { %v6961_v2 = vpack.c.bf16 %v2546_v1, %v2545_v0 }
 0x584   :  { %v5572_v21 = vpop.eup %5571 }
 0x585   :  { %v1895_v27 = vmul.f32 %v5572_v21, %v1888_v20 }
 0x586   :  { %v5574_v28 = vpop.eup %5573 }
 0x587   :  { %v1891_v35 = vmul.f32 0.5, %v5574_v28  ;;  %v5576_v16 = vpop.eup %5575  ;;  %v3079_v28 = vld [vmem:[%s7219_s0 + $0xa0] sm:$0xff] }
 0x588   :  { %v1883_v23 = vmul.f32 0.5, %v5576_v16  ;;  %v3081_v16 = vld [vmem:[%s7219_s0 + $0xb0] sm:$0xff] }
 0x589   :  { %v1892_v55 = vadd.f32 0.5, %v1891_v35 }
 0x58a   :  { %v1884_v33 = vadd.f32 0.5, %v1883_v23 }
 0x58b   :  { %v1894_v56 = vmul.f32 %v1892_v55, %v6614_v12  ;;  %v2374_v12 = vld [vmem:[%s7220_s1 + $0xe0] sm:$0xff] }
 0x58c   :  { %v6821_v36 = vpack.c.bf16 %v2374_v12, %v2373_v4 }
 0x58d   :  { %v6703_v61 = vadd.f32 %v1895_v27, %v1894_v56  ;;  %v3080_v56 = vld [vmem:[%s7219_s0 + $0xa8] sm:$0xff] }
 0x58f   :  { %5577 = vtanh.f32 %v6703_v61  ;;  %1902 = vst [vmem:[#allocation6 + $0x20] sm:$0xff] %v6703_v61 }
 0x599   :  { %v5578_v41 = vpop.eup %5577 }
 0x59a   :  { %v1898_v38 = vmul.f32 %v5578_v41, %v1884_v33 }
 0x59c   :  { %1900 = vst [vmem:[#allocation4 + $0x20] sm:$0xff] %v1898_v38  ;;  %4367 = vmatmul.mubr.f32.vlgmr.msra.gmra.mrb[20].mxu0 %v1898_v38  ;;  %4402 = vmatmul.mubr.f32.vlgmr.msra.gmra.mrb[20].mxu1 %v1898_v38 }
 0x59d   :  { %5284 = vmatpush3.bf16.msra.mxu0 %v6406_v24  ;;  %5308 = vmatpush3.bf16.msra.mxu1 %v6408_v30  ;;  %v2278_v24 = vld [vmem:[%s7220_s1 + $0x18] sm:$0xff] }
 0x59e   :  { %5285 = vmatprep.subr.bf16.mxu0 %v5657_v3  ;;  %5309 = vmatprep.subr.bf16.mxu1 %v5657_v3  ;;  %v2279_v30 = vld [vmem:[%s7220_s1 + $0x38] sm:$0xff] }
 0x59f   :  { %4436 = vmatprep.mubr.msk.f32.mxu0 %vm5658_vm0, %v5659_v11  ;;  %4471 = vmatprep.mubr.msk.f32.mxu1 %vm5658_vm0, %v5659_v11 }
 0x5a1   :  { %5287 = vmatpush3.bf16.msra.mxu0 %v6429_v60  ;;  %5311 = vmatpush3.bf16.msra.mxu1 %v6431_v63  ;;  %v2367_v60 = vld [vmem:[%s7220_s1] sm:$0xff]  ;;  %v6756_v63 = vpack.c.bf16 %v2279_v30, %v2278_v24 }
 0x5a2   :  { %5288 = vmatprep.subr.bf16.mxu0 %v5657_v3  ;;  %5312 = vmatprep.subr.bf16.mxu1 %v5657_v3 }
 0x5a5   :  { %5290 = vmatpush3.bf16.msra.mxu0 %v6453_v14  ;;  %5314 = vmatpush3.bf16.msra.mxu1 %v6455_v17  ;;  %v2368_v14 = vld [vmem:[%s7220_s1 + $0x20] sm:$0xff] }
 0x5a6   :  { %5291 = vmatprep.subr.bf16.mxu0 %v5657_v3  ;;  %5315 = vmatprep.subr.bf16.mxu1 %v5657_v3  ;;  %v6761_v17 = vpack.c.bf16 %v2368_v14, %v2367_v60 }
 0x5a9   :  { %5293 = vmatpush3.bf16.msra.mxu0 %v6473_v29  ;;  %5317 = vmatpush3.bf16.msra.mxu1 %v6475_v32  ;;  %v2280_v29 = vld [vmem:[%s7220_s1 + $0x58] sm:$0xff] }
 0x5aa   :  { %5294 = vmatprep.subr.bf16.mxu0 %v5657_v3  ;;  %5318 = vmatprep.subr.bf16.mxu1 %v5657_v3  ;;  %v2281_v32 = vld [vmem:[%s7220_s1 + $0x78] sm:$0xff] }
 0x5ad   :  { %5296 = vmatpush3.bf16.msra.mxu0 %v6493_v5  ;;  %5320 = vmatpush3.bf16.msra.mxu1 %v6495_v15  ;;  %v2369_v5 = vld [vmem:[%s7220_s1 + $0x40] sm:$0xff]  ;;  %v6776_v15 = vpack.c.bf16 %v2281_v32, %v2280_v29  ;;  %v3078_v29 = vld [vmem:[%s7219_s0 + $0xb8] sm:$0xff] }
 0x5ae   :  { %5297 = vmatprep.subr.bf16.mxu0 %v5657_v3  ;;  %5321 = vmatprep.subr.bf16.mxu1 %v5657_v3 }
 0x5b1   :  { %5299 = vmatpush3.bf16.msra.mxu0 %v6513_v44  ;;  %5323 = vmatpush3.bf16.msra.mxu1 %v6515_v51  ;;  %v2370_v44 = vld [vmem:[%s7220_s1 + $0x60] sm:$0xff] }
 0x5b2   :  { %5300 = vmatprep.subr.bf16.mxu0 %v5657_v3  ;;  %5324 = vmatprep.subr.bf16.mxu1 %v5657_v3  ;;  %v6781_v51 = vpack.c.bf16 %v2370_v44, %v2369_v5 }
 0x5b5   :  { %5302 = vmatpush3.bf16.msra.mxu0 %v6533_v54  ;;  %5326 = vmatpush3.bf16.msra.mxu1 %v6535_v57  ;;  %v2282_v54 = vld [vmem:[%s7220_s1 + $0x98] sm:$0xff] }
 0x5b6   :  { %5303 = vmatprep.subr.bf16.mxu0 %v5657_v3  ;;  %5327 = vmatprep.subr.bf16.mxu1 %v5657_v3  ;;  %v2283_v57 = vld [vmem:[%s7220_s1 + $0xb8] sm:$0xff] }
 0x5b9   :  { %5305 = vmatpush3.bf16.msra.mxu0 %v6553_v13  ;;  %5329 = vmatpush3.bf16.msra.mxu1 %v6555_v18  ;;  %v2371_v13 = vld [vmem:[%s7220_s1 + $0x80] sm:$0xff]  ;;  %v6796_v18 = vpack.c.bf16 %v2283_v57, %v2282_v54 }
 0x5ba   :  { %5330 = vmatprep.subr.bf16.mxu0 %v5657_v3  ;;  %5354 = vmatprep.subr.bf16.mxu1 %v5657_v3  ;;  %v6801_v45 = vpack.c.bf16 %v2372_v40, %v2371_v13 }
 0x5bc   :  { %4437 = vmatmul.mubr.f32.vlgmr.msra.gmra.mrb[22].mxu0 %v1898_v38  ;;  %4472 = vmatmul.mubr.f32.vlgmr.msra.gmra.mrb[22].mxu1 %v1898_v38 }
 0x5bd   :  { %4506 = vmatprep.mubr.msk.f32.mxu0 %vm5658_vm0, %v5659_v11  ;;  %4541 = vmatprep.mubr.msk.f32.mxu1 %vm5658_vm0, %v5659_v11 }
 0x5be   :  { %5332 = vmatpush3.bf16.msra.mxu0 %v6756_v63  ;;  %5356 = vmatpush3.bf16.msra.mxu1 %v6761_v17 }
 0x5bf   :  { %5333 = vmatprep.subr.bf16.mxu0 %v5657_v3  ;;  %5357 = vmatprep.subr.bf16.mxu1 %v5657_v3 }
 0x5c2   :  { %5335 = vmatpush3.bf16.msra.mxu0 %v6776_v15  ;;  %5359 = vmatpush3.bf16.msra.mxu1 %v6781_v51 }
 0x5c3   :  { %5336 = vmatprep.subr.bf16.mxu0 %v5657_v3  ;;  %5360 = vmatprep.subr.bf16.mxu1 %v5657_v3 }
 0x5c6   :  { %5338 = vmatpush3.bf16.msra.mxu0 %v6796_v18  ;;  %5362 = vmatpush3.bf16.msra.mxu1 %v6801_v45 }
 0x5c7   :  { %5339 = vmatprep.subr.bf16.mxu0 %v5657_v3  ;;  %5363 = vmatprep.subr.bf16.mxu1 %v5657_v3 }
 0x5ca   :  { %5341 = vmatpush3.bf16.msra.mxu0 %v6816_v22  ;;  %5365 = vmatpush3.bf16.msra.mxu1 %v6821_v36 }
 0x5cb   :  { %5342 = vmatprep.subr.bf16.mxu0 %v5657_v3  ;;  %5366 = vmatprep.subr.bf16.mxu1 %v5657_v3 }
 0x5ce   :  { %5344 = vmatpush3.bf16.msra.mxu0 %v6836_v49  ;;  %5368 = vmatpush3.bf16.msra.mxu1 %v6841_v6 }
 0x5cf   :  { %5345 = vmatprep.subr.bf16.mxu0 %v5657_v3  ;;  %5369 = vmatprep.subr.bf16.mxu1 %v5657_v3 }
 0x5d2   :  { %5347 = vmatpush3.bf16.msra.mxu0 %v6856_v39  ;;  %5371 = vmatpush3.bf16.msra.mxu1 %v6861_v53 }
 0x5d3   :  { %5348 = vmatprep.subr.bf16.mxu0 %v5657_v3  ;;  %5372 = vmatprep.subr.bf16.mxu1 %v5657_v3 }
 0x5d6   :  { %5350 = vmatpush3.bf16.msra.mxu0 %v6873_v25  ;;  %5374 = vmatpush3.bf16.msra.mxu1 %v6880_v43 }
 0x5d7   :  { %5351 = vmatprep.subr.bf16.mxu0 %v5657_v3  ;;  %5375 = vmatprep.subr.bf16.mxu1 %v5657_v3 }
 0x5da   :  { %5353 = vmatpush3.bf16.msra.mxu0 %v6896_v7  ;;  %5377 = vmatpush3.bf16.msra.mxu1 %v6900_v9 }
 0x5db   :  { %5378 = vmatprep.subr.bf16.mxu0 %v5657_v3  ;;  %5402 = vmatprep.subr.bf16.mxu1 %v5657_v3 }
 0x66f   :  { %v1985_v10 = vpop.f32.mrb[20].mxu0  ;;  %v2074_v20 = vpop.f32.mrb[20].mxu1 }
 0x670   :  { %v4368_v21 = vpop.f32.mrb[21].mxu0  ;;  %v4403_v27 = vpop.f32.mrb[21].mxu1  ;;  %v2079_v35 = vadd.f32 %v3079_v28, %v2074_v20  ;;  %v1991_v32 = vadd.f32 %v3078_v29, %v1985_v10  ;;  %v2459_v10 = vld [vmem:[%s7220_s1 + $0x88] sm:$0xff] }
 0x671   :  { %v2460_v20 = vld [vmem:[%s7220_s1 + $0xa8] sm:$0xff]  ;;  %v2547_v21 = vld [vmem:[%s7220_s1 + $0x90] sm:$0xff] }
 0x672   :  { %v2260_v55 = vmul.f32 0.5, %v2079_v35  ;;  %v2256_v44 = vmul.f32 0.5, %v1991_v32  ;;  %v2548_v27 = vld [vmem:[%s7220_s1 + $0xb0] sm:$0xff]  ;;  %v6983_v28 = vpack.c.bf16 %v2460_v20, %v2459_v10  ;;  %v2465_v32 = vld [vmem:[%s7220_s1 + $0x148] sm:$0xff] }
 0x673   :  { %v6985_v35 = vpack.c.bf16 %v2548_v27, %v2547_v21 }
 0x674   :  { %5579 = vtanh.f32 %v2260_v55  ;;  %v2461_v55 = vld [vmem:[%s7220_s1 + $0xc8] sm:$0xff] }
 0x67e   :  { %v5580_v14 = vpop.eup %5579 }
 0x67f   :  { %v2262_v5 = vmul.f32 0.5, %v5580_v14 }
 0x681   :  { %v2263_v54 = vadd.f32 0.5, %v2262_v5  ;;  %v2466_v5 = vld [vmem:[%s7220_s1 + $0x168] sm:$0xff] }
 0x68f   :  { %v2162_v23 = vpop.f32.mrb[22].mxu0  ;;  %v2250_v33 = vpop.f32.mrb[22].mxu1 }
 0x690   :  { %v2167_v41 = vadd.f32 %v3080_v56, %v2162_v23  ;;  %v2255_v38 = vadd.f32 %v3081_v16, %v2250_v33  ;;  %v4438_v24 = vpop.f32.mrb[23].mxu0  ;;  %v4473_v30 = vpop.f32.mrb[23].mxu1  ;;  %v2462_v56 = vld [vmem:[%s7220_s1 + $0xe8] sm:$0xff]  ;;  %v2549_v16 = vld [vmem:[%s7220_s1 + $0xd0] sm:$0xff] }
 0x691   :  { %v2550_v23 = vld [vmem:[%s7220_s1 + $0xf0] sm:$0xff]  ;;  %v7003_v33 = vpack.c.bf16 %v2462_v56, %v2461_v55  ;;  %v2464_v24 = vld [vmem:[%s7220_s1 + $0x128] sm:$0xff] }
 0x692   :  { %v2264_v60 = vmul.f32 0.5, %v2167_v41  ;;  %5581 = vtanh.f32 %v2255_v38  ;;  %v7005_v41 = vpack.c.bf16 %v2550_v23, %v2549_v16  ;;  %v2463_v38 = vld [vmem:[%s7220_s1 + $0x108] sm:$0xff]  ;;  %v2551_v30 = vld [vmem:[%s7220_s1 + $0x110] sm:$0xff] }
 0x693   :  { %v7023_v14 = vpack.c.bf16 %v2464_v24, %v2463_v38 }
 0x694   :  { %5583 = vtanh.f32 %v2264_v60  ;;  %v2552_v60 = vld [vmem:[%s7220_s1 + $0x130] sm:$0xff] }
 0x695   :  { %5585 = vtanh.f32 %v2256_v44  ;;  %v7025_v29 = vpack.c.bf16 %v2552_v60, %v2551_v30  ;;  %v2553_v44 = vld [vmem:[%s7220_s1 + $0x150] sm:$0xff] }
 0x69c   :  { %v5582_v57 = vpop.eup %5581 }
 0x69d   :  { %v2270_v13 = vmul.f32 %v5582_v57, %v2263_v54  ;;  %v2554_v54 = vld [vmem:[%s7220_s1 + $0x170] sm:$0xff]  ;;  %v7043_v57 = vpack.c.bf16 %v2466_v5, %v2465_v32 }
 0x69e   :  { %v5584_v40 = vpop.eup %5583 }
 0x69f   :  { %v2266_v46 = vmul.f32 0.5, %v5584_v40  ;;  %v5586_v42 = vpop.eup %5585  ;;  %v2467_v40 = vld [vmem:[%s7220_s1 + $0x188] sm:$0xff] }
 0x6a0   :  { %v2258_v31 = vmul.f32 0.5, %v5586_v42 }
 0x6a1   :  { %v2267_v58 = vadd.f32 0.5, %v2266_v46  ;;  %v2468_v46 = vld [vmem:[%s7220_s1 + $0x1a8] sm:$0xff] }
 0x6a2   :  { %v2259_v34 = vadd.f32 0.5, %v2258_v31  ;;  %v7063_v42 = vpack.c.bf16 %v2468_v46, %v2467_v40 }
 0x6a3   :  { %v2269_v4 = vmul.f32 %v2267_v58, %v6703_v61  ;;  %v2543_v61 = vld [vmem:[%s7220_s1 + $0x10] sm:$0xff] }
 0x6a4   :  { %v6938_v59 = vpack.c.bf16 %v2544_v26, %v2543_v61  ;;  %v2555_v58 = vld [vmem:[%s7220_s1 + $0x190] sm:$0xff] }
 0x6a5   :  { %v6920_v12 = vadd.f32 %v2270_v13, %v2269_v4  ;;  %v7045_v13 = vpack.c.bf16 %v2554_v54, %v2553_v44  ;;  %v2556_v4 = vld [vmem:[%s7220_s1 + $0x1b0] sm:$0xff] }
 0x6a6   :  { %v7065_v31 = vpack.c.bf16 %v2556_v4, %v2555_v58  ;;  %v2557_v61 = vld [vmem:[%s7220_s1 + $0x1d0] sm:$0xff] }
 0x6a7   :  { %5587 = vtanh.f32 %v6920_v12  ;;  %2277 = vst [vmem:[#allocation6 + $0x28] sm:$0xff] %v6920_v12  ;;  %v2558_v26 = vld [vmem:[%s7220_s1 + $0x1f0] sm:$0xff] }
 0x6b1   :  { %v5588_v52 = vpop.eup %5587 }
 0x6b2   :  { %v6943_v19 = vmul.f32 %v5588_v52, %v2259_v34  ;;  %v7083_v34 = vpack.c.bf16 %v2470_v62, %v2469_v48  ;;  %v7085_v52 = vpack.c.bf16 %v2558_v26, %v2557_v61 }
 0x6b4   :  { %2275 = vst [vmem:[#allocation4 + $0x28] sm:$0xff] %v6943_v19  ;;  %4507 = vmatmul.mubr.f32.vlgmr.msra.gmra.mrb[24].mxu0 %v6943_v19  ;;  %4542 = vmatmul.mubr.f32.vlgmr.msra.gmra.mrb[24].mxu1 %v6943_v19 }
 0x6b5   :  { %5380 = vmatpush3.bf16.msra.mxu0 %v6936_v47  ;;  %5404 = vmatpush3.bf16.msra.mxu1 %v6938_v59 }
 0x6b6   :  { %5381 = vmatprep.subr.bf16.mxu0 %v5657_v3  ;;  %5405 = vmatprep.subr.bf16.mxu1 %v5657_v3 }
 0x6b7   :  { %4576 = vmatprep.mubr.msk.f32.mxu0 %vm5658_vm0, %v5659_v11  ;;  %4611 = vmatprep.mubr.msk.f32.mxu1 %vm5658_vm0, %v5659_v11 }
 0x6b9   :  { %5383 = vmatpush3.bf16.msra.mxu0 %v6959_v50  ;;  %5407 = vmatpush3.bf16.msra.mxu1 %v6961_v2 }
 0x6ba   :  { %5384 = vmatprep.subr.bf16.mxu0 %v5657_v3  ;;  %5408 = vmatprep.subr.bf16.mxu1 %v5657_v3 }
 0x6bd   :  { %5386 = vmatpush3.bf16.msra.mxu0 %v6983_v28  ;;  %5410 = vmatpush3.bf16.msra.mxu1 %v6985_v35 }
 0x6be   :  { %5387 = vmatprep.subr.bf16.mxu0 %v5657_v3  ;;  %5411 = vmatprep.subr.bf16.mxu1 %v5657_v3 }
 0x6c1   :  { %5389 = vmatpush3.bf16.msra.mxu0 %v7003_v33  ;;  %5413 = vmatpush3.bf16.msra.mxu1 %v7005_v41 }
 0x6c2   :  { %5390 = vmatprep.subr.bf16.mxu0 %v5657_v3  ;;  %5414 = vmatprep.subr.bf16.mxu1 %v5657_v3 }
 0x6c5   :  { %5392 = vmatpush3.bf16.msra.mxu0 %v7023_v14  ;;  %5416 = vmatpush3.bf16.msra.mxu1 %v7025_v29 }
 0x6c6   :  { %5393 = vmatprep.subr.bf16.mxu0 %v5657_v3  ;;  %5417 = vmatprep.subr.bf16.mxu1 %v5657_v3 }
 0x6c9   :  { %5395 = vmatpush3.bf16.msra.mxu0 %v7043_v57  ;;  %5419 = vmatpush3.bf16.msra.mxu1 %v7045_v13 }
 0x6ca   :  { %5396 = vmatprep.subr.bf16.mxu0 %v5657_v3  ;;  %5420 = vmatprep.subr.bf16.mxu1 %v5657_v3 }
 0x6cd   :  { %5398 = vmatpush3.bf16.msra.mxu0 %v7063_v42  ;;  %5422 = vmatpush3.bf16.msra.mxu1 %v7065_v31 }
 0x6ce   :  { %5399 = vmatprep.subr.bf16.mxu0 %v5657_v3  ;;  %5423 = vmatprep.subr.bf16.mxu1 %v5657_v3 }
 0x6d1   :  { %5401 = vmatpush3.bf16.msra.mxu0 %v7083_v34  ;;  %5425 = vmatpush3.bf16.msra.mxu1 %v7085_v52 }
 0x6d2   :  { %5426 = vmatprep.subr.bf16.mxu0 %v5657_v3  ;;  %5450 = vmatprep.subr.bf16.mxu1 %v5657_v3 }
 0x6d4   :  { %4577 = vmatmul.mubr.f32.vlgmr.msra.gmra.mrb[26].mxu0 %v6943_v19  ;;  %4612 = vmatmul.mubr.f32.vlgmr.msra.gmra.mrb[26].mxu1 %v6943_v19  ;;  %v3082_v19 = vld [vmem:[%s7219_s0 + $0xd8] sm:$0xff] }
 0x6d5   :  { %5428 = vmatpush3.bf16.msra.mxu0 %v6756_v63  ;;  %5452 = vmatpush3.bf16.msra.mxu1 %v6761_v17 }
 0x6d6   :  { %5429 = vmatprep.subr.bf16.mxu0 %v5657_v3  ;;  %5453 = vmatprep.subr.bf16.mxu1 %v5657_v3 }
 0x6d7   :  { %4646 = vmatprep.mubr.msk.f32.mxu0 %vm5658_vm0, %v5659_v11  ;;  %4681 = vmatprep.mubr.msk.f32.mxu1 %vm5658_vm0, %v5659_v11 }
 0x6d9   :  { %5431 = vmatpush3.bf16.msra.mxu0 %v6776_v15  ;;  %5455 = vmatpush3.bf16.msra.mxu1 %v6781_v51 }
 0x6da   :  { %5432 = vmatprep.subr.bf16.mxu0 %v5657_v3  ;;  %5456 = vmatprep.subr.bf16.mxu1 %v5657_v3 }
 0x6dd   :  { %5434 = vmatpush3.bf16.msra.mxu0 %v6796_v18  ;;  %5458 = vmatpush3.bf16.msra.mxu1 %v6801_v45  ;;  %v3083_v18 = vld [vmem:[%s7219_s0 + $0xc0] sm:$0xff] }
 0x6de   :  { %5435 = vmatprep.subr.bf16.mxu0 %v5657_v3  ;;  %5459 = vmatprep.subr.bf16.mxu1 %v5657_v3 }
 0x6e1   :  { %5437 = vmatpush3.bf16.msra.mxu0 %v6816_v22  ;;  %5461 = vmatpush3.bf16.msra.mxu1 %v6821_v36  ;;  %v3084_v36 = vld [vmem:[%s7219_s0 + $0xc8] sm:$0xff] }
 0x6e2   :  { %5438 = vmatprep.subr.bf16.mxu0 %v5657_v3  ;;  %5462 = vmatprep.subr.bf16.mxu1 %v5657_v3 }
 0x6e5   :  { %5440 = vmatpush3.bf16.msra.mxu0 %v6836_v49  ;;  %5464 = vmatpush3.bf16.msra.mxu1 %v6841_v6  ;;  %v3085_v49 = vld [vmem:[%s7219_s0 + $0xd0] sm:$0xff] }
 0x6e6   :  { %5441 = vmatprep.subr.bf16.mxu0 %v5657_v3  ;;  %5465 = vmatprep.subr.bf16.mxu1 %v5657_v3 }
 0x6e9   :  { %5443 = vmatpush3.bf16.msra.mxu0 %v6856_v39  ;;  %5467 = vmatpush3.bf16.msra.mxu1 %v6861_v53 }
 0x6ea   :  { %5444 = vmatprep.subr.bf16.mxu0 %v5657_v3  ;;  %5468 = vmatprep.subr.bf16.mxu1 %v5657_v3 }
 0x6ed   :  { %5446 = vmatpush3.bf16.msra.mxu0 %v6873_v25  ;;  %5470 = vmatpush3.bf16.msra.mxu1 %v6880_v43 }
 0x6ee   :  { %5447 = vmatprep.subr.bf16.mxu0 %v5657_v3  ;;  %5471 = vmatprep.subr.bf16.mxu1 %v5657_v3 }
 0x6f1   :  { %5449 = vmatpush3.bf16.msra.mxu0 %v6896_v7  ;;  %5473 = vmatpush3.bf16.msra.mxu1 %v6900_v9 }
 0x6f2   :  { %5474 = vmatprep.subr.bf16.mxu0 %v5657_v3  ;;  %5498 = vmatprep.subr.bf16.mxu1 %v5657_v3 }
 0x787   :  { %v2360_v63 = vpop.f32.mrb[24].mxu0  ;;  %v2449_v17 = vpop.f32.mrb[24].mxu1 }
 0x788   :  { %v4508_v15 = vpop.f32.mrb[25].mxu0  ;;  %v4543_v51 = vpop.f32.mrb[25].mxu1  ;;  %v2454_v45 = vadd.f32 %v3083_v18, %v2449_v17  ;;  %v2366_v37 = vadd.f32 %v3082_v19, %v2360_v63 }
 0x78a   :  { %v2635_v22 = vmul.f32 0.5, %v2454_v45  ;;  %v2631_v1 = vmul.f32 0.5, %v2366_v37 }
 0x78c   :  { %5589 = vtanh.f32 %v2635_v22 }
 0x796   :  { %v5590_v8 = vpop.eup %5589 }
 0x797   :  { %v2637_v0 = vmul.f32 0.5, %v5590_v8 }
 0x799   :  { %v2638_v10 = vadd.f32 0.5, %v2637_v0 }
 0x7a7   :  { %v2537_v6 = vpop.f32.mrb[26].mxu0  ;;  %v2625_v39 = vpop.f32.mrb[26].mxu1 }
 0x7a8   :  { %v2542_v53 = vadd.f32 %v3084_v36, %v2537_v6  ;;  %v2630_v25 = vadd.f32 %v3085_v49, %v2625_v39  ;;  %v4578_v43 = vpop.f32.mrb[27].mxu0  ;;  %v4613_v7 = vpop.f32.mrb[27].mxu1 }
 0x7aa   :  { %v2639_v9 = vmul.f32 0.5, %v2542_v53  ;;  %5591 = vtanh.f32 %v2630_v25 }
 0x7ac   :  { %5593 = vtanh.f32 %v2639_v9 }
 0x7ad   :  { %5595 = vtanh.f32 %v2631_v1 }
 0x7b4   :  { %v5592_v20 = vpop.eup %5591 }
 0x7b5   :  { %v2645_v21 = vmul.f32 %v5592_v20, %v2638_v10 }
 0x7b6   :  { %v5594_v27 = vpop.eup %5593 }
 0x7b7   :  { %v2641_v55 = vmul.f32 0.5, %v5594_v27  ;;  %v5596_v38 = vpop.eup %5595 }
 0x7b8   :  { %v2633_v24 = vmul.f32 0.5, %v5596_v38 }
 0x7b9   :  { %v2642_v56 = vadd.f32 0.5, %v2641_v55 }
 0x7ba   :  { %v2634_v30 = vadd.f32 0.5, %v2633_v24 }
 0x7bb   :  { %v2644_v16 = vmul.f32 %v2642_v56, %v6920_v12 }
 0x7bd   :  { %v7144_v23 = vadd.f32 %v2645_v21, %v2644_v16 }
 0x7bf   :  { %5597 = vtanh.f32 %v7144_v23  ;;  %2652 = vst [vmem:[#allocation6 + $0x30] sm:$0xff] %v7144_v23 }
 0x7c9   :  { %v5598_v60 = vpop.eup %5597 }
 0x7ca   :  { %v2648_v32 = vmul.f32 %v5598_v60, %v2634_v30 }
 0x7cc   :  { %2650 = vst [vmem:[#allocation4 + $0x30] sm:$0xff] %v2648_v32  ;;  %4647 = vmatmul.mubr.f32.vlgmr.msra.gmra.mrb[28].mxu0 %v2648_v32  ;;  %4682 = vmatmul.mubr.f32.vlgmr.msra.gmra.mrb[28].mxu1 %v2648_v32 }
 0x7cd   :  { %5476 = vmatpush3.bf16.msra.mxu0 %v6936_v47  ;;  %5500 = vmatpush3.bf16.msra.mxu1 %v6938_v59 }
 0x7ce   :  { %5477 = vmatprep.subr.bf16.mxu0 %v5657_v3  ;;  %5501 = vmatprep.subr.bf16.mxu1 %v5657_v3 }
 0x7cf   :  { %4716 = vmatprep.mubr.msk.f32.mxu0 %vm5658_vm0, %v5659_v11  ;;  %4751 = vmatprep.mubr.msk.f32.mxu1 %vm5658_vm0, %v5659_v11 }
 0x7d1   :  { %5479 = vmatpush3.bf16.msra.mxu0 %v6959_v50  ;;  %5503 = vmatpush3.bf16.msra.mxu1 %v6961_v2  ;;  %v3087_v50 = vld [vmem:[%s7219_s0 + $0xe0] sm:$0xff] }
 0x7d2   :  { %5480 = vmatprep.subr.bf16.mxu0 %v5657_v3  ;;  %5504 = vmatprep.subr.bf16.mxu1 %v5657_v3 }
 0x7d5   :  { %5482 = vmatpush3.bf16.msra.mxu0 %v6983_v28  ;;  %5506 = vmatpush3.bf16.msra.mxu1 %v6985_v35  ;;  %v3089_v35 = vld [vmem:[%s7219_s0 + $0xf0] sm:$0xff] }
 0x7d6   :  { %5483 = vmatprep.subr.bf16.mxu0 %v5657_v3  ;;  %5507 = vmatprep.subr.bf16.mxu1 %v5657_v3 }
 0x7d9   :  { %5485 = vmatpush3.bf16.msra.mxu0 %v7003_v33  ;;  %5509 = vmatpush3.bf16.msra.mxu1 %v7005_v41 }
 0x7da   :  { %5486 = vmatprep.subr.bf16.mxu0 %v5657_v3  ;;  %5510 = vmatprep.subr.bf16.mxu1 %v5657_v3 }
 0x7dd   :  { %5488 = vmatpush3.bf16.msra.mxu0 %v7023_v14  ;;  %5512 = vmatpush3.bf16.msra.mxu1 %v7025_v29 }
 0x7de   :  { %5489 = vmatprep.subr.bf16.mxu0 %v5657_v3  ;;  %5513 = vmatprep.subr.bf16.mxu1 %v5657_v3 }
 0x7e1   :  { %5491 = vmatpush3.bf16.msra.mxu0 %v7043_v57  ;;  %5515 = vmatpush3.bf16.msra.mxu1 %v7045_v13  ;;  %v3086_v13 = vld [vmem:[%s7219_s0 + $0xf8] sm:$0xff] }
 0x7e2   :  { %5492 = vmatprep.subr.bf16.mxu0 %v5657_v3  ;;  %5516 = vmatprep.subr.bf16.mxu1 %v5657_v3 }
 0x7e5   :  { %5494 = vmatpush3.bf16.msra.mxu0 %v7063_v42  ;;  %5518 = vmatpush3.bf16.msra.mxu1 %v7065_v31 }
 0x7e6   :  { %5495 = vmatprep.subr.bf16.mxu0 %v5657_v3  ;;  %5519 = vmatprep.subr.bf16.mxu1 %v5657_v3  ;;  %v3088_v3 = vld [vmem:[%s7219_s0 + $0xe8] sm:$0xff]  ;;  %s5609_s0 = scalar_lea.vmem %s3048_s19, 1024 }
 0x7e7   :  { %p5610_p0 = scmp.ne.s32.totalorder %s3048_s19, %s5609_s0  ;;  %p5615_p2 = scmp.lt.s32.totalorder %s5609_s0, %s5609_s0 }
 0x7e9   :  { %5497 = vmatpush3.bf16.msra.mxu0 %v7083_v34  ;;  %5521 = vmatpush3.bf16.msra.mxu1 %v7085_v52  ;;  %p5616_p3 = por %p5615_p2, %p5614_p1 }
 0x7eb   :  { %p5617_p4 = pnand %p5616_p3, %p5610_p0 }
 0x7ec   :  { %4717 = vmatmul.mubr.f32.vlgmr.msra.gmra.mrb[30].mxu0 %v2648_v32  ;;  %4752 = vmatmul.mubr.f32.vlgmr.msra.gmra.mrb[30].mxu1 %v2648_v32 }
 0x89f   :  { %v2735_v11 = vpop.f32.mrb[28].mxu0  ;;  %v2824_v12 = vpop.f32.mrb[28].mxu1 }
 0x8a0   :  { %v4648_v47 = vpop.f32.mrb[29].mxu0  ;;  %v4683_v59 = vpop.f32.mrb[29].mxu1  ;;  %v2829_v2 = vadd.f32 %v3087_v50, %v2824_v12  ;;  %v2741_v40 = vadd.f32 %v3086_v13, %v2735_v11 }
 0x8a2   :  { %v3010_v28 = vmul.f32 0.5, %v2829_v2  ;;  %v3006_v58 = vmul.f32 0.5, %v2741_v40 }
 0x8a4   :  { %5599 = vtanh.f32 %v3010_v28 }
 0x8ae   :  { %v5600_v57 = vpop.eup %5599 }
 0x8af   :  { %v3012_v46 = vmul.f32 0.5, %v5600_v57 }
 0x8b1   :  { %v3013_v4 = vadd.f32 0.5, %v3012_v46 }
 0x8bf   :  { %v2912_v33 = vpop.f32.mrb[30].mxu0  ;;  %v3000_v41 = vpop.f32.mrb[30].mxu1 }
 0x8c0   :  { %v2917_v14 = vadd.f32 %v3088_v3, %v2912_v33  ;;  %v3005_v29 = vadd.f32 %v3089_v35, %v3000_v41  ;;  %v4718_v5 = vpop.f32.mrb[31].mxu0  ;;  %v4753_v44 = vpop.f32.mrb[31].mxu1 }
 0x8c2   :  { %v3014_v54 = vmul.f32 0.5, %v2917_v14  ;;  %5601 = vtanh.f32 %v3005_v29 }
 0x8c4   :  { %5603 = vtanh.f32 %v3014_v54 }
 0x8c5   :  { %5605 = vtanh.f32 %v3006_v58 }
 0x8cc   :  { %v5602_v42 = vpop.eup %5601 }
 0x8cd   :  { %v3020_v31 = vmul.f32 %v5602_v42, %v3013_v4 }
 0x8ce   :  { %v5604_v48 = vpop.eup %5603 }
 0x8cf   :  { %v3016_v62 = vmul.f32 0.5, %v5604_v48 }
 0x8d1   :  { %v3017_v61 = vadd.f32 0.5, %v3016_v62 }
 0x8d3   :  { %v3019_v26 = vmul.f32 %v3017_v61, %v7144_v23 }
 0x8d5   :  { %v3021_v34 = vadd.f32 %v3020_v31, %v3019_v26 }
 0x8d7   :  { %5607 = vtanh.f32 %v3021_v34  ;;  %3027 = vst [vmem:[#allocation6 + $0x38] sm:$0xff] %v3021_v34 }
 0x8d8   :  { %5620 = shalt.err (!%p5617_p4)
}
 0x8d9   :  { %s5621_s21 = scalar_lea.hbm %s7224_s5, 1024 }
 0x8da   :  { %p5622_p5 = scmp.ne.s32.totalorder %s7224_s5, %s5621_s21  ;;  %p5625_p6 = scmp.lt.u32.totalorder %s5621_s21, %s7224_s5 }
 0x8dc   :  { %p5627_p7 = pnand %p5625_p6, %p5622_p5 }
 0x8de   :  { %5630 = shalt.err (!%p5627_p7)
}
 0x8df   :  { %s5661_s26 = smov 128   ;;  %s5662_s27 = smov 8   ;;  %v5606_v52 = vpop.eup %5605 }
 0x8e0   :  { %3053 = dma.vmem_to_hbm [thread:$0]  %s3048_s19, 1024, %s7224_s5, [#allocation7], %s5661_s26, %s5661_s26, %s5662_s27   ;;  %v3008_v63 = vmul.f32 0.5, %v5606_v52 }
 0x8e1   :  { %s5663_s29 = smov [#allocation4]   ;;  %v5608_v15 = vpop.eup %5607 }
 0x8e2   :  { %s3035_s3 = sshll.u32 %s5663_s29, 4  ;;  %v3009_v17 = vadd.f32 0.5, %v3008_v63  ;;  %s3036_s3 = int_to_ptr.vmem [resolvable:$true] %s3035_s3 }
 0x8e3   :  { %s5631_s30 = scalar_lea.vmem %s3036_s3, 1024  ;;  %p5636_p9 = scmp.lt.s32.totalorder %s3036_s3, %s3036_s3 }
 0x8e4   :  { %v3023_v51 = vmul.f32 %v5608_v15, %v3009_v17  ;;  %p5632_p8 = scmp.ne.s32.totalorder %s3036_s3, %s5631_s30  ;;  %p5637_p10 = scmp.lt.s32.totalorder %s5631_s30, %s5631_s30 }
 0x8e6   :  { %3025 = vst [vmem:[#allocation4 + $0x38] sm:$0xff] %v3023_v51  ;;  %p5638_p11 = por %p5637_p10, %p5636_p9 }
 0x8e8   :  { %p5639_p12 = pnand %p5638_p11, %p5632_p8 }
 0x8ea   :  { %5642 = shalt.err (!%p5639_p12)
}
 0x8eb   :  { %s5643_s5 = scalar_lea.hbm %s7223_s4, 1024 }
 0x8ec   :  { %p5644_p13 = scmp.ne.s32.totalorder %s7223_s4, %s5643_s5  ;;  %p5647_p0 = scmp.lt.u32.totalorder %s5643_s5, %s7223_s4 }
 0x8ee   :  { %p5649_p1 = pnand %p5647_p0, %p5644_p13 }
 0x8f0   :  { %5652 = shalt.err (!%p5649_p1)
}
 0x8f1   :  { %3041 = dma.vmem_to_hbm [thread:$0]  %s3036_s3, 1024, %s7223_s4, [#allocation5], %s5661_s26, %s5661_s26, %s5662_s27  }
 0x8f2   :  { %5653 = dma.done.wait [#allocation5], 1024  }
 0x8f3   :  { %5654 = vsyncadd [#allocation5], 4294966272 }
 0x8f4   :  { %5655 = dma.done.wait [#allocation7], 1024  }
 0x8f5   :  { %5656 = vsyncadd [#allocation7], 4294966272 }
 0x8f6   :  { %3060 = vsyncpa [#allocation5], 1 }
 0x8f7   :  { %3061 = vsyncpa [#allocation7], 1 }

</bundles_post_ra>
